<compile_context>
chip_gen: v5e
topology: v5e:2x2
jax: 0.10.0
libtpu: 0.0.40
codegen_flags: <defaults>
</compile_context>

<pallas_src>
import math

import jax
import jax.numpy as jnp
from jax.experimental import pallas as pl
from jax.experimental.pallas import tpu as pltpu


# --------------------------------------------------------------------------- #
# Kernel
# --------------------------------------------------------------------------- #
def _make_kernel(*, num_heads: int, head_group: int, batch_block: int,
                 seq_len: int, kv_block: int, eps: float = 1e-5,
                 dot_dtype=jnp.bfloat16):
    Bb, S, hg = batch_block, seq_len, head_group
    n_groups = num_heads // hg

    def kernel(x_ref,
               wqkv_ref, bqkv_ref,          # packed in_proj, pre-transposed (E, 3E), (1, 3E)
               wo_ref, bo_ref,              # out_proj, pre-transposed       (E, E),  (1, E)
               w1_ref, b1_ref,              # linear1, pre-transposed        (E, H),  (1, H)
               w2_ref, b2_ref,              # linear2, pre-transposed        (H, E),  (1, E)
               g1_ref, be1_ref,             # norm1 gamma/beta               (1, E)
               g3_ref, be3_ref,             # norm3 gamma/beta               (1, E)
               o_ref,
               attn_sc):                    # VMEM scratch (M, E) bf16: concat of head outputs
        M, E = x_ref.shape                  # M = batch_block * seq_len
        d = E // num_heads
        scale = 1.0 / math.sqrt(d)

        x = x_ref[...]
        x32 = x.astype(jnp.float32)

        # Fused QKV projection: bf16 operands on the MXU, f32 accumulation + bias.
        qkv = jnp.dot(x.astype(dot_dtype), wqkv_ref[...],
                      preferred_element_type=jnp.float32) + bqkv_ref[...]
        qkv = qkv.astype(dot_dtype)         # bf16 operands for the attention matmuls

        def attention_group(qg, kg, vg):
            """qg/kg/vg: (Z, S, d) bf16 -> (Z, S, d) f32 softmax(QK^T/sqrt(d)) V."""
            Z = qg.shape[0]
            if kv_block < S:
                # Flash-style streaming softmax over key blocks: caps live VMEM at
                # (Z, S, kv_block) scores instead of (Z, S, S).
                m_run = jnp.full((Z, S, 1), -1e30, jnp.float32)
                l_run = jnp.zeros((Z, S, 1), jnp.float32)
                acc = jnp.zeros((Z, S, d), jnp.float32)
                off = 0
                while off < S:                       # static Python loop (S, kv_block static)
                    tk = min(kv_block, S - off)
                    kb = kg[:, off:off + tk]
                    vb = vg[:, off:off + tk]
                    s = jnp.einsum("zqd,zkd->zqk", qg, kb,
                                   preferred_element_type=jnp.float32) * scale
                    m_new = jnp.maximum(m_run, jnp.max(s, axis=-1, keepdims=True))
                    alpha = jnp.exp(m_run - m_new)
                    p = jnp.exp(s - m_new)
                    l_run = alpha * l_run + jnp.sum(p, axis=-1, keepdims=True)
                    acc = acc * alpha + jnp.einsum(
                        "zqk,zkd->zqd", p.astype(dot_dtype), vb,
                        preferred_element_type=jnp.float32)
                    m_run = m_new
                    off += tk
                return acc * pl.reciprocal(l_run, approx=True)
            else:
                s = jnp.einsum("zqd,zkd->zqk", qg, kg,
                               preferred_element_type=jnp.float32) * scale
                s = s - jnp.max(s, axis=-1, keepdims=True)
                p = jnp.exp(s)
                p = p * pl.reciprocal(jnp.sum(p, axis=-1, keepdims=True), approx=True)
                return jnp.einsum("zqk,zkd->zqd", p.astype(dot_dtype), vg,
                                  preferred_element_type=jnp.float32)

        if hg == 1:
            # Transpose-free per-head path (robust fallback / d >= 128 case).
            for h in range(num_heads):
                lo = h * d
                qg = qkv[:, lo:lo + d].reshape(Bb, S, d)
                kg = qkv[:, E + lo:E + lo + d].reshape(Bb, S, d)
                vg = qkv[:, 2 * E + lo:2 * E + lo + d].reshape(Bb, S, d)
                og = attention_group(qg, kg, vg)                       # (Bb, S, d) f32
                attn_sc[:, lo:lo + d] = og.reshape(M, d).astype(dot_dtype)
        else:
            # Grouped-head path: hg heads per iteration -> wider MXU N dim in the
            # PV matmul and independent work for the scheduler (EUP/MXU overlap).
            def to_heads(t2d):
                # (M, E_slice) -> (num_heads*Bb, S, d), leading index = h*Bb + b
                return jnp.transpose(
                    t2d.reshape(Bb, S, num_heads, d), (2, 0, 1, 3)
                ).reshape(num_heads * Bb, S, d)

            qh = to_heads(qkv[:, :E])
            kh = to_heads(qkv[:, E:2 * E])
            vh = to_heads(qkv[:, 2 * E:])
            Z = hg * Bb
            for g in range(n_groups):
                z0 = g * Z
                og = attention_group(qh[z0:z0 + Z], kh[z0:z0 + Z], vh[z0:z0 + Z])
                # (hg, Bb, S, d) -> (Bb, S, hg, d) -> (M, hg*d): this group's columns
                # of the concatenated multi-head output.
                og = jnp.transpose(og.reshape(hg, Bb, S, d),
                                   (1, 2, 0, 3)).reshape(M, hg * d)
                attn_sc[:, g * hg * d:(g + 1) * hg * d] = og.astype(dot_dtype)

        # Single full-depth (K = E) output projection after the head loop.
        attn = jnp.dot(attn_sc[...], wo_ref[...],
                       preferred_element_type=jnp.float32) + bo_ref[...]

        def layer_norm(y, gamma, beta):
            mu = jnp.mean(y, axis=-1, keepdims=True)
            yc = y - mu
            var = jnp.mean(yc * yc, axis=-1, keepdims=True)
            return yc * jax.lax.rsqrt(var + eps) * gamma + beta

        # Residual + LayerNorm1 (dropout identity in eval mode).
        x1 = layer_norm(x32 + attn, g1_ref[...], be1_ref[...])

        # Feed-forward: linear2(relu(linear1(x1))); bf16 MXU operands, f32 accum.
        hdn = jnp.maximum(
            jnp.dot(x1.astype(dot_dtype), w1_ref[...],
                    preferred_element_type=jnp.float32) + b1_ref[...], 0.0)
        ff = jnp.dot(hdn.astype(dot_dtype), w2_ref[...],
                     preferred_element_type=jnp.float32) + b2_ref[...]

        # Residual + LayerNorm3.
        x2 = layer_norm(x1 + ff, g3_ref[...], be3_ref[...])
        o_ref[...] = x2.astype(o_ref.dtype)

    return kernel


# --------------------------------------------------------------------------- #
# Wrapper helpers
# --------------------------------------------------------------------------- #
def prepare_params(params, dot_dtype=jnp.bfloat16):
    """One-time weight prep (call OUTSIDE the per-forward path): transpose PyTorch
    (out,in) weights to (in,out) and cast matmul weights to bf16."""
    return {
        "wqkv_t": params["wqkv"].T.astype(dot_dtype),   # (E, 3E)
        "bqkv":   params["bqkv"].astype(jnp.float32),   # (1, 3E)
        "wo_t":   params["wo"].T.astype(dot_dtype),     # (E, E)
        "bo":     params["bo"].astype(jnp.float32),     # (1, E)
        "w1_t":   params["w1"].T.astype(dot_dtype),     # (E, H)
        "b1":     params["b1"].astype(jnp.float32),     # (1, H)
        "w2_t":   params["w2"].T.astype(dot_dtype),     # (H, E)
        "b2":     params["b2"].astype(jnp.float32),     # (1, E)
        "g1":     params["g1"].astype(jnp.float32),
        "be1":    params["be1"].astype(jnp.float32),
        "g3":     params["g3"].astype(jnp.float32),
        "be3":    params["be3"].astype(jnp.float32),
    }


def _pick_batch_block(B, S, target_rows=512):
    """Largest divisor of B keeping M=bb*S a multiple of 8 (or full), M<=target_rows,
    preferring >=2 grid steps (megacore / pipelining)."""
    valid = [bb for bb in range(1, B + 1)
             if B % bb == 0 and ((bb * S) % 8 == 0 or bb == B)]
    pref = [bb for bb in valid if B // bb >= 2] or valid
    within = [bb for bb in pref if bb * S <= target_rows]
    return max(within) if within else min(pref)


def _pick_head_group(num_heads, d, cap=4):
    """Group heads so hg*d >= 128 lanes where possible (cap 4), dividing num_heads."""
    hg = max(1, min(cap, max(1, 128 // max(d, 1))))
    hg = min(hg, num_heads)
    while num_heads % hg:
        hg -= 1
    return max(hg, 1)


def _vmem_limit_bytes(frac=0.75, fallback=64 * 1024 * 1024):
    try:
        info = pltpu.get_tpu_info()
        cap = getattr(info, "vmem_capacity_bytes", 0)
        if cap:
            return int(cap * frac)
    except Exception:
        pass
    return fallback


# --------------------------------------------------------------------------- #
# Public entry point
# --------------------------------------------------------------------------- #
def custom_transformer_encoder_layer(x, prepared, *, num_heads, batch_block=None,
                                     kv_block=None, head_group=None):
    """x: (B, S, E) -> (B, S, E). `prepared` comes from prepare_params()."""
    B, S, E = x.shape
    H = prepared["w1_t"].shape[1]
    assert E % num_heads == 0, "embedding_dim must be divisible by num_heads"
    d = E // num_heads

    if batch_block is None:
        batch_block = _pick_batch_block(B, S)
    assert B % batch_block == 0
    M = batch_block * S
    assert (M % 8 == 0) or (batch_block == B), "row block must satisfy (8,128) tiling"

    if head_group is None:
        head_group = _pick_head_group(num_heads, d)
    else:
        while num_heads % head_group:
            head_group -= 1
        head_group = max(head_group, 1)

    if kv_block is None:
        # Flash-tile keys for long sequences; full softmax otherwise.
        kv_block = 256 if S >= 512 else S

    x2d = x.reshape(B * S, E)

    def run(hg, single_buffer_consts):
        kernel = _make_kernel(num_heads=num_heads, head_group=hg,
                              batch_block=batch_block, seq_len=S, kv_block=kv_block)
        if single_buffer_consts:
            const = lambda shape: pl.BlockSpec(shape, lambda i: (0, 0),
                                               pipeline_mode=pl.Buffered(1))
        else:
            const = lambda shape: pl.BlockSpec(shape, lambda i: (0, 0))
        in_specs = [
            pl.BlockSpec((M, E), lambda i: (i, 0)),     # x (flattened rows)
            const((E, 3 * E)), const((1, 3 * E)),       # in_proj
            const((E, E)), const((1, E)),               # out_proj
            const((E, H)), const((1, H)),               # linear1
            const((H, E)), const((1, E)),               # linear2
            const((1, E)), const((1, E)),               # norm1
            const((1, E)), const((1, E)),               # norm3
        ]
        return pl.pallas_call(
            kernel,
            out_shape=jax.ShapeDtypeStruct((B * S, E), x.dtype),
            grid_spec=pltpu.PrefetchScalarGridSpec(
                num_scalar_prefetch=0,
                grid=(B // batch_block,),
                in_specs=in_specs,
                out_specs=pl.BlockSpec((M, E), lambda i: (i, 0)),
                scratch_shapes=[pltpu.VMEM((M, E), jnp.bfloat16)],
            ),
            compiler_params=pltpu.CompilerParams(
                dimension_semantics=("parallel",),
                vmem_limit_bytes=_vmem_limit_bytes(),
            ),
        )(x2d, prepared["wqkv_t"], prepared["bqkv"], prepared["wo_t"], prepared["bo"],
          prepared["w1_t"], prepared["b1"], prepared["w2_t"], prepared["b2"],
          prepared["g1"], prepared["be1"], prepared["g3"], prepared["be3"])

    # Graceful degradation: grouped heads + single-buffered constants preferred;
    # fall back to default buffering and/or the per-head path if lowering rejects.
    attempts = []
    for hg_try in dict.fromkeys([head_group, 1]):
        for buffered in (True, False):
            attempts.append((hg_try, buffered))
    last_err = None
    out = None
    for hg_try, buffered in attempts:
        try:
            out = run(hg_try, buffered)
            break
        except Exception as e:      # noqa: BLE001 - retry with a simpler config
            last_err = e
    if out is None:
        raise last_err

    return out.reshape(B, S, E)


# --------------------------------------------------------------------------- #
# Pure-JAX reference (same math, eval mode, no mask)
# --------------------------------------------------------------------------- #
def _reference(x, params, *, num_heads):
    B, S, E = x.shape
    d = E // num_heads
    wqkv, bqkv = params["wqkv"], params["bqkv"][0]
    q = x @ wqkv[:E].T + bqkv[:E]
    k = x @ wqkv[E:2 * E].T + bqkv[E:2 * E]
    v = x @ wqkv[2 * E:].T + bqkv[2 * E:]
    q = q.reshape(B, S, num_heads, d).transpose(0, 2, 1, 3)
    k = k.reshape(B, S, num_heads, d).transpose(0, 2, 1, 3)
    v = v.reshape(B, S, num_heads, d).transpose(0, 2, 1, 3)
    s = jnp.einsum("bhqd,bhkd->bhqk", q, k) / math.sqrt(d)
    p = jax.nn.softmax(s, axis=-1)
    o = jnp.einsum("bhqk,bhkd->bhqd", p, v).transpose(0, 2, 1, 3).reshape(B, S, E)
    attn = o @ params["wo"].T + params["bo"][0]

    def ln(y, g, b):
        mu = jnp.mean(y, -1, keepdims=True)
        var = jnp.mean((y - mu) ** 2, -1, keepdims=True)
        return (y - mu) / jnp.sqrt(var + 1e-5) * g[0] + b[0]

    x1 = ln(x + attn, params["g1"], params["be1"])
    ff = jnp.maximum(x1 @ params["w1"].T + params["b1"][0], 0.0) @ params["w2"].T + params["b2"][0]
    return ln(x1 + ff, params["g3"], params["be3"])


# --------------------------------------------------------------------------- #
# Self-test
# --------------------------------------------------------------------------- #
if __name__ == "__main__":
    NUM_HEADS = 4
    E, H = 32, 64

    key = jax.random.PRNGKey(0)
    ks = jax.random.split(key, 10)

    params = {
        "wqkv": 0.02 * jax.random.normal(ks[0], (3 * E, E), jnp.float32),
        "bqkv": 0.01 * jax.random.normal(ks[1], (1, 3 * E), jnp.float32),
        "wo":   0.02 * jax.random.normal(ks[2], (E, E), jnp.float32),
        "bo":   0.01 * jax.random.normal(ks[3], (1, E), jnp.float32),
        "w1":   0.02 * jax.random.normal(ks[4], (H, E), jnp.float32),
        "b1":   0.01 * jax.random.normal(ks[5], (1, H), jnp.float32),
        "w2":   0.02 * jax.random.normal(ks[6], (E, H), jnp.float32),
        "b2":   jnp.zeros((1, E), jnp.float32),
        "g1":   jnp.ones((1, E), jnp.float32),
        "be1":  jnp.zeros((1, E), jnp.float32),
        "g3":   jnp.ones((1, E), jnp.float32),
        "be3":  jnp.zeros((1, E), jnp.float32),
    }
    prepared = prepare_params(params)   # one-time transpose + bf16 cast

    # Test 1: small shapes, full-softmax path (B=2, S=8, E=32).
    B, S = 2, 8
    x = jax.random.normal(ks[7], (B, S, E), jnp.float32)
    out = custom_transformer_encoder_layer(x, prepared, num_heads=NUM_HEADS)
    out = jax.block_until_ready(out)
    ref = _reference(x, params, num_heads=NUM_HEADS)
    assert out.shape == (B, S, E)
    assert jnp.allclose(out, ref, rtol=2e-2, atol=2e-2), "mismatch vs reference (full path)"

    # Test 2: exercise the flash-style key-block tiling path (B=2, S=64, kv_block=16).
    B2, S2 = 2, 64
    x2 = jax.random.normal(ks[8], (B2, S2, E), jnp.float32)
    out2 = custom_transformer_encoder_layer(x2, prepared, num_heads=NUM_HEADS, kv_block=16)
    out2 = jax.block_until_ready(out2)
    ref2 = _reference(x2, params, num_heads=NUM_HEADS)
    assert out2.shape == (B2, S2, E)
    assert jnp.allclose(out2, ref2, rtol=2e-2, atol=2e-2), "mismatch vs reference (flash path)"

    print("KERNEL_OK")
</pallas_src>

<mosaic_0001>
module attributes {stable_mosaic.version = 11 : i64} {
  func.func @kernel(%arg0: i32, %arg1: memref<8x32xf32, #tpu.memory_space<vmem>>, %arg2: memref<32x96xbf16, #tpu.memory_space<vmem>>, %arg3: memref<1x96xf32, #tpu.memory_space<vmem>>, %arg4: memref<32x32xbf16, #tpu.memory_space<vmem>>, %arg5: memref<1x32xf32, #tpu.memory_space<vmem>>, %arg6: memref<32x64xbf16, #tpu.memory_space<vmem>>, %arg7: memref<1x64xf32, #tpu.memory_space<vmem>>, %arg8: memref<64x32xbf16, #tpu.memory_space<vmem>>, %arg9: memref<1x32xf32, #tpu.memory_space<vmem>>, %arg10: memref<1x32xf32, #tpu.memory_space<vmem>>, %arg11: memref<1x32xf32, #tpu.memory_space<vmem>>, %arg12: memref<1x32xf32, #tpu.memory_space<vmem>>, %arg13: memref<1x32xf32, #tpu.memory_space<vmem>>, %arg14: memref<8x32xf32, #tpu.memory_space<vmem>>, %arg15: memref<8x32xbf16, #tpu.memory_space<vmem>>) attributes {dimension_semantics = [#tpu.dimension_semantics<parallel>], iteration_bounds = array<i64: 2>, scalar_prefetch = 0 : i64, scratch_operands = 1 : i64, tpu.core_type = #tpu.core_type<tc>, window_params = [{transform_indices = @transform_0, window_bounds = array<i64: 8, 32>}, {pipeline_mode = #tpu.pipeline_mode<synchronous>, transform_indices = @transform_1, window_bounds = array<i64: 32, 96>}, {pipeline_mode = #tpu.pipeline_mode<synchronous>, transform_indices = @transform_2, window_bounds = array<i64: 1, 96>}, {pipeline_mode = #tpu.pipeline_mode<synchronous>, transform_indices = @transform_3, window_bounds = array<i64: 32, 32>}, {pipeline_mode = #tpu.pipeline_mode<synchronous>, transform_indices = @transform_4, window_bounds = array<i64: 1, 32>}, {pipeline_mode = #tpu.pipeline_mode<synchronous>, transform_indices = @transform_5, window_bounds = array<i64: 32, 64>}, {pipeline_mode = #tpu.pipeline_mode<synchronous>, transform_indices = @transform_6, window_bounds = array<i64: 1, 64>}, {pipeline_mode = #tpu.pipeline_mode<synchronous>, transform_indices = @transform_7, window_bounds = array<i64: 64, 32>}, {pipeline_mode = #tpu.pipeline_mode<synchronous>, transform_indices = @transform_8, window_bounds = array<i64: 1, 32>}, {pipeline_mode = #tpu.pipeline_mode<synchronous>, transform_indices = @transform_9, window_bounds = array<i64: 1, 32>}, {pipeline_mode = #tpu.pipeline_mode<synchronous>, transform_indices = @transform_10, window_bounds = array<i64: 1, 32>}, {pipeline_mode = #tpu.pipeline_mode<synchronous>, transform_indices = @transform_11, window_bounds = array<i64: 1, 32>}, {pipeline_mode = #tpu.pipeline_mode<synchronous>, transform_indices = @transform_12, window_bounds = array<i64: 1, 32>}, {transform_indices = @transform_13, window_bounds = array<i64: 8, 32>}]} {
    %c0 = arith.constant 0 : index
    %c0_0 = arith.constant 0 : index
    %0 = vector.load %arg1[%c0, %c0_0] : memref<8x32xf32, #tpu.memory_space<vmem>>, vector<8x32xf32>
    %1 = arith.truncf %0 : vector<8x32xf32> to vector<8x32xbf16>
    %c0_1 = arith.constant 0 : index
    %c0_2 = arith.constant 0 : index
    %2 = vector.load %arg2[%c0_1, %c0_2] : memref<32x96xbf16, #tpu.memory_space<vmem>>, vector<32x96xbf16>
    %cst = arith.constant dense<0.000000e+00> : vector<8x96xf32>
    %3 = tpu.matmul %1, %2, %cst {dimension_numbers = #tpu.dot_dimension_numbers<[1], [0], [0], [1], [0, 0, 1, 1], [], []>} : vector<8x32xbf16>, vector<32x96xbf16>, vector<8x96xf32> -> vector<8x96xf32>
    %c0_3 = arith.constant 0 : index
    %c0_4 = arith.constant 0 : index
    %4 = vector.load %arg3[%c0_3, %c0_4] : memref<1x96xf32, #tpu.memory_space<vmem>>, vector<1x96xf32>
    %5 = vector.broadcast %4 : vector<1x96xf32> to vector<8x96xf32>
    %6 = arith.addf %3, %5 : vector<8x96xf32>
    %7 = arith.truncf %6 : vector<8x96xf32> to vector<8x96xbf16>
    %8 = vector.extract_strided_slice %7 {offsets = [0, 0], sizes = [8, 32], strides = [1, 1]} : vector<8x96xbf16> to vector<8x32xbf16>
    %9 = vector.shape_cast %8 : vector<8x32xbf16> to vector<1x8x4x8xbf16>
    %10 = tpu.transpose %9, [2, 0, 1, 3] : vector<1x8x4x8xbf16> -> vector<4x1x8x8xbf16>
    %11 = vector.shape_cast %10 : vector<4x1x8x8xbf16> to vector<4x8x8xbf16>
    %12 = vector.extract_strided_slice %7 {offsets = [0, 32], sizes = [8, 32], strides = [1, 1]} : vector<8x96xbf16> to vector<8x32xbf16>
    %13 = vector.shape_cast %12 : vector<8x32xbf16> to vector<1x8x4x8xbf16>
    %14 = tpu.transpose %13, [2, 0, 1, 3] : vector<1x8x4x8xbf16> -> vector<4x1x8x8xbf16>
    %15 = vector.shape_cast %14 : vector<4x1x8x8xbf16> to vector<4x8x8xbf16>
    %16 = vector.extract_strided_slice %7 {offsets = [0, 64], sizes = [8, 32], strides = [1, 1]} : vector<8x96xbf16> to vector<8x32xbf16>
    %17 = vector.shape_cast %16 : vector<8x32xbf16> to vector<1x8x4x8xbf16>
    %18 = tpu.transpose %17, [2, 0, 1, 3] : vector<1x8x4x8xbf16> -> vector<4x1x8x8xbf16>
    %19 = vector.shape_cast %18 : vector<4x1x8x8xbf16> to vector<4x8x8xbf16>
    "tpu.trace_start"() <{level = 10 : i32, message = "zqd,zkd->zqk"}> : () -> ()
    %cst_5 = arith.constant dense<0.000000e+00> : vector<4x8x8xf32>
    %20 = tpu.matmul %11, %15, %cst_5 {dimension_numbers = #tpu.dot_dimension_numbers<[2], [2], [1], [1], [0, 0, 0, 1, 1, 1], [0], [0]>} : vector<4x8x8xbf16>, vector<4x8x8xbf16>, vector<4x8x8xf32> -> vector<4x8x8xf32>
    "tpu.trace_stop"() : () -> ()
    %cst_6 = arith.constant 0.353553385 : f32
    %21 = vector.broadcast %cst_6 : f32 to vector<4x8x8xf32>
    %22 = arith.mulf %20, %21 : vector<4x8x8xf32>
    %cst_7 = arith.constant dense<0xFF800000> : vector<4x8xf32>
    %23 = vector.multi_reduction <maximumf>, %22, %cst_7 [2] : vector<4x8x8xf32> to vector<4x8xf32>
    %24 = vector.shape_cast %23 : vector<4x8xf32> to vector<4x8x1xf32>
    %25 = vector.broadcast %24 : vector<4x8x1xf32> to vector<4x8x8xf32>
    %26 = arith.subf %22, %25 : vector<4x8x8xf32>
    %27 = math.exp %26 : vector<4x8x8xf32>
    %cst_8 = arith.constant dense<0.000000e+00> : vector<4x8xf32>
    %28 = vector.multi_reduction <add>, %27, %cst_8 [2] : vector<4x8x8xf32> to vector<4x8xf32>
    %29 = vector.shape_cast %28 : vector<4x8xf32> to vector<4x8x1xf32>
    %30 = tpu.reciprocal %29 {approx = true} : vector<4x8x1xf32> -> vector<4x8x1xf32>
    %31 = vector.broadcast %30 : vector<4x8x1xf32> to vector<4x8x8xf32>
    %32 = arith.mulf %27, %31 : vector<4x8x8xf32>
    %33 = arith.truncf %32 : vector<4x8x8xf32> to vector<4x8x8xbf16>
    "tpu.trace_start"() <{level = 10 : i32, message = "zqk,zkd->zqd"}> : () -> ()
    %cst_9 = arith.constant dense<0.000000e+00> : vector<4x8x8xf32>
    %34 = tpu.matmul %33, %19, %cst_9 {dimension_numbers = #tpu.dot_dimension_numbers<[2], [1], [1], [2], [0, 0, 0, 1, 1, 2], [0], [0]>} : vector<4x8x8xbf16>, vector<4x8x8xbf16>, vector<4x8x8xf32> -> vector<4x8x8xf32>
    "tpu.trace_stop"() : () -> ()
    %35 = vector.shape_cast %34 : vector<4x8x8xf32> to vector<4x1x8x8xf32>
    %36 = tpu.transpose %35, [1, 2, 0, 3] : vector<4x1x8x8xf32> -> vector<1x8x4x8xf32>
    %37 = vector.shape_cast %36 : vector<1x8x4x8xf32> to vector<8x32xf32>
    %38 = arith.truncf %37 : vector<8x32xf32> to vector<8x32xbf16>
    %c0_10 = arith.constant 0 : index
    %c0_11 = arith.constant 0 : index
    %39 = vector.load %arg15[%c0_10, %c0_11] : memref<8x32xbf16, #tpu.memory_space<vmem>>, vector<8x32xbf16>
    tpu.vector_store %arg15[%c0_10, %c0_11], %38 {strides = array<i32>} : memref<8x32xbf16, #tpu.memory_space<vmem>>, vector<8x32xbf16>,
    %c0_12 = arith.constant 0 : index
    %c0_13 = arith.constant 0 : index
    %40 = vector.load %arg15[%c0_12, %c0_13] : memref<8x32xbf16, #tpu.memory_space<vmem>>, vector<8x32xbf16>
    %c0_14 = arith.constant 0 : index
    %c0_15 = arith.constant 0 : index
    %41 = vector.load %arg4[%c0_14, %c0_15] : memref<32x32xbf16, #tpu.memory_space<vmem>>, vector<32x32xbf16>
    %cst_16 = arith.constant dense<0.000000e+00> : vector<8x32xf32>
    %42 = tpu.matmul %40, %41, %cst_16 {dimension_numbers = #tpu.dot_dimension_numbers<[1], [0], [0], [1], [0, 0, 1, 1], [], []>} : vector<8x32xbf16>, vector<32x32xbf16>, vector<8x32xf32> -> vector<8x32xf32>
    %c0_17 = arith.constant 0 : index
    %c0_18 = arith.constant 0 : index
    %43 = vector.load %arg5[%c0_17, %c0_18] : memref<1x32xf32, #tpu.memory_space<vmem>>, vector<1x32xf32>
    %44 = vector.broadcast %43 : vector<1x32xf32> to vector<8x32xf32>
    %45 = arith.addf %42, %44 : vector<8x32xf32>
    %46 = arith.addf %0, %45 : vector<8x32xf32>
    %c0_19 = arith.constant 0 : index
    %c0_20 = arith.constant 0 : index
    %47 = vector.load %arg10[%c0_19, %c0_20] : memref<1x32xf32, #tpu.memory_space<vmem>>, vector<1x32xf32>
    %c0_21 = arith.constant 0 : index
    %c0_22 = arith.constant 0 : index
    %48 = vector.load %arg11[%c0_21, %c0_22] : memref<1x32xf32, #tpu.memory_space<vmem>>, vector<1x32xf32>
    %cst_23 = arith.constant dense<0.000000e+00> : vector<8xf32>
    %49 = vector.multi_reduction <add>, %46, %cst_23 [1] : vector<8x32xf32> to vector<8xf32>
    %50 = vector.shape_cast %49 : vector<8xf32> to vector<8x1xf32>
    %cst_24 = arith.constant 3.200000e+01 : f32
    %51 = vector.broadcast %cst_24 : f32 to vector<8x1xf32>
    %52 = arith.divf %50, %51 : vector<8x1xf32>
    %53 = vector.broadcast %52 : vector<8x1xf32> to vector<8x32xf32>
    %54 = arith.subf %46, %53 : vector<8x32xf32>
    %55 = arith.mulf %54, %54 : vector<8x32xf32>
    %cst_25 = arith.constant dense<0.000000e+00> : vector<8xf32>
    %56 = vector.multi_reduction <add>, %55, %cst_25 [1] : vector<8x32xf32> to vector<8xf32>
    %57 = vector.shape_cast %56 : vector<8xf32> to vector<8x1xf32>
    %cst_26 = arith.constant 3.200000e+01 : f32
    %58 = vector.broadcast %cst_26 : f32 to vector<8x1xf32>
    %59 = arith.divf %57, %58 : vector<8x1xf32>
    %cst_27 = arith.constant 9.99999974E-6 : f32
    %60 = vector.broadcast %cst_27 : f32 to vector<8x1xf32>
    %61 = arith.addf %59, %60 : vector<8x1xf32>
    %62 = math.rsqrt %61 : vector<8x1xf32>
    %63 = vector.broadcast %62 : vector<8x1xf32> to vector<8x32xf32>
    %64 = arith.mulf %54, %63 : vector<8x32xf32>
    %65 = vector.broadcast %47 : vector<1x32xf32> to vector<8x32xf32>
    %66 = arith.mulf %64, %65 : vector<8x32xf32>
    %67 = vector.broadcast %48 : vector<1x32xf32> to vector<8x32xf32>
    %68 = arith.addf %66, %67 : vector<8x32xf32>
    %69 = arith.truncf %68 : vector<8x32xf32> to vector<8x32xbf16>
    %c0_28 = arith.constant 0 : index
    %c0_29 = arith.constant 0 : index
    %70 = vector.load %arg6[%c0_28, %c0_29] : memref<32x64xbf16, #tpu.memory_space<vmem>>, vector<32x64xbf16>
    %cst_30 = arith.constant dense<0.000000e+00> : vector<8x64xf32>
    %71 = tpu.matmul %69, %70, %cst_30 {dimension_numbers = #tpu.dot_dimension_numbers<[1], [0], [0], [1], [0, 0, 1, 1], [], []>} : vector<8x32xbf16>, vector<32x64xbf16>, vector<8x64xf32> -> vector<8x64xf32>
    %c0_31 = arith.constant 0 : index
    %c0_32 = arith.constant 0 : index
    %72 = vector.load %arg7[%c0_31, %c0_32] : memref<1x64xf32, #tpu.memory_space<vmem>>, vector<1x64xf32>
    %73 = vector.broadcast %72 : vector<1x64xf32> to vector<8x64xf32>
    %74 = arith.addf %71, %73 : vector<8x64xf32>
    %cst_33 = arith.constant 0.000000e+00 : f32
    %75 = vector.broadcast %cst_33 : f32 to vector<8x64xf32>
    %76 = arith.maximumf %74, %75 : vector<8x64xf32>
    %77 = arith.truncf %76 : vector<8x64xf32> to vector<8x64xbf16>
    %c0_34 = arith.constant 0 : index
    %c0_35 = arith.constant 0 : index
    %78 = vector.load %arg8[%c0_34, %c0_35] : memref<64x32xbf16, #tpu.memory_space<vmem>>, vector<64x32xbf16>
    %cst_36 = arith.constant dense<0.000000e+00> : vector<8x32xf32>
    %79 = tpu.matmul %77, %78, %cst_36 {dimension_numbers = #tpu.dot_dimension_numbers<[1], [0], [0], [1], [0, 0, 1, 1], [], []>} : vector<8x64xbf16>, vector<64x32xbf16>, vector<8x32xf32> -> vector<8x32xf32>
    %c0_37 = arith.constant 0 : index
    %c0_38 = arith.constant 0 : index
    %80 = vector.load %arg9[%c0_37, %c0_38] : memref<1x32xf32, #tpu.memory_space<vmem>>, vector<1x32xf32>
    %81 = vector.broadcast %80 : vector<1x32xf32> to vector<8x32xf32>
    %82 = arith.addf %79, %81 : vector<8x32xf32>
    %83 = arith.addf %68, %82 : vector<8x32xf32>
    %c0_39 = arith.constant 0 : index
    %c0_40 = arith.constant 0 : index
    %84 = vector.load %arg12[%c0_39, %c0_40] : memref<1x32xf32, #tpu.memory_space<vmem>>, vector<1x32xf32>
    %c0_41 = arith.constant 0 : index
    %c0_42 = arith.constant 0 : index
    %85 = vector.load %arg13[%c0_41, %c0_42] : memref<1x32xf32, #tpu.memory_space<vmem>>, vector<1x32xf32>
    %cst_43 = arith.constant dense<0.000000e+00> : vector<8xf32>
    %86 = vector.multi_reduction <add>, %83, %cst_43 [1] : vector<8x32xf32> to vector<8xf32>
    %87 = vector.shape_cast %86 : vector<8xf32> to vector<8x1xf32>
    %cst_44 = arith.constant 3.200000e+01 : f32
    %88 = vector.broadcast %cst_44 : f32 to vector<8x1xf32>
    %89 = arith.divf %87, %88 : vector<8x1xf32>
    %90 = vector.broadcast %89 : vector<8x1xf32> to vector<8x32xf32>
    %91 = arith.subf %83, %90 : vector<8x32xf32>
    %92 = arith.mulf %91, %91 : vector<8x32xf32>
    %cst_45 = arith.constant dense<0.000000e+00> : vector<8xf32>
    %93 = vector.multi_reduction <add>, %92, %cst_45 [1] : vector<8x32xf32> to vector<8xf32>
    %94 = vector.shape_cast %93 : vector<8xf32> to vector<8x1xf32>
    %cst_46 = arith.constant 3.200000e+01 : f32
    %95 = vector.broadcast %cst_46 : f32 to vector<8x1xf32>
    %96 = arith.divf %94, %95 : vector<8x1xf32>
    %cst_47 = arith.constant 9.99999974E-6 : f32
    %97 = vector.broadcast %cst_47 : f32 to vector<8x1xf32>
    %98 = arith.addf %96, %97 : vector<8x1xf32>
    %99 = math.rsqrt %98 : vector<8x1xf32>
    %100 = vector.broadcast %99 : vector<8x1xf32> to vector<8x32xf32>
    %101 = arith.mulf %91, %100 : vector<8x32xf32>
    %102 = vector.broadcast %84 : vector<1x32xf32> to vector<8x32xf32>
    %103 = arith.mulf %101, %102 : vector<8x32xf32>
    %104 = vector.broadcast %85 : vector<1x32xf32> to vector<8x32xf32>
    %105 = arith.addf %103, %104 : vector<8x32xf32>
    %c0_48 = arith.constant 0 : index
    %c0_49 = arith.constant 0 : index
    %106 = vector.load %arg14[%c0_48, %c0_49] : memref<8x32xf32, #tpu.memory_space<vmem>>, vector<8x32xf32>
    tpu.vector_store %arg14[%c0_48, %c0_49], %105 {strides = array<i32>} : memref<8x32xf32, #tpu.memory_space<vmem>>, vector<8x32xf32>,
    return
  }
  func.func @transform_0(%arg0: i32) -> (i32, i32) {
    %c0_i32 = arith.constant 0 : i32
    %c0_i32_0 = arith.constant 0 : i32
    return %arg0, %c0_i32 : i32, i32
  }
  func.func @transform_1(%arg0: i32) -> (i32, i32) {
    %c0_i32 = arith.constant 0 : i32
    %c0_i32_0 = arith.constant 0 : i32
    %c0_i32_1 = arith.constant 0 : i32
    return %c0_i32, %c0_i32_0 : i32, i32
  }
  func.func @transform_2(%arg0: i32) -> (i32, i32) {
    %c0_i32 = arith.constant 0 : i32
    %c0_i32_0 = arith.constant 0 : i32
    %c0_i32_1 = arith.constant 0 : i32
    return %c0_i32, %c0_i32_0 : i32, i32
  }
  func.func @transform_3(%arg0: i32) -> (i32, i32) {
    %c0_i32 = arith.constant 0 : i32
    %c0_i32_0 = arith.constant 0 : i32
    %c0_i32_1 = arith.constant 0 : i32
    return %c0_i32, %c0_i32_0 : i32, i32
  }
  func.func @transform_4(%arg0: i32) -> (i32, i32) {
    %c0_i32 = arith.constant 0 : i32
    %c0_i32_0 = arith.constant 0 : i32
    %c0_i32_1 = arith.constant 0 : i32
    return %c0_i32, %c0_i32_0 : i32, i32
  }
  func.func @transform_5(%arg0: i32) -> (i32, i32) {
    %c0_i32 = arith.constant 0 : i32
    %c0_i32_0 = arith.constant 0 : i32
    %c0_i32_1 = arith.constant 0 : i32
    return %c0_i32, %c0_i32_0 : i32, i32
  }
  func.func @transform_6(%arg0: i32) -> (i32, i32) {
    %c0_i32 = arith.constant 0 : i32
    %c0_i32_0 = arith.constant 0 : i32
    %c0_i32_1 = arith.constant 0 : i32
    return %c0_i32, %c0_i32_0 : i32, i32
  }
  func.func @transform_7(%arg0: i32) -> (i32, i32) {
    %c0_i32 = arith.constant 0 : i32
    %c0_i32_0 = arith.constant 0 : i32
    %c0_i32_1 = arith.constant 0 : i32
    return %c0_i32, %c0_i32_0 : i32, i32
  }
  func.func @transform_8(%arg0: i32) -> (i32, i32) {
    %c0_i32 = arith.constant 0 : i32
    %c0_i32_0 = arith.constant 0 : i32
    %c0_i32_1 = arith.constant 0 : i32
    return %c0_i32, %c0_i32_0 : i32, i32
  }
  func.func @transform_9(%arg0: i32) -> (i32, i32) {
    %c0_i32 = arith.constant 0 : i32
    %c0_i32_0 = arith.constant 0 : i32
    %c0_i32_1 = arith.constant 0 : i32
    return %c0_i32, %c0_i32_0 : i32, i32
  }
  func.func @transform_10(%arg0: i32) -> (i32, i32) {
    %c0_i32 = arith.constant 0 : i32
    %c0_i32_0 = arith.constant 0 : i32
    %c0_i32_1 = arith.constant 0 : i32
    return %c0_i32, %c0_i32_0 : i32, i32
  }
  func.func @transform_11(%arg0: i32) -> (i32, i32) {
    %c0_i32 = arith.constant 0 : i32
    %c0_i32_0 = arith.constant 0 : i32
    %c0_i32_1 = arith.constant 0 : i32
    return %c0_i32, %c0_i32_0 : i32, i32
  }
  func.func @transform_12(%arg0: i32) -> (i32, i32) {
    %c0_i32 = arith.constant 0 : i32
    %c0_i32_0 = arith.constant 0 : i32
    %c0_i32_1 = arith.constant 0 : i32
    return %c0_i32, %c0_i32_0 : i32, i32
  }
  func.func @transform_13(%arg0: i32) -> (i32, i32) {
    %c0_i32 = arith.constant 0 : i32
    %c0_i32_0 = arith.constant 0 : i32
    return %arg0, %c0_i32 : i32, i32
  }
}

module attributes {stable_mosaic.version = 11 : i64} {
  func.func @kernel(%arg0: i32, %arg1: memref<8x32xf32, #tpu.memory_space<vmem>>, %arg2: memref<32x96xbf16, #tpu.memory_space<vmem>>, %arg3: memref<1x96xf32, #tpu.memory_space<vmem>>, %arg4: memref<32x32xbf16, #tpu.memory_space<vmem>>, %arg5: memref<1x32xf32, #tpu.memory_space<vmem>>, %arg6: memref<32x64xbf16, #tpu.memory_space<vmem>>, %arg7: memref<1x64xf32, #tpu.memory_space<vmem>>, %arg8: memref<64x32xbf16, #tpu.memory_space<vmem>>, %arg9: memref<1x32xf32, #tpu.memory_space<vmem>>, %arg10: memref<1x32xf32, #tpu.memory_space<vmem>>, %arg11: memref<1x32xf32, #tpu.memory_space<vmem>>, %arg12: memref<1x32xf32, #tpu.memory_space<vmem>>, %arg13: memref<1x32xf32, #tpu.memory_space<vmem>>, %arg14: memref<8x32xf32, #tpu.memory_space<vmem>>, %arg15: memref<8x32xbf16, #tpu.memory_space<vmem>>) attributes {dimension_semantics = [#tpu.dimension_semantics<parallel>], iteration_bounds = array<i64: 2>, scalar_prefetch = 0 : i64, scratch_operands = 1 : i64, tpu.core_type = #tpu.core_type<tc>, window_params = [{transform_indices = @transform_0, window_bounds = array<i64: 8, 32>}, {pipeline_mode = #tpu.pipeline_mode<synchronous>, transform_indices = @transform_1, window_bounds = array<i64: 32, 96>}, {pipeline_mode = #tpu.pipeline_mode<synchronous>, transform_indices = @transform_2, window_bounds = array<i64: 1, 96>}, {pipeline_mode = #tpu.pipeline_mode<synchronous>, transform_indices = @transform_3, window_bounds = array<i64: 32, 32>}, {pipeline_mode = #tpu.pipeline_mode<synchronous>, transform_indices = @transform_4, window_bounds = array<i64: 1, 32>}, {pipeline_mode = #tpu.pipeline_mode<synchronous>, transform_indices = @transform_5, window_bounds = array<i64: 32, 64>}, {pipeline_mode = #tpu.pipeline_mode<synchronous>, transform_indices = @transform_6, window_bounds = array<i64: 1, 64>}, {pipeline_mode = #tpu.pipeline_mode<synchronous>, transform_indices = @transform_7, window_bounds = array<i64: 64, 32>}, {pipeline_mode = #tpu.pipeline_mode<synchronous>, transform_indices = @transform_8, window_bounds = array<i64: 1, 32>}, {pipeline_mode = #tpu.pipeline_mode<synchronous>, transform_indices = @transform_9, window_bounds = array<i64: 1, 32>}, {pipeline_mode = #tpu.pipeline_mode<synchronous>, transform_indices = @transform_10, window_bounds = array<i64: 1, 32>}, {pipeline_mode = #tpu.pipeline_mode<synchronous>, transform_indices = @transform_11, window_bounds = array<i64: 1, 32>}, {pipeline_mode = #tpu.pipeline_mode<synchronous>, transform_indices = @transform_12, window_bounds = array<i64: 1, 32>}, {transform_indices = @transform_13, window_bounds = array<i64: 8, 32>}]} {
    %c0 = arith.constant 0 : index
    %c0_0 = arith.constant 0 : index
    %0 = vector.load %arg1[%c0, %c0_0] : memref<8x32xf32, #tpu.memory_space<vmem>>, vector<8x32xf32>
    %1 = arith.truncf %0 : vector<8x32xf32> to vector<8x32xbf16>
    %c0_1 = arith.constant 0 : index
    %c0_2 = arith.constant 0 : index
    %2 = vector.load %arg2[%c0_1, %c0_2] : memref<32x96xbf16, #tpu.memory_space<vmem>>, vector<32x96xbf16>
    %cst = arith.constant dense<0.000000e+00> : vector<8x96xf32>
    %3 = tpu.matmul %1, %2, %cst {dimension_numbers = #tpu.dot_dimension_numbers<[1], [0], [0], [1], [0, 0, 1, 1], [], []>} : vector<8x32xbf16>, vector<32x96xbf16>, vector<8x96xf32> -> vector<8x96xf32>
    %c0_3 = arith.constant 0 : index
    %c0_4 = arith.constant 0 : index
    %4 = vector.load %arg3[%c0_3, %c0_4] : memref<1x96xf32, #tpu.memory_space<vmem>>, vector<1x96xf32>
    %5 = vector.broadcast %4 : vector<1x96xf32> to vector<8x96xf32>
    %6 = arith.addf %3, %5 : vector<8x96xf32>
    %7 = arith.truncf %6 : vector<8x96xf32> to vector<8x96xbf16>
    %8 = vector.extract_strided_slice %7 {offsets = [0, 0], sizes = [8, 32], strides = [1, 1]} : vector<8x96xbf16> to vector<8x32xbf16>
    %9 = vector.shape_cast %8 : vector<8x32xbf16> to vector<1x8x4x8xbf16>
    %10 = tpu.transpose %9, [2, 0, 1, 3] : vector<1x8x4x8xbf16> -> vector<4x1x8x8xbf16>
    %11 = vector.shape_cast %10 : vector<4x1x8x8xbf16> to vector<4x8x8xbf16>
    %12 = vector.extract_strided_slice %7 {offsets = [0, 32], sizes = [8, 32], strides = [1, 1]} : vector<8x96xbf16> to vector<8x32xbf16>
    %13 = vector.shape_cast %12 : vector<8x32xbf16> to vector<1x8x4x8xbf16>
    %14 = tpu.transpose %13, [2, 0, 1, 3] : vector<1x8x4x8xbf16> -> vector<4x1x8x8xbf16>
    %15 = vector.shape_cast %14 : vector<4x1x8x8xbf16> to vector<4x8x8xbf16>
    %16 = vector.extract_strided_slice %7 {offsets = [0, 64], sizes = [8, 32], strides = [1, 1]} : vector<8x96xbf16> to vector<8x32xbf16>
    %17 = vector.shape_cast %16 : vector<8x32xbf16> to vector<1x8x4x8xbf16>
    %18 = tpu.transpose %17, [2, 0, 1, 3] : vector<1x8x4x8xbf16> -> vector<4x1x8x8xbf16>
    %19 = vector.shape_cast %18 : vector<4x1x8x8xbf16> to vector<4x8x8xbf16>
    "tpu.trace_start"() <{level = 10 : i32, message = "zqd,zkd->zqk"}> : () -> ()
    %cst_5 = arith.constant dense<0.000000e+00> : vector<4x8x8xf32>
    %20 = tpu.matmul %11, %15, %cst_5 {dimension_numbers = #tpu.dot_dimension_numbers<[2], [2], [1], [1], [0, 0, 0, 1, 1, 1], [0], [0]>} : vector<4x8x8xbf16>, vector<4x8x8xbf16>, vector<4x8x8xf32> -> vector<4x8x8xf32>
    "tpu.trace_stop"() : () -> ()
    %cst_6 = arith.constant 0.353553385 : f32
    %21 = vector.broadcast %cst_6 : f32 to vector<4x8x8xf32>
    %22 = arith.mulf %20, %21 : vector<4x8x8xf32>
    %cst_7 = arith.constant dense<0xFF800000> : vector<4x8xf32>
    %23 = vector.multi_reduction <maximumf>, %22, %cst_7 [2] : vector<4x8x8xf32> to vector<4x8xf32>
    %24 = vector.shape_cast %23 : vector<4x8xf32> to vector<4x8x1xf32>
    %25 = vector.broadcast %24 : vector<4x8x1xf32> to vector<4x8x8xf32>
    %26 = arith.subf %22, %25 : vector<4x8x8xf32>
    %27 = math.exp %26 : vector<4x8x8xf32>
    %cst_8 = arith.constant dense<0.000000e+00> : vector<4x8xf32>
    %28 = vector.multi_reduction <add>, %27, %cst_8 [2] : vector<4x8x8xf32> to vector<4x8xf32>
    %29 = vector.shape_cast %28 : vector<4x8xf32> to vector<4x8x1xf32>
    %30 = tpu.reciprocal %29 {approx = true} : vector<4x8x1xf32> -> vector<4x8x1xf32>
    %31 = vector.broadcast %30 : vector<4x8x1xf32> to vector<4x8x8xf32>
    %32 = arith.mulf %27, %31 : vector<4x8x8xf32>
    %33 = arith.truncf %32 : vector<4x8x8xf32> to vector<4x8x8xbf16>
    "tpu.trace_start"() <{level = 10 : i32, message = "zqk,zkd->zqd"}> : () -> ()
    %cst_9 = arith.constant dense<0.000000e+00> : vector<4x8x8xf32>
    %34 = tpu.matmul %33, %19, %cst_9 {dimension_numbers = #tpu.dot_dimension_numbers<[2], [1], [1], [2], [0, 0, 0, 1, 1, 2], [0], [0]>} : vector<4x8x8xbf16>, vector<4x8x8xbf16>, vector<4x8x8xf32> -> vector<4x8x8xf32>
    "tpu.trace_stop"() : () -> ()
    %35 = vector.shape_cast %34 : vector<4x8x8xf32> to vector<4x1x8x8xf32>
    %36 = tpu.transpose %35, [1, 2, 0, 3] : vector<4x1x8x8xf32> -> vector<1x8x4x8xf32>
    %37 = vector.shape_cast %36 : vector<1x8x4x8xf32> to vector<8x32xf32>
    %38 = arith.truncf %37 : vector<8x32xf32> to vector<8x32xbf16>
    %c0_10 = arith.constant 0 : index
    %c0_11 = arith.constant 0 : index
    %39 = vector.load %arg15[%c0_10, %c0_11] : memref<8x32xbf16, #tpu.memory_space<vmem>>, vector<8x32xbf16>
    tpu.vector_store %arg15[%c0_10, %c0_11], %38 {strides = array<i32>} : memref<8x32xbf16, #tpu.memory_space<vmem>>, vector<8x32xbf16>,
    %c0_12 = arith.constant 0 : index
    %c0_13 = arith.constant 0 : index
    %40 = vector.load %arg15[%c0_12, %c0_13] : memref<8x32xbf16, #tpu.memory_space<vmem>>, vector<8x32xbf16>
    %c0_14 = arith.constant 0 : index
    %c0_15 = arith.constant 0 : index
    %41 = vector.load %arg4[%c0_14, %c0_15] : memref<32x32xbf16, #tpu.memory_space<vmem>>, vector<32x32xbf16>
    %cst_16 = arith.constant dense<0.000000e+00> : vector<8x32xf32>
    %42 = tpu.matmul %40, %41, %cst_16 {dimension_numbers = #tpu.dot_dimension_numbers<[1], [0], [0], [1], [0, 0, 1, 1], [], []>} : vector<8x32xbf16>, vector<32x32xbf16>, vector<8x32xf32> -> vector<8x32xf32>
    %c0_17 = arith.constant 0 : index
    %c0_18 = arith.constant 0 : index
    %43 = vector.load %arg5[%c0_17, %c0_18] : memref<1x32xf32, #tpu.memory_space<vmem>>, vector<1x32xf32>
    %44 = vector.broadcast %43 : vector<1x32xf32> to vector<8x32xf32>
    %45 = arith.addf %42, %44 : vector<8x32xf32>
    %46 = arith.addf %0, %45 : vector<8x32xf32>
    %c0_19 = arith.constant 0 : index
    %c0_20 = arith.constant 0 : index
    %47 = vector.load %arg10[%c0_19, %c0_20] : memref<1x32xf32, #tpu.memory_space<vmem>>, vector<1x32xf32>
    %c0_21 = arith.constant 0 : index
    %c0_22 = arith.constant 0 : index
    %48 = vector.load %arg11[%c0_21, %c0_22] : memref<1x32xf32, #tpu.memory_space<vmem>>, vector<1x32xf32>
    %cst_23 = arith.constant dense<0.000000e+00> : vector<8xf32>
    %49 = vector.multi_reduction <add>, %46, %cst_23 [1] : vector<8x32xf32> to vector<8xf32>
    %50 = vector.shape_cast %49 : vector<8xf32> to vector<8x1xf32>
    %cst_24 = arith.constant 3.200000e+01 : f32
    %51 = vector.broadcast %cst_24 : f32 to vector<8x1xf32>
    %52 = arith.divf %50, %51 : vector<8x1xf32>
    %53 = vector.broadcast %52 : vector<8x1xf32> to vector<8x32xf32>
    %54 = arith.subf %46, %53 : vector<8x32xf32>
    %55 = arith.mulf %54, %54 : vector<8x32xf32>
    %cst_25 = arith.constant dense<0.000000e+00> : vector<8xf32>
    %56 = vector.multi_reduction <add>, %55, %cst_25 [1] : vector<8x32xf32> to vector<8xf32>
    %57 = vector.shape_cast %56 : vector<8xf32> to vector<8x1xf32>
    %cst_26 = arith.constant 3.200000e+01 : f32
    %58 = vector.broadcast %cst_26 : f32 to vector<8x1xf32>
    %59 = arith.divf %57, %58 : vector<8x1xf32>
    %cst_27 = arith.constant 9.99999974E-6 : f32
    %60 = vector.broadcast %cst_27 : f32 to vector<8x1xf32>
    %61 = arith.addf %59, %60 : vector<8x1xf32>
    %62 = math.rsqrt %61 : vector<8x1xf32>
    %63 = vector.broadcast %62 : vector<8x1xf32> to vector<8x32xf32>
    %64 = arith.mulf %54, %63 : vector<8x32xf32>
    %65 = vector.broadcast %47 : vector<1x32xf32> to vector<8x32xf32>
    %66 = arith.mulf %64, %65 : vector<8x32xf32>
    %67 = vector.broadcast %48 : vector<1x32xf32> to vector<8x32xf32>
    %68 = arith.addf %66, %67 : vector<8x32xf32>
    %69 = arith.truncf %68 : vector<8x32xf32> to vector<8x32xbf16>
    %c0_28 = arith.constant 0 : index
    %c0_29 = arith.constant 0 : index
    %70 = vector.load %arg6[%c0_28, %c0_29] : memref<32x64xbf16, #tpu.memory_space<vmem>>, vector<32x64xbf16>
    %cst_30 = arith.constant dense<0.000000e+00> : vector<8x64xf32>
    %71 = tpu.matmul %69, %70, %cst_30 {dimension_numbers = #tpu.dot_dimension_numbers<[1], [0], [0], [1], [0, 0, 1, 1], [], []>} : vector<8x32xbf16>, vector<32x64xbf16>, vector<8x64xf32> -> vector<8x64xf32>
    %c0_31 = arith.constant 0 : index
    %c0_32 = arith.constant 0 : index
    %72 = vector.load %arg7[%c0_31, %c0_32] : memref<1x64xf32, #tpu.memory_space<vmem>>, vector<1x64xf32>
    %73 = vector.broadcast %72 : vector<1x64xf32> to vector<8x64xf32>
    %74 = arith.addf %71, %73 : vector<8x64xf32>
    %cst_33 = arith.constant 0.000000e+00 : f32
    %75 = vector.broadcast %cst_33 : f32 to vector<8x64xf32>
    %76 = arith.maximumf %74, %75 : vector<8x64xf32>
    %77 = arith.truncf %76 : vector<8x64xf32> to vector<8x64xbf16>
    %c0_34 = arith.constant 0 : index
    %c0_35 = arith.constant 0 : index
    %78 = vector.load %arg8[%c0_34, %c0_35] : memref<64x32xbf16, #tpu.memory_space<vmem>>, vector<64x32xbf16>
    %cst_36 = arith.constant dense<0.000000e+00> : vector<8x32xf32>
    %79 = tpu.matmul %77, %78, %cst_36 {dimension_numbers = #tpu.dot_dimension_numbers<[1], [0], [0], [1], [0, 0, 1, 1], [], []>} : vector<8x64xbf16>, vector<64x32xbf16>, vector<8x32xf32> -> vector<8x32xf32>
    %c0_37 = arith.constant 0 : index
    %c0_38 = arith.constant 0 : index
    %80 = vector.load %arg9[%c0_37, %c0_38] : memref<1x32xf32, #tpu.memory_space<vmem>>, vector<1x32xf32>
    %81 = vector.broadcast %80 : vector<1x32xf32> to vector<8x32xf32>
    %82 = arith.addf %79, %81 : vector<8x32xf32>
    %83 = arith.addf %68, %82 : vector<8x32xf32>
    %c0_39 = arith.constant 0 : index
    %c0_40 = arith.constant 0 : index
    %84 = vector.load %arg12[%c0_39, %c0_40] : memref<1x32xf32, #tpu.memory_space<vmem>>, vector<1x32xf32>
    %c0_41 = arith.constant 0 : index
    %c0_42 = arith.constant 0 : index
    %85 = vector.load %arg13[%c0_41, %c0_42] : memref<1x32xf32, #tpu.memory_space<vmem>>, vector<1x32xf32>
    %cst_43 = arith.constant dense<0.000000e+00> : vector<8xf32>
    %86 = vector.multi_reduction <add>, %83, %cst_43 [1] : vector<8x32xf32> to vector<8xf32>
    %87 = vector.shape_cast %86 : vector<8xf32> to vector<8x1xf32>
    %cst_44 = arith.constant 3.200000e+01 : f32
    %88 = vector.broadcast %cst_44 : f32 to vector<8x1xf32>
    %89 = arith.divf %87, %88 : vector<8x1xf32>
    %90 = vector.broadcast %89 : vector<8x1xf32> to vector<8x32xf32>
    %91 = arith.subf %83, %90 : vector<8x32xf32>
    %92 = arith.mulf %91, %91 : vector<8x32xf32>
    %cst_45 = arith.constant dense<0.000000e+00> : vector<8xf32>
    %93 = vector.multi_reduction <add>, %92, %cst_45 [1] : vector<8x32xf32> to vector<8xf32>
    %94 = vector.shape_cast %93 : vector<8xf32> to vector<8x1xf32>
    %cst_46 = arith.constant 3.200000e+01 : f32
    %95 = vector.broadcast %cst_46 : f32 to vector<8x1xf32>
    %96 = arith.divf %94, %95 : vector<8x1xf32>
    %cst_47 = arith.constant 9.99999974E-6 : f32
    %97 = vector.broadcast %cst_47 : f32 to vector<8x1xf32>
    %98 = arith.addf %96, %97 : vector<8x1xf32>
    %99 = math.rsqrt %98 : vector<8x1xf32>
    %100 = vector.broadcast %99 : vector<8x1xf32> to vector<8x32xf32>
    %101 = arith.mulf %91, %100 : vector<8x32xf32>
    %102 = vector.broadcast %84 : vector<1x32xf32> to vector<8x32xf32>
    %103 = arith.mulf %101, %102 : vector<8x32xf32>
    %104 = vector.broadcast %85 : vector<1x32xf32> to vector<8x32xf32>
    %105 = arith.addf %103, %104 : vector<8x32xf32>
    %c0_48 = arith.constant 0 : index
    %c0_49 = arith.constant 0 : index
    %106 = vector.load %arg14[%c0_48, %c0_49] : memref<8x32xf32, #tpu.memory_space<vmem>>, vector<8x32xf32>
    tpu.vector_store %arg14[%c0_48, %c0_49], %105 {strides = array<i32>} : memref<8x32xf32, #tpu.memory_space<vmem>>, vector<8x32xf32>,
    return
  }
  func.func @transform_0(%arg0: i32) -> (i32, i32) {
    %c0_i32 = arith.constant 0 : i32
    %c0_i32_0 = arith.constant 0 : i32
    return %arg0, %c0_i32 : i32, i32
  }
  func.func @transform_1(%arg0: i32) -> (i32, i32) {
    %c0_i32 = arith.constant 0 : i32
    %c0_i32_0 = arith.constant 0 : i32
    %c0_i32_1 = arith.constant 0 : i32
    return %c0_i32, %c0_i32_0 : i32, i32
  }
  func.func @transform_2(%arg0: i32) -> (i32, i32) {
    %c0_i32 = arith.constant 0 : i32
    %c0_i32_0 = arith.constant 0 : i32
    %c0_i32_1 = arith.constant 0 : i32
    return %c0_i32, %c0_i32_0 : i32, i32
  }
  func.func @transform_3(%arg0: i32) -> (i32, i32) {
    %c0_i32 = arith.constant 0 : i32
    %c0_i32_0 = arith.constant 0 : i32
    %c0_i32_1 = arith.constant 0 : i32
    return %c0_i32, %c0_i32_0 : i32, i32
  }
  func.func @transform_4(%arg0: i32) -> (i32, i32) {
    %c0_i32 = arith.constant 0 : i32
    %c0_i32_0 = arith.constant 0 : i32
    %c0_i32_1 = arith.constant 0 : i32
    return %c0_i32, %c0_i32_0 : i32, i32
  }
  func.func @transform_5(%arg0: i32) -> (i32, i32) {
    %c0_i32 = arith.constant 0 : i32
    %c0_i32_0 = arith.constant 0 : i32
    %c0_i32_1 = arith.constant 0 : i32
    return %c0_i32, %c0_i32_0 : i32, i32
  }
  func.func @transform_6(%arg0: i32) -> (i32, i32) {
    %c0_i32 = arith.constant 0 : i32
    %c0_i32_0 = arith.constant 0 : i32
    %c0_i32_1 = arith.constant 0 : i32
    return %c0_i32, %c0_i32_0 : i32, i32
  }
  func.func @transform_7(%arg0: i32) -> (i32, i32) {
    %c0_i32 = arith.constant 0 : i32
    %c0_i32_0 = arith.constant 0 : i32
    %c0_i32_1 = arith.constant 0 : i32
    return %c0_i32, %c0_i32_0 : i32, i32
  }
  func.func @transform_8(%arg0: i32) -> (i32, i32) {
    %c0_i32 = arith.constant 0 : i32
    %c0_i32_0 = arith.constant 0 : i32
    %c0_i32_1 = arith.constant 0 : i32
    return %c0_i32, %c0_i32_0 : i32, i32
  }
  func.func @transform_9(%arg0: i32) -> (i32, i32) {
    %c0_i32 = arith.constant 0 : i32
    %c0_i32_0 = arith.constant 0 : i32
    %c0_i32_1 = arith.constant 0 : i32
    return %c0_i32, %c0_i32_0 : i32, i32
  }
  func.func @transform_10(%arg0: i32) -> (i32, i32) {
    %c0_i32 = arith.constant 0 : i32
    %c0_i32_0 = arith.constant 0 : i32
    %c0_i32_1 = arith.constant 0 : i32
    return %c0_i32, %c0_i32_0 : i32, i32
  }
  func.func @transform_11(%arg0: i32) -> (i32, i32) {
    %c0_i32 = arith.constant 0 : i32
    %c0_i32_0 = arith.constant 0 : i32
    %c0_i32_1 = arith.constant 0 : i32
    return %c0_i32, %c0_i32_0 : i32, i32
  }
  func.func @transform_12(%arg0: i32) -> (i32, i32) {
    %c0_i32 = arith.constant 0 : i32
    %c0_i32_0 = arith.constant 0 : i32
    %c0_i32_1 = arith.constant 0 : i32
    return %c0_i32, %c0_i32_0 : i32, i32
  }
  func.func @transform_13(%arg0: i32) -> (i32, i32) {
    %c0_i32 = arith.constant 0 : i32
    %c0_i32_0 = arith.constant 0 : i32
    return %arg0, %c0_i32 : i32, i32
  }
}

module attributes {stable_mosaic.version = 11 : i64} {
  func.func @kernel(%arg0: i32, %arg1: memref<8x32xf32, #tpu.memory_space<vmem>>, %arg2: memref<32x96xbf16, #tpu.memory_space<vmem>>, %arg3: memref<1x96xf32, #tpu.memory_space<vmem>>, %arg4: memref<32x32xbf16, #tpu.memory_space<vmem>>, %arg5: memref<1x32xf32, #tpu.memory_space<vmem>>, %arg6: memref<32x64xbf16, #tpu.memory_space<vmem>>, %arg7: memref<1x64xf32, #tpu.memory_space<vmem>>, %arg8: memref<64x32xbf16, #tpu.memory_space<vmem>>, %arg9: memref<1x32xf32, #tpu.memory_space<vmem>>, %arg10: memref<1x32xf32, #tpu.memory_space<vmem>>, %arg11: memref<1x32xf32, #tpu.memory_space<vmem>>, %arg12: memref<1x32xf32, #tpu.memory_space<vmem>>, %arg13: memref<1x32xf32, #tpu.memory_space<vmem>>, %arg14: memref<8x32xf32, #tpu.memory_space<vmem>>, %arg15: memref<8x32xbf16, #tpu.memory_space<vmem>>) attributes {dimension_semantics = [#tpu.dimension_semantics<parallel>], iteration_bounds = array<i64: 2>, scalar_prefetch = 0 : i64, scratch_operands = 1 : i64, tpu.core_type = #tpu.core_type<tc>, window_params = [{transform_indices = @transform_0, window_bounds = array<i64: 8, 32>}, {pipeline_mode = #tpu.pipeline_mode<synchronous>, transform_indices = @transform_1, window_bounds = array<i64: 32, 96>}, {pipeline_mode = #tpu.pipeline_mode<synchronous>, transform_indices = @transform_2, window_bounds = array<i64: 1, 96>}, {pipeline_mode = #tpu.pipeline_mode<synchronous>, transform_indices = @transform_3, window_bounds = array<i64: 32, 32>}, {pipeline_mode = #tpu.pipeline_mode<synchronous>, transform_indices = @transform_4, window_bounds = array<i64: 1, 32>}, {pipeline_mode = #tpu.pipeline_mode<synchronous>, transform_indices = @transform_5, window_bounds = array<i64: 32, 64>}, {pipeline_mode = #tpu.pipeline_mode<synchronous>, transform_indices = @transform_6, window_bounds = array<i64: 1, 64>}, {pipeline_mode = #tpu.pipeline_mode<synchronous>, transform_indices = @transform_7, window_bounds = array<i64: 64, 32>}, {pipeline_mode = #tpu.pipeline_mode<synchronous>, transform_indices = @transform_8, window_bounds = array<i64: 1, 32>}, {pipeline_mode = #tpu.pipeline_mode<synchronous>, transform_indices = @transform_9, window_bounds = array<i64: 1, 32>}, {pipeline_mode = #tpu.pipeline_mode<synchronous>, transform_indices = @transform_10, window_bounds = array<i64: 1, 32>}, {pipeline_mode = #tpu.pipeline_mode<synchronous>, transform_indices = @transform_11, window_bounds = array<i64: 1, 32>}, {pipeline_mode = #tpu.pipeline_mode<synchronous>, transform_indices = @transform_12, window_bounds = array<i64: 1, 32>}, {transform_indices = @transform_13, window_bounds = array<i64: 8, 32>}]} {
    %c0 = arith.constant 0 : index
    %c0_0 = arith.constant 0 : index
    %0 = vector.load %arg1[%c0, %c0_0] : memref<8x32xf32, #tpu.memory_space<vmem>>, vector<8x32xf32>
    %1 = arith.truncf %0 : vector<8x32xf32> to vector<8x32xbf16>
    %c0_1 = arith.constant 0 : index
    %c0_2 = arith.constant 0 : index
    %2 = vector.load %arg2[%c0_1, %c0_2] : memref<32x96xbf16, #tpu.memory_space<vmem>>, vector<32x96xbf16>
    %cst = arith.constant dense<0.000000e+00> : vector<8x96xf32>
    %3 = tpu.matmul %1, %2, %cst {dimension_numbers = #tpu.dot_dimension_numbers<[1], [0], [0], [1], [0, 0, 1, 1], [], []>} : vector<8x32xbf16>, vector<32x96xbf16>, vector<8x96xf32> -> vector<8x96xf32>
    %c0_3 = arith.constant 0 : index
    %c0_4 = arith.constant 0 : index
    %4 = vector.load %arg3[%c0_3, %c0_4] : memref<1x96xf32, #tpu.memory_space<vmem>>, vector<1x96xf32>
    %5 = vector.broadcast %4 : vector<1x96xf32> to vector<8x96xf32>
    %6 = arith.addf %3, %5 : vector<8x96xf32>
    %7 = arith.truncf %6 : vector<8x96xf32> to vector<8x96xbf16>
    %8 = vector.extract_strided_slice %7 {offsets = [0, 0], sizes = [8, 8], strides = [1, 1]} : vector<8x96xbf16> to vector<8x8xbf16>
    %9 = vector.shape_cast %8 : vector<8x8xbf16> to vector<1x8x8xbf16>
    %10 = vector.extract_strided_slice %7 {offsets = [0, 32], sizes = [8, 8], strides = [1, 1]} : vector<8x96xbf16> to vector<8x8xbf16>
    %11 = vector.shape_cast %10 : vector<8x8xbf16> to vector<1x8x8xbf16>
    %12 = vector.extract_strided_slice %7 {offsets = [0, 64], sizes = [8, 8], strides = [1, 1]} : vector<8x96xbf16> to vector<8x8xbf16>
    %13 = vector.shape_cast %12 : vector<8x8xbf16> to vector<1x8x8xbf16>
    "tpu.trace_start"() <{level = 10 : i32, message = "zqd,zkd->zqk"}> : () -> ()
    %cst_5 = arith.constant dense<0.000000e+00> : vector<1x8x8xf32>
    %14 = tpu.matmul %9, %11, %cst_5 {dimension_numbers = #tpu.dot_dimension_numbers<[2], [2], [1], [1], [0, 0, 0, 1, 1, 1], [0], [0]>} : vector<1x8x8xbf16>, vector<1x8x8xbf16>, vector<1x8x8xf32> -> vector<1x8x8xf32>
    "tpu.trace_stop"() : () -> ()
    %cst_6 = arith.constant 0.353553385 : f32
    %15 = vector.broadcast %cst_6 : f32 to vector<1x8x8xf32>
    %16 = arith.mulf %14, %15 : vector<1x8x8xf32>
    %cst_7 = arith.constant dense<0xFF800000> : vector<1x8xf32>
    %17 = vector.multi_reduction <maximumf>, %16, %cst_7 [2] : vector<1x8x8xf32> to vector<1x8xf32>
    %18 = vector.shape_cast %17 : vector<1x8xf32> to vector<1x8x1xf32>
    %19 = vector.broadcast %18 : vector<1x8x1xf32> to vector<1x8x8xf32>
    %20 = arith.subf %16, %19 : vector<1x8x8xf32>
    %21 = math.exp %20 : vector<1x8x8xf32>
    %cst_8 = arith.constant dense<0.000000e+00> : vector<1x8xf32>
    %22 = vector.multi_reduction <add>, %21, %cst_8 [2] : vector<1x8x8xf32> to vector<1x8xf32>
    %23 = vector.shape_cast %22 : vector<1x8xf32> to vector<1x8x1xf32>
    %24 = tpu.reciprocal %23 {approx = true} : vector<1x8x1xf32> -> vector<1x8x1xf32>
    %25 = vector.broadcast %24 : vector<1x8x1xf32> to vector<1x8x8xf32>
    %26 = arith.mulf %21, %25 : vector<1x8x8xf32>
    %27 = arith.truncf %26 : vector<1x8x8xf32> to vector<1x8x8xbf16>
    "tpu.trace_start"() <{level = 10 : i32, message = "zqk,zkd->zqd"}> : () -> ()
    %cst_9 = arith.constant dense<0.000000e+00> : vector<1x8x8xf32>
    %28 = tpu.matmul %27, %13, %cst_9 {dimension_numbers = #tpu.dot_dimension_numbers<[2], [1], [1], [2], [0, 0, 0, 1, 1, 2], [0], [0]>} : vector<1x8x8xbf16>, vector<1x8x8xbf16>, vector<1x8x8xf32> -> vector<1x8x8xf32>
    "tpu.trace_stop"() : () -> ()
    %29 = vector.shape_cast %28 : vector<1x8x8xf32> to vector<8x8xf32>
    %30 = arith.truncf %29 : vector<8x8xf32> to vector<8x8xbf16>
    %c0_10 = arith.constant 0 : index
    %c0_11 = arith.constant 0 : index
    %31 = vector.load %arg15[%c0_10, %c0_11] : memref<8x32xbf16, #tpu.memory_space<vmem>>, vector<8x8xbf16>
    tpu.vector_store %arg15[%c0_10, %c0_11], %30 {strides = array<i32>} : memref<8x32xbf16, #tpu.memory_space<vmem>>, vector<8x8xbf16>,
    %32 = vector.extract_strided_slice %7 {offsets = [0, 8], sizes = [8, 8], strides = [1, 1]} : vector<8x96xbf16> to vector<8x8xbf16>
    %33 = vector.shape_cast %32 : vector<8x8xbf16> to vector<1x8x8xbf16>
    %34 = vector.extract_strided_slice %7 {offsets = [0, 40], sizes = [8, 8], strides = [1, 1]} : vector<8x96xbf16> to vector<8x8xbf16>
    %35 = vector.shape_cast %34 : vector<8x8xbf16> to vector<1x8x8xbf16>
    %36 = vector.extract_strided_slice %7 {offsets = [0, 72], sizes = [8, 8], strides = [1, 1]} : vector<8x96xbf16> to vector<8x8xbf16>
    %37 = vector.shape_cast %36 : vector<8x8xbf16> to vector<1x8x8xbf16>
    "tpu.trace_start"() <{level = 10 : i32, message = "zqd,zkd->zqk"}> : () -> ()
    %cst_12 = arith.constant dense<0.000000e+00> : vector<1x8x8xf32>
    %38 = tpu.matmul %33, %35, %cst_12 {dimension_numbers = #tpu.dot_dimension_numbers<[2], [2], [1], [1], [0, 0, 0, 1, 1, 1], [0], [0]>} : vector<1x8x8xbf16>, vector<1x8x8xbf16>, vector<1x8x8xf32> -> vector<1x8x8xf32>
    "tpu.trace_stop"() : () -> ()
    %cst_13 = arith.constant 0.353553385 : f32
    %39 = vector.broadcast %cst_13 : f32 to vector<1x8x8xf32>
    %40 = arith.mulf %38, %39 : vector<1x8x8xf32>
    %cst_14 = arith.constant dense<0xFF800000> : vector<1x8xf32>
    %41 = vector.multi_reduction <maximumf>, %40, %cst_14 [2] : vector<1x8x8xf32> to vector<1x8xf32>
    %42 = vector.shape_cast %41 : vector<1x8xf32> to vector<1x8x1xf32>
    %43 = vector.broadcast %42 : vector<1x8x1xf32> to vector<1x8x8xf32>
    %44 = arith.subf %40, %43 : vector<1x8x8xf32>
    %45 = math.exp %44 : vector<1x8x8xf32>
    %cst_15 = arith.constant dense<0.000000e+00> : vector<1x8xf32>
    %46 = vector.multi_reduction <add>, %45, %cst_15 [2] : vector<1x8x8xf32> to vector<1x8xf32>
    %47 = vector.shape_cast %46 : vector<1x8xf32> to vector<1x8x1xf32>
    %48 = tpu.reciprocal %47 {approx = true} : vector<1x8x1xf32> -> vector<1x8x1xf32>
    %49 = vector.broadcast %48 : vector<1x8x1xf32> to vector<1x8x8xf32>
    %50 = arith.mulf %45, %49 : vector<1x8x8xf32>
    %51 = arith.truncf %50 : vector<1x8x8xf32> to vector<1x8x8xbf16>
    "tpu.trace_start"() <{level = 10 : i32, message = "zqk,zkd->zqd"}> : () -> ()
    %cst_16 = arith.constant dense<0.000000e+00> : vector<1x8x8xf32>
    %52 = tpu.matmul %51, %37, %cst_16 {dimension_numbers = #tpu.dot_dimension_numbers<[2], [1], [1], [2], [0, 0, 0, 1, 1, 2], [0], [0]>} : vector<1x8x8xbf16>, vector<1x8x8xbf16>, vector<1x8x8xf32> -> vector<1x8x8xf32>
    "tpu.trace_stop"() : () -> ()
    %53 = vector.shape_cast %52 : vector<1x8x8xf32> to vector<8x8xf32>
    %54 = arith.truncf %53 : vector<8x8xf32> to vector<8x8xbf16>
    %c0_17 = arith.constant 0 : index
    %c8 = arith.constant 8 : index
    %55 = vector.load %arg15[%c0_17, %c8] : memref<8x32xbf16, #tpu.memory_space<vmem>>, vector<8x8xbf16>
    tpu.vector_store %arg15[%c0_17, %c8], %54 {strides = array<i32>} : memref<8x32xbf16, #tpu.memory_space<vmem>>, vector<8x8xbf16>,
    %56 = vector.extract_strided_slice %7 {offsets = [0, 16], sizes = [8, 8], strides = [1, 1]} : vector<8x96xbf16> to vector<8x8xbf16>
    %57 = vector.shape_cast %56 : vector<8x8xbf16> to vector<1x8x8xbf16>
    %58 = vector.extract_strided_slice %7 {offsets = [0, 48], sizes = [8, 8], strides = [1, 1]} : vector<8x96xbf16> to vector<8x8xbf16>
    %59 = vector.shape_cast %58 : vector<8x8xbf16> to vector<1x8x8xbf16>
    %60 = vector.extract_strided_slice %7 {offsets = [0, 80], sizes = [8, 8], strides = [1, 1]} : vector<8x96xbf16> to vector<8x8xbf16>
    %61 = vector.shape_cast %60 : vector<8x8xbf16> to vector<1x8x8xbf16>
    "tpu.trace_start"() <{level = 10 : i32, message = "zqd,zkd->zqk"}> : () -> ()
    %cst_18 = arith.constant dense<0.000000e+00> : vector<1x8x8xf32>
    %62 = tpu.matmul %57, %59, %cst_18 {dimension_numbers = #tpu.dot_dimension_numbers<[2], [2], [1], [1], [0, 0, 0, 1, 1, 1], [0], [0]>} : vector<1x8x8xbf16>, vector<1x8x8xbf16>, vector<1x8x8xf32> -> vector<1x8x8xf32>
    "tpu.trace_stop"() : () -> ()
    %cst_19 = arith.constant 0.353553385 : f32
    %63 = vector.broadcast %cst_19 : f32 to vector<1x8x8xf32>
    %64 = arith.mulf %62, %63 : vector<1x8x8xf32>
    %cst_20 = arith.constant dense<0xFF800000> : vector<1x8xf32>
    %65 = vector.multi_reduction <maximumf>, %64, %cst_20 [2] : vector<1x8x8xf32> to vector<1x8xf32>
    %66 = vector.shape_cast %65 : vector<1x8xf32> to vector<1x8x1xf32>
    %67 = vector.broadcast %66 : vector<1x8x1xf32> to vector<1x8x8xf32>
    %68 = arith.subf %64, %67 : vector<1x8x8xf32>
    %69 = math.exp %68 : vector<1x8x8xf32>
    %cst_21 = arith.constant dense<0.000000e+00> : vector<1x8xf32>
    %70 = vector.multi_reduction <add>, %69, %cst_21 [2] : vector<1x8x8xf32> to vector<1x8xf32>
    %71 = vector.shape_cast %70 : vector<1x8xf32> to vector<1x8x1xf32>
    %72 = tpu.reciprocal %71 {approx = true} : vector<1x8x1xf32> -> vector<1x8x1xf32>
    %73 = vector.broadcast %72 : vector<1x8x1xf32> to vector<1x8x8xf32>
    %74 = arith.mulf %69, %73 : vector<1x8x8xf32>
    %75 = arith.truncf %74 : vector<1x8x8xf32> to vector<1x8x8xbf16>
    "tpu.trace_start"() <{level = 10 : i32, message = "zqk,zkd->zqd"}> : () -> ()
    %cst_22 = arith.constant dense<0.000000e+00> : vector<1x8x8xf32>
    %76 = tpu.matmul %75, %61, %cst_22 {dimension_numbers = #tpu.dot_dimension_numbers<[2], [1], [1], [2], [0, 0, 0, 1, 1, 2], [0], [0]>} : vector<1x8x8xbf16>, vector<1x8x8xbf16>, vector<1x8x8xf32> -> vector<1x8x8xf32>
    "tpu.trace_stop"() : () -> ()
    %77 = vector.shape_cast %76 : vector<1x8x8xf32> to vector<8x8xf32>
    %78 = arith.truncf %77 : vector<8x8xf32> to vector<8x8xbf16>
    %c0_23 = arith.constant 0 : index
    %c16 = arith.constant 16 : index
    %79 = vector.load %arg15[%c0_23, %c16] : memref<8x32xbf16, #tpu.memory_space<vmem>>, vector<8x8xbf16>
    tpu.vector_store %arg15[%c0_23, %c16], %78 {strides = array<i32>} : memref<8x32xbf16, #tpu.memory_space<vmem>>, vector<8x8xbf16>,
    %80 = vector.extract_strided_slice %7 {offsets = [0, 24], sizes = [8, 8], strides = [1, 1]} : vector<8x96xbf16> to vector<8x8xbf16>
    %81 = vector.shape_cast %80 : vector<8x8xbf16> to vector<1x8x8xbf16>
    %82 = vector.extract_strided_slice %7 {offsets = [0, 56], sizes = [8, 8], strides = [1, 1]} : vector<8x96xbf16> to vector<8x8xbf16>
    %83 = vector.shape_cast %82 : vector<8x8xbf16> to vector<1x8x8xbf16>
    %84 = vector.extract_strided_slice %7 {offsets = [0, 88], sizes = [8, 8], strides = [1, 1]} : vector<8x96xbf16> to vector<8x8xbf16>
    %85 = vector.shape_cast %84 : vector<8x8xbf16> to vector<1x8x8xbf16>
    "tpu.trace_start"() <{level = 10 : i32, message = "zqd,zkd->zqk"}> : () -> ()
    %cst_24 = arith.constant dense<0.000000e+00> : vector<1x8x8xf32>
    %86 = tpu.matmul %81, %83, %cst_24 {dimension_numbers = #tpu.dot_dimension_numbers<[2], [2], [1], [1], [0, 0, 0, 1, 1, 1], [0], [0]>} : vector<1x8x8xbf16>, vector<1x8x8xbf16>, vector<1x8x8xf32> -> vector<1x8x8xf32>
    "tpu.trace_stop"() : () -> ()
    %cst_25 = arith.constant 0.353553385 : f32
    %87 = vector.broadcast %cst_25 : f32 to vector<1x8x8xf32>
    %88 = arith.mulf %86, %87 : vector<1x8x8xf32>
    %cst_26 = arith.constant dense<0xFF800000> : vector<1x8xf32>
    %89 = vector.multi_reduction <maximumf>, %88, %cst_26 [2] : vector<1x8x8xf32> to vector<1x8xf32>
    %90 = vector.shape_cast %89 : vector<1x8xf32> to vector<1x8x1xf32>
    %91 = vector.broadcast %90 : vector<1x8x1xf32> to vector<1x8x8xf32>
    %92 = arith.subf %88, %91 : vector<1x8x8xf32>
    %93 = math.exp %92 : vector<1x8x8xf32>
    %cst_27 = arith.constant dense<0.000000e+00> : vector<1x8xf32>
    %94 = vector.multi_reduction <add>, %93, %cst_27 [2] : vector<1x8x8xf32> to vector<1x8xf32>
    %95 = vector.shape_cast %94 : vector<1x8xf32> to vector<1x8x1xf32>
    %96 = tpu.reciprocal %95 {approx = true} : vector<1x8x1xf32> -> vector<1x8x1xf32>
    %97 = vector.broadcast %96 : vector<1x8x1xf32> to vector<1x8x8xf32>
    %98 = arith.mulf %93, %97 : vector<1x8x8xf32>
    %99 = arith.truncf %98 : vector<1x8x8xf32> to vector<1x8x8xbf16>
    "tpu.trace_start"() <{level = 10 : i32, message = "zqk,zkd->zqd"}> : () -> ()
    %cst_28 = arith.constant dense<0.000000e+00> : vector<1x8x8xf32>
    %100 = tpu.matmul %99, %85, %cst_28 {dimension_numbers = #tpu.dot_dimension_numbers<[2], [1], [1], [2], [0, 0, 0, 1, 1, 2], [0], [0]>} : vector<1x8x8xbf16>, vector<1x8x8xbf16>, vector<1x8x8xf32> -> vector<1x8x8xf32>
    "tpu.trace_stop"() : () -> ()
    %101 = vector.shape_cast %100 : vector<1x8x8xf32> to vector<8x8xf32>
    %102 = arith.truncf %101 : vector<8x8xf32> to vector<8x8xbf16>
    %c0_29 = arith.constant 0 : index
    %c24 = arith.constant 24 : index
    %103 = vector.load %arg15[%c0_29, %c24] : memref<8x32xbf16, #tpu.memory_space<vmem>>, vector<8x8xbf16>
    tpu.vector_store %arg15[%c0_29, %c24], %102 {strides = array<i32>} : memref<8x32xbf16, #tpu.memory_space<vmem>>, vector<8x8xbf16>,
    %c0_30 = arith.constant 0 : index
    %c0_31 = arith.constant 0 : index
    %104 = vector.load %arg15[%c0_30, %c0_31] : memref<8x32xbf16, #tpu.memory_space<vmem>>, vector<8x32xbf16>
    %c0_32 = arith.constant 0 : index
    %c0_33 = arith.constant 0 : index
    %105 = vector.load %arg4[%c0_32, %c0_33] : memref<32x32xbf16, #tpu.memory_space<vmem>>, vector<32x32xbf16>
    %cst_34 = arith.constant dense<0.000000e+00> : vector<8x32xf32>
    %106 = tpu.matmul %104, %105, %cst_34 {dimension_numbers = #tpu.dot_dimension_numbers<[1], [0], [0], [1], [0, 0, 1, 1], [], []>} : vector<8x32xbf16>, vector<32x32xbf16>, vector<8x32xf32> -> vector<8x32xf32>
    %c0_35 = arith.constant 0 : index
    %c0_36 = arith.constant 0 : index
    %107 = vector.load %arg5[%c0_35, %c0_36] : memref<1x32xf32, #tpu.memory_space<vmem>>, vector<1x32xf32>
    %108 = vector.broadcast %107 : vector<1x32xf32> to vector<8x32xf32>
    %109 = arith.addf %106, %108 : vector<8x32xf32>
    %110 = arith.addf %0, %109 : vector<8x32xf32>
    %c0_37 = arith.constant 0 : index
    %c0_38 = arith.constant 0 : index
    %111 = vector.load %arg10[%c0_37, %c0_38] : memref<1x32xf32, #tpu.memory_space<vmem>>, vector<1x32xf32>
    %c0_39 = arith.constant 0 : index
    %c0_40 = arith.constant 0 : index
    %112 = vector.load %arg11[%c0_39, %c0_40] : memref<1x32xf32, #tpu.memory_space<vmem>>, vector<1x32xf32>
    %cst_41 = arith.constant dense<0.000000e+00> : vector<8xf32>
    %113 = vector.multi_reduction <add>, %110, %cst_41 [1] : vector<8x32xf32> to vector<8xf32>
    %114 = vector.shape_cast %113 : vector<8xf32> to vector<8x1xf32>
    %cst_42 = arith.constant 3.200000e+01 : f32
    %115 = vector.broadcast %cst_42 : f32 to vector<8x1xf32>
    %116 = arith.divf %114, %115 : vector<8x1xf32>
    %117 = vector.broadcast %116 : vector<8x1xf32> to vector<8x32xf32>
    %118 = arith.subf %110, %117 : vector<8x32xf32>
    %119 = arith.mulf %118, %118 : vector<8x32xf32>
    %cst_43 = arith.constant dense<0.000000e+00> : vector<8xf32>
    %120 = vector.multi_reduction <add>, %119, %cst_43 [1] : vector<8x32xf32> to vector<8xf32>
    %121 = vector.shape_cast %120 : vector<8xf32> to vector<8x1xf32>
    %cst_44 = arith.constant 3.200000e+01 : f32
    %122 = vector.broadcast %cst_44 : f32 to vector<8x1xf32>
    %123 = arith.divf %121, %122 : vector<8x1xf32>
    %cst_45 = arith.constant 9.99999974E-6 : f32
    %124 = vector.broadcast %cst_45 : f32 to vector<8x1xf32>
    %125 = arith.addf %123, %124 : vector<8x1xf32>
    %126 = math.rsqrt %125 : vector<8x1xf32>
    %127 = vector.broadcast %126 : vector<8x1xf32> to vector<8x32xf32>
    %128 = arith.mulf %118, %127 : vector<8x32xf32>
    %129 = vector.broadcast %111 : vector<1x32xf32> to vector<8x32xf32>
    %130 = arith.mulf %128, %129 : vector<8x32xf32>
    %131 = vector.broadcast %112 : vector<1x32xf32> to vector<8x32xf32>
    %132 = arith.addf %130, %131 : vector<8x32xf32>
    %133 = arith.truncf %132 : vector<8x32xf32> to vector<8x32xbf16>
    %c0_46 = arith.constant 0 : index
    %c0_47 = arith.constant 0 : index
    %134 = vector.load %arg6[%c0_46, %c0_47] : memref<32x64xbf16, #tpu.memory_space<vmem>>, vector<32x64xbf16>
    %cst_48 = arith.constant dense<0.000000e+00> : vector<8x64xf32>
    %135 = tpu.matmul %133, %134, %cst_48 {dimension_numbers = #tpu.dot_dimension_numbers<[1], [0], [0], [1], [0, 0, 1, 1], [], []>} : vector<8x32xbf16>, vector<32x64xbf16>, vector<8x64xf32> -> vector<8x64xf32>
    %c0_49 = arith.constant 0 : index
    %c0_50 = arith.constant 0 : index
    %136 = vector.load %arg7[%c0_49, %c0_50] : memref<1x64xf32, #tpu.memory_space<vmem>>, vector<1x64xf32>
    %137 = vector.broadcast %136 : vector<1x64xf32> to vector<8x64xf32>
    %138 = arith.addf %135, %137 : vector<8x64xf32>
    %cst_51 = arith.constant 0.000000e+00 : f32
    %139 = vector.broadcast %cst_51 : f32 to vector<8x64xf32>
    %140 = arith.maximumf %138, %139 : vector<8x64xf32>
    %141 = arith.truncf %140 : vector<8x64xf32> to vector<8x64xbf16>
    %c0_52 = arith.constant 0 : index
    %c0_53 = arith.constant 0 : index
    %142 = vector.load %arg8[%c0_52, %c0_53] : memref<64x32xbf16, #tpu.memory_space<vmem>>, vector<64x32xbf16>
    %cst_54 = arith.constant dense<0.000000e+00> : vector<8x32xf32>
    %143 = tpu.matmul %141, %142, %cst_54 {dimension_numbers = #tpu.dot_dimension_numbers<[1], [0], [0], [1], [0, 0, 1, 1], [], []>} : vector<8x64xbf16>, vector<64x32xbf16>, vector<8x32xf32> -> vector<8x32xf32>
    %c0_55 = arith.constant 0 : index
    %c0_56 = arith.constant 0 : index
    %144 = vector.load %arg9[%c0_55, %c0_56] : memref<1x32xf32, #tpu.memory_space<vmem>>, vector<1x32xf32>
    %145 = vector.broadcast %144 : vector<1x32xf32> to vector<8x32xf32>
    %146 = arith.addf %143, %145 : vector<8x32xf32>
    %147 = arith.addf %132, %146 : vector<8x32xf32>
    %c0_57 = arith.constant 0 : index
    %c0_58 = arith.constant 0 : index
    %148 = vector.load %arg12[%c0_57, %c0_58] : memref<1x32xf32, #tpu.memory_space<vmem>>, vector<1x32xf32>
    %c0_59 = arith.constant 0 : index
    %c0_60 = arith.constant 0 : index
    %149 = vector.load %arg13[%c0_59, %c0_60] : memref<1x32xf32, #tpu.memory_space<vmem>>, vector<1x32xf32>
    %cst_61 = arith.constant dense<0.000000e+00> : vector<8xf32>
    %150 = vector.multi_reduction <add>, %147, %cst_61 [1] : vector<8x32xf32> to vector<8xf32>
    %151 = vector.shape_cast %150 : vector<8xf32> to vector<8x1xf32>
    %cst_62 = arith.constant 3.200000e+01 : f32
    %152 = vector.broadcast %cst_62 : f32 to vector<8x1xf32>
    %153 = arith.divf %151, %152 : vector<8x1xf32>
    %154 = vector.broadcast %153 : vector<8x1xf32> to vector<8x32xf32>
    %155 = arith.subf %147, %154 : vector<8x32xf32>
    %156 = arith.mulf %155, %155 : vector<8x32xf32>
    %cst_63 = arith.constant dense<0.000000e+00> : vector<8xf32>
    %157 = vector.multi_reduction <add>, %156, %cst_63 [1] : vector<8x32xf32> to vector<8xf32>
    %158 = vector.shape_cast %157 : vector<8xf32> to vector<8x1xf32>
    %cst_64 = arith.constant 3.200000e+01 : f32
    %159 = vector.broadcast %cst_64 : f32 to vector<8x1xf32>
    %160 = arith.divf %158, %159 : vector<8x1xf32>
    %cst_65 = arith.constant 9.99999974E-6 : f32
    %161 = vector.broadcast %cst_65 : f32 to vector<8x1xf32>
    %162 = arith.addf %160, %161 : vector<8x1xf32>
    %163 = math.rsqrt %162 : vector<8x1xf32>
    %164 = vector.broadcast %163 : vector<8x1xf32> to vector<8x32xf32>
    %165 = arith.mulf %155, %164 : vector<8x32xf32>
    %166 = vector.broadcast %148 : vector<1x32xf32> to vector<8x32xf32>
    %167 = arith.mulf %165, %166 : vector<8x32xf32>
    %168 = vector.broadcast %149 : vector<1x32xf32> to vector<8x32xf32>
    %169 = arith.addf %167, %168 : vector<8x32xf32>
    %c0_66 = arith.constant 0 : index
    %c0_67 = arith.constant 0 : index
    %170 = vector.load %arg14[%c0_66, %c0_67] : memref<8x32xf32, #tpu.memory_space<vmem>>, vector<8x32xf32>
    tpu.vector_store %arg14[%c0_66, %c0_67], %169 {strides = array<i32>} : memref<8x32xf32, #tpu.memory_space<vmem>>, vector<8x32xf32>,
    return
  }
  func.func @transform_0(%arg0: i32) -> (i32, i32) {
    %c0_i32 = arith.constant 0 : i32
    %c0_i32_0 = arith.constant 0 : i32
    return %arg0, %c0_i32 : i32, i32
  }
  func.func @transform_1(%arg0: i32) -> (i32, i32) {
    %c0_i32 = arith.constant 0 : i32
    %c0_i32_0 = arith.constant 0 : i32
    %c0_i32_1 = arith.constant 0 : i32
    return %c0_i32, %c0_i32_0 : i32, i32
  }
  func.func @transform_2(%arg0: i32) -> (i32, i32) {
    %c0_i32 = arith.constant 0 : i32
    %c0_i32_0 = arith.constant 0 : i32
    %c0_i32_1 = arith.constant 0 : i32
    return %c0_i32, %c0_i32_0 : i32, i32
  }
  func.func @transform_3(%arg0: i32) -> (i32, i32) {
    %c0_i32 = arith.constant 0 : i32
    %c0_i32_0 = arith.constant 0 : i32
    %c0_i32_1 = arith.constant 0 : i32
    return %c0_i32, %c0_i32_0 : i32, i32
  }
  func.func @transform_4(%arg0: i32) -> (i32, i32) {
    %c0_i32 = arith.constant 0 : i32
    %c0_i32_0 = arith.constant 0 : i32
    %c0_i32_1 = arith.constant 0 : i32
    return %c0_i32, %c0_i32_0 : i32, i32
  }
  func.func @transform_5(%arg0: i32) -> (i32, i32) {
    %c0_i32 = arith.constant 0 : i32
    %c0_i32_0 = arith.constant 0 : i32
    %c0_i32_1 = arith.constant 0 : i32
    return %c0_i32, %c0_i32_0 : i32, i32
  }
  func.func @transform_6(%arg0: i32) -> (i32, i32) {
    %c0_i32 = arith.constant 0 : i32
    %c0_i32_0 = arith.constant 0 : i32
    %c0_i32_1 = arith.constant 0 : i32
    return %c0_i32, %c0_i32_0 : i32, i32
  }
  func.func @transform_7(%arg0: i32) -> (i32, i32) {
    %c0_i32 = arith.constant 0 : i32
    %c0_i32_0 = arith.constant 0 : i32
    %c0_i32_1 = arith.constant 0 : i32
    return %c0_i32, %c0_i32_0 : i32, i32
  }
  func.func @transform_8(%arg0: i32) -> (i32, i32) {
    %c0_i32 = arith.constant 0 : i32
    %c0_i32_0 = arith.constant 0 : i32
    %c0_i32_1 = arith.constant 0 : i32
    return %c0_i32, %c0_i32_0 : i32, i32
  }
  func.func @transform_9(%arg0: i32) -> (i32, i32) {
    %c0_i32 = arith.constant 0 : i32
    %c0_i32_0 = arith.constant 0 : i32
    %c0_i32_1 = arith.constant 0 : i32
    return %c0_i32, %c0_i32_0 : i32, i32
  }
  func.func @transform_10(%arg0: i32) -> (i32, i32) {
    %c0_i32 = arith.constant 0 : i32
    %c0_i32_0 = arith.constant 0 : i32
    %c0_i32_1 = arith.constant 0 : i32
    return %c0_i32, %c0_i32_0 : i32, i32
  }
  func.func @transform_11(%arg0: i32) -> (i32, i32) {
    %c0_i32 = arith.constant 0 : i32
    %c0_i32_0 = arith.constant 0 : i32
    %c0_i32_1 = arith.constant 0 : i32
    return %c0_i32, %c0_i32_0 : i32, i32
  }
  func.func @transform_12(%arg0: i32) -> (i32, i32) {
    %c0_i32 = arith.constant 0 : i32
    %c0_i32_0 = arith.constant 0 : i32
    %c0_i32_1 = arith.constant 0 : i32
    return %c0_i32, %c0_i32_0 : i32, i32
  }
  func.func @transform_13(%arg0: i32) -> (i32, i32) {
    %c0_i32 = arith.constant 0 : i32
    %c0_i32_0 = arith.constant 0 : i32
    return %arg0, %c0_i32 : i32, i32
  }
}

module attributes {stable_mosaic.version = 11 : i64} {
  func.func @kernel(%arg0: i32, %arg1: memref<8x32xf32, #tpu.memory_space<vmem>>, %arg2: memref<32x96xbf16, #tpu.memory_space<vmem>>, %arg3: memref<1x96xf32, #tpu.memory_space<vmem>>, %arg4: memref<32x32xbf16, #tpu.memory_space<vmem>>, %arg5: memref<1x32xf32, #tpu.memory_space<vmem>>, %arg6: memref<32x64xbf16, #tpu.memory_space<vmem>>, %arg7: memref<1x64xf32, #tpu.memory_space<vmem>>, %arg8: memref<64x32xbf16, #tpu.memory_space<vmem>>, %arg9: memref<1x32xf32, #tpu.memory_space<vmem>>, %arg10: memref<1x32xf32, #tpu.memory_space<vmem>>, %arg11: memref<1x32xf32, #tpu.memory_space<vmem>>, %arg12: memref<1x32xf32, #tpu.memory_space<vmem>>, %arg13: memref<1x32xf32, #tpu.memory_space<vmem>>, %arg14: memref<8x32xf32, #tpu.memory_space<vmem>>, %arg15: memref<8x32xbf16, #tpu.memory_space<vmem>>) attributes {dimension_semantics = [#tpu.dimension_semantics<parallel>], iteration_bounds = array<i64: 2>, scalar_prefetch = 0 : i64, scratch_operands = 1 : i64, tpu.core_type = #tpu.core_type<tc>, window_params = [{transform_indices = @transform_0, window_bounds = array<i64: 8, 32>}, {pipeline_mode = #tpu.pipeline_mode<synchronous>, transform_indices = @transform_1, window_bounds = array<i64: 32, 96>}, {pipeline_mode = #tpu.pipeline_mode<synchronous>, transform_indices = @transform_2, window_bounds = array<i64: 1, 96>}, {pipeline_mode = #tpu.pipeline_mode<synchronous>, transform_indices = @transform_3, window_bounds = array<i64: 32, 32>}, {pipeline_mode = #tpu.pipeline_mode<synchronous>, transform_indices = @transform_4, window_bounds = array<i64: 1, 32>}, {pipeline_mode = #tpu.pipeline_mode<synchronous>, transform_indices = @transform_5, window_bounds = array<i64: 32, 64>}, {pipeline_mode = #tpu.pipeline_mode<synchronous>, transform_indices = @transform_6, window_bounds = array<i64: 1, 64>}, {pipeline_mode = #tpu.pipeline_mode<synchronous>, transform_indices = @transform_7, window_bounds = array<i64: 64, 32>}, {pipeline_mode = #tpu.pipeline_mode<synchronous>, transform_indices = @transform_8, window_bounds = array<i64: 1, 32>}, {pipeline_mode = #tpu.pipeline_mode<synchronous>, transform_indices = @transform_9, window_bounds = array<i64: 1, 32>}, {pipeline_mode = #tpu.pipeline_mode<synchronous>, transform_indices = @transform_10, window_bounds = array<i64: 1, 32>}, {pipeline_mode = #tpu.pipeline_mode<synchronous>, transform_indices = @transform_11, window_bounds = array<i64: 1, 32>}, {pipeline_mode = #tpu.pipeline_mode<synchronous>, transform_indices = @transform_12, window_bounds = array<i64: 1, 32>}, {transform_indices = @transform_13, window_bounds = array<i64: 8, 32>}]} {
    %c0 = arith.constant 0 : index
    %c0_0 = arith.constant 0 : index
    %0 = vector.load %arg1[%c0, %c0_0] : memref<8x32xf32, #tpu.memory_space<vmem>>, vector<8x32xf32>
    %1 = arith.truncf %0 : vector<8x32xf32> to vector<8x32xbf16>
    %c0_1 = arith.constant 0 : index
    %c0_2 = arith.constant 0 : index
    %2 = vector.load %arg2[%c0_1, %c0_2] : memref<32x96xbf16, #tpu.memory_space<vmem>>, vector<32x96xbf16>
    %cst = arith.constant dense<0.000000e+00> : vector<8x96xf32>
    %3 = tpu.matmul %1, %2, %cst {dimension_numbers = #tpu.dot_dimension_numbers<[1], [0], [0], [1], [0, 0, 1, 1], [], []>} : vector<8x32xbf16>, vector<32x96xbf16>, vector<8x96xf32> -> vector<8x96xf32>
    %c0_3 = arith.constant 0 : index
    %c0_4 = arith.constant 0 : index
    %4 = vector.load %arg3[%c0_3, %c0_4] : memref<1x96xf32, #tpu.memory_space<vmem>>, vector<1x96xf32>
    %5 = vector.broadcast %4 : vector<1x96xf32> to vector<8x96xf32>
    %6 = arith.addf %3, %5 : vector<8x96xf32>
    %7 = arith.truncf %6 : vector<8x96xf32> to vector<8x96xbf16>
    %8 = vector.extract_strided_slice %7 {offsets = [0, 0], sizes = [8, 8], strides = [1, 1]} : vector<8x96xbf16> to vector<8x8xbf16>
    %9 = vector.shape_cast %8 : vector<8x8xbf16> to vector<1x8x8xbf16>
    %10 = vector.extract_strided_slice %7 {offsets = [0, 32], sizes = [8, 8], strides = [1, 1]} : vector<8x96xbf16> to vector<8x8xbf16>
    %11 = vector.shape_cast %10 : vector<8x8xbf16> to vector<1x8x8xbf16>
    %12 = vector.extract_strided_slice %7 {offsets = [0, 64], sizes = [8, 8], strides = [1, 1]} : vector<8x96xbf16> to vector<8x8xbf16>
    %13 = vector.shape_cast %12 : vector<8x8xbf16> to vector<1x8x8xbf16>
    "tpu.trace_start"() <{level = 10 : i32, message = "zqd,zkd->zqk"}> : () -> ()
    %cst_5 = arith.constant dense<0.000000e+00> : vector<1x8x8xf32>
    %14 = tpu.matmul %9, %11, %cst_5 {dimension_numbers = #tpu.dot_dimension_numbers<[2], [2], [1], [1], [0, 0, 0, 1, 1, 1], [0], [0]>} : vector<1x8x8xbf16>, vector<1x8x8xbf16>, vector<1x8x8xf32> -> vector<1x8x8xf32>
    "tpu.trace_stop"() : () -> ()
    %cst_6 = arith.constant 0.353553385 : f32
    %15 = vector.broadcast %cst_6 : f32 to vector<1x8x8xf32>
    %16 = arith.mulf %14, %15 : vector<1x8x8xf32>
    %cst_7 = arith.constant dense<0xFF800000> : vector<1x8xf32>
    %17 = vector.multi_reduction <maximumf>, %16, %cst_7 [2] : vector<1x8x8xf32> to vector<1x8xf32>
    %18 = vector.shape_cast %17 : vector<1x8xf32> to vector<1x8x1xf32>
    %19 = vector.broadcast %18 : vector<1x8x1xf32> to vector<1x8x8xf32>
    %20 = arith.subf %16, %19 : vector<1x8x8xf32>
    %21 = math.exp %20 : vector<1x8x8xf32>
    %cst_8 = arith.constant dense<0.000000e+00> : vector<1x8xf32>
    %22 = vector.multi_reduction <add>, %21, %cst_8 [2] : vector<1x8x8xf32> to vector<1x8xf32>
    %23 = vector.shape_cast %22 : vector<1x8xf32> to vector<1x8x1xf32>
    %24 = tpu.reciprocal %23 {approx = true} : vector<1x8x1xf32> -> vector<1x8x1xf32>
    %25 = vector.broadcast %24 : vector<1x8x1xf32> to vector<1x8x8xf32>
    %26 = arith.mulf %21, %25 : vector<1x8x8xf32>
    %27 = arith.truncf %26 : vector<1x8x8xf32> to vector<1x8x8xbf16>
    "tpu.trace_start"() <{level = 10 : i32, message = "zqk,zkd->zqd"}> : () -> ()
    %cst_9 = arith.constant dense<0.000000e+00> : vector<1x8x8xf32>
    %28 = tpu.matmul %27, %13, %cst_9 {dimension_numbers = #tpu.dot_dimension_numbers<[2], [1], [1], [2], [0, 0, 0, 1, 1, 2], [0], [0]>} : vector<1x8x8xbf16>, vector<1x8x8xbf16>, vector<1x8x8xf32> -> vector<1x8x8xf32>
    "tpu.trace_stop"() : () -> ()
    %29 = vector.shape_cast %28 : vector<1x8x8xf32> to vector<8x8xf32>
    %30 = arith.truncf %29 : vector<8x8xf32> to vector<8x8xbf16>
    %c0_10 = arith.constant 0 : index
    %c0_11 = arith.constant 0 : index
    %31 = vector.load %arg15[%c0_10, %c0_11] : memref<8x32xbf16, #tpu.memory_space<vmem>>, vector<8x8xbf16>
    tpu.vector_store %arg15[%c0_10, %c0_11], %30 {strides = array<i32>} : memref<8x32xbf16, #tpu.memory_space<vmem>>, vector<8x8xbf16>,
    %32 = vector.extract_strided_slice %7 {offsets = [0, 8], sizes = [8, 8], strides = [1, 1]} : vector<8x96xbf16> to vector<8x8xbf16>
    %33 = vector.shape_cast %32 : vector<8x8xbf16> to vector<1x8x8xbf16>
    %34 = vector.extract_strided_slice %7 {offsets = [0, 40], sizes = [8, 8], strides = [1, 1]} : vector<8x96xbf16> to vector<8x8xbf16>
    %35 = vector.shape_cast %34 : vector<8x8xbf16> to vector<1x8x8xbf16>
    %36 = vector.extract_strided_slice %7 {offsets = [0, 72], sizes = [8, 8], strides = [1, 1]} : vector<8x96xbf16> to vector<8x8xbf16>
    %37 = vector.shape_cast %36 : vector<8x8xbf16> to vector<1x8x8xbf16>
    "tpu.trace_start"() <{level = 10 : i32, message = "zqd,zkd->zqk"}> : () -> ()
    %cst_12 = arith.constant dense<0.000000e+00> : vector<1x8x8xf32>
    %38 = tpu.matmul %33, %35, %cst_12 {dimension_numbers = #tpu.dot_dimension_numbers<[2], [2], [1], [1], [0, 0, 0, 1, 1, 1], [0], [0]>} : vector<1x8x8xbf16>, vector<1x8x8xbf16>, vector<1x8x8xf32> -> vector<1x8x8xf32>
    "tpu.trace_stop"() : () -> ()
    %cst_13 = arith.constant 0.353553385 : f32
    %39 = vector.broadcast %cst_13 : f32 to vector<1x8x8xf32>
    %40 = arith.mulf %38, %39 : vector<1x8x8xf32>
    %cst_14 = arith.constant dense<0xFF800000> : vector<1x8xf32>
    %41 = vector.multi_reduction <maximumf>, %40, %cst_14 [2] : vector<1x8x8xf32> to vector<1x8xf32>
    %42 = vector.shape_cast %41 : vector<1x8xf32> to vector<1x8x1xf32>
    %43 = vector.broadcast %42 : vector<1x8x1xf32> to vector<1x8x8xf32>
    %44 = arith.subf %40, %43 : vector<1x8x8xf32>
    %45 = math.exp %44 : vector<1x8x8xf32>
    %cst_15 = arith.constant dense<0.000000e+00> : vector<1x8xf32>
    %46 = vector.multi_reduction <add>, %45, %cst_15 [2] : vector<1x8x8xf32> to vector<1x8xf32>
    %47 = vector.shape_cast %46 : vector<1x8xf32> to vector<1x8x1xf32>
    %48 = tpu.reciprocal %47 {approx = true} : vector<1x8x1xf32> -> vector<1x8x1xf32>
    %49 = vector.broadcast %48 : vector<1x8x1xf32> to vector<1x8x8xf32>
    %50 = arith.mulf %45, %49 : vector<1x8x8xf32>
    %51 = arith.truncf %50 : vector<1x8x8xf32> to vector<1x8x8xbf16>
    "tpu.trace_start"() <{level = 10 : i32, message = "zqk,zkd->zqd"}> : () -> ()
    %cst_16 = arith.constant dense<0.000000e+00> : vector<1x8x8xf32>
    %52 = tpu.matmul %51, %37, %cst_16 {dimension_numbers = #tpu.dot_dimension_numbers<[2], [1], [1], [2], [0, 0, 0, 1, 1, 2], [0], [0]>} : vector<1x8x8xbf16>, vector<1x8x8xbf16>, vector<1x8x8xf32> -> vector<1x8x8xf32>
    "tpu.trace_stop"() : () -> ()
    %53 = vector.shape_cast %52 : vector<1x8x8xf32> to vector<8x8xf32>
    %54 = arith.truncf %53 : vector<8x8xf32> to vector<8x8xbf16>
    %c0_17 = arith.constant 0 : index
    %c8 = arith.constant 8 : index
    %55 = vector.load %arg15[%c0_17, %c8] : memref<8x32xbf16, #tpu.memory_space<vmem>>, vector<8x8xbf16>
    tpu.vector_store %arg15[%c0_17, %c8], %54 {strides = array<i32>} : memref<8x32xbf16, #tpu.memory_space<vmem>>, vector<8x8xbf16>,
    %56 = vector.extract_strided_slice %7 {offsets = [0, 16], sizes = [8, 8], strides = [1, 1]} : vector<8x96xbf16> to vector<8x8xbf16>
    %57 = vector.shape_cast %56 : vector<8x8xbf16> to vector<1x8x8xbf16>
    %58 = vector.extract_strided_slice %7 {offsets = [0, 48], sizes = [8, 8], strides = [1, 1]} : vector<8x96xbf16> to vector<8x8xbf16>
    %59 = vector.shape_cast %58 : vector<8x8xbf16> to vector<1x8x8xbf16>
    %60 = vector.extract_strided_slice %7 {offsets = [0, 80], sizes = [8, 8], strides = [1, 1]} : vector<8x96xbf16> to vector<8x8xbf16>
    %61 = vector.shape_cast %60 : vector<8x8xbf16> to vector<1x8x8xbf16>
    "tpu.trace_start"() <{level = 10 : i32, message = "zqd,zkd->zqk"}> : () -> ()
    %cst_18 = arith.constant dense<0.000000e+00> : vector<1x8x8xf32>
    %62 = tpu.matmul %57, %59, %cst_18 {dimension_numbers = #tpu.dot_dimension_numbers<[2], [2], [1], [1], [0, 0, 0, 1, 1, 1], [0], [0]>} : vector<1x8x8xbf16>, vector<1x8x8xbf16>, vector<1x8x8xf32> -> vector<1x8x8xf32>
    "tpu.trace_stop"() : () -> ()
    %cst_19 = arith.constant 0.353553385 : f32
    %63 = vector.broadcast %cst_19 : f32 to vector<1x8x8xf32>
    %64 = arith.mulf %62, %63 : vector<1x8x8xf32>
    %cst_20 = arith.constant dense<0xFF800000> : vector<1x8xf32>
    %65 = vector.multi_reduction <maximumf>, %64, %cst_20 [2] : vector<1x8x8xf32> to vector<1x8xf32>
    %66 = vector.shape_cast %65 : vector<1x8xf32> to vector<1x8x1xf32>
    %67 = vector.broadcast %66 : vector<1x8x1xf32> to vector<1x8x8xf32>
    %68 = arith.subf %64, %67 : vector<1x8x8xf32>
    %69 = math.exp %68 : vector<1x8x8xf32>
    %cst_21 = arith.constant dense<0.000000e+00> : vector<1x8xf32>
    %70 = vector.multi_reduction <add>, %69, %cst_21 [2] : vector<1x8x8xf32> to vector<1x8xf32>
    %71 = vector.shape_cast %70 : vector<1x8xf32> to vector<1x8x1xf32>
    %72 = tpu.reciprocal %71 {approx = true} : vector<1x8x1xf32> -> vector<1x8x1xf32>
    %73 = vector.broadcast %72 : vector<1x8x1xf32> to vector<1x8x8xf32>
    %74 = arith.mulf %69, %73 : vector<1x8x8xf32>
    %75 = arith.truncf %74 : vector<1x8x8xf32> to vector<1x8x8xbf16>
    "tpu.trace_start"() <{level = 10 : i32, message = "zqk,zkd->zqd"}> : () -> ()
    %cst_22 = arith.constant dense<0.000000e+00> : vector<1x8x8xf32>
    %76 = tpu.matmul %75, %61, %cst_22 {dimension_numbers = #tpu.dot_dimension_numbers<[2], [1], [1], [2], [0, 0, 0, 1, 1, 2], [0], [0]>} : vector<1x8x8xbf16>, vector<1x8x8xbf16>, vector<1x8x8xf32> -> vector<1x8x8xf32>
    "tpu.trace_stop"() : () -> ()
    %77 = vector.shape_cast %76 : vector<1x8x8xf32> to vector<8x8xf32>
    %78 = arith.truncf %77 : vector<8x8xf32> to vector<8x8xbf16>
    %c0_23 = arith.constant 0 : index
    %c16 = arith.constant 16 : index
    %79 = vector.load %arg15[%c0_23, %c16] : memref<8x32xbf16, #tpu.memory_space<vmem>>, vector<8x8xbf16>
    tpu.vector_store %arg15[%c0_23, %c16], %78 {strides = array<i32>} : memref<8x32xbf16, #tpu.memory_space<vmem>>, vector<8x8xbf16>,
    %80 = vector.extract_strided_slice %7 {offsets = [0, 24], sizes = [8, 8], strides = [1, 1]} : vector<8x96xbf16> to vector<8x8xbf16>
    %81 = vector.shape_cast %80 : vector<8x8xbf16> to vector<1x8x8xbf16>
    %82 = vector.extract_strided_slice %7 {offsets = [0, 56], sizes = [8, 8], strides = [1, 1]} : vector<8x96xbf16> to vector<8x8xbf16>
    %83 = vector.shape_cast %82 : vector<8x8xbf16> to vector<1x8x8xbf16>
    %84 = vector.extract_strided_slice %7 {offsets = [0, 88], sizes = [8, 8], strides = [1, 1]} : vector<8x96xbf16> to vector<8x8xbf16>
    %85 = vector.shape_cast %84 : vector<8x8xbf16> to vector<1x8x8xbf16>
    "tpu.trace_start"() <{level = 10 : i32, message = "zqd,zkd->zqk"}> : () -> ()
    %cst_24 = arith.constant dense<0.000000e+00> : vector<1x8x8xf32>
    %86 = tpu.matmul %81, %83, %cst_24 {dimension_numbers = #tpu.dot_dimension_numbers<[2], [2], [1], [1], [0, 0, 0, 1, 1, 1], [0], [0]>} : vector<1x8x8xbf16>, vector<1x8x8xbf16>, vector<1x8x8xf32> -> vector<1x8x8xf32>
    "tpu.trace_stop"() : () -> ()
    %cst_25 = arith.constant 0.353553385 : f32
    %87 = vector.broadcast %cst_25 : f32 to vector<1x8x8xf32>
    %88 = arith.mulf %86, %87 : vector<1x8x8xf32>
    %cst_26 = arith.constant dense<0xFF800000> : vector<1x8xf32>
    %89 = vector.multi_reduction <maximumf>, %88, %cst_26 [2] : vector<1x8x8xf32> to vector<1x8xf32>
    %90 = vector.shape_cast %89 : vector<1x8xf32> to vector<1x8x1xf32>
    %91 = vector.broadcast %90 : vector<1x8x1xf32> to vector<1x8x8xf32>
    %92 = arith.subf %88, %91 : vector<1x8x8xf32>
    %93 = math.exp %92 : vector<1x8x8xf32>
    %cst_27 = arith.constant dense<0.000000e+00> : vector<1x8xf32>
    %94 = vector.multi_reduction <add>, %93, %cst_27 [2] : vector<1x8x8xf32> to vector<1x8xf32>
    %95 = vector.shape_cast %94 : vector<1x8xf32> to vector<1x8x1xf32>
    %96 = tpu.reciprocal %95 {approx = true} : vector<1x8x1xf32> -> vector<1x8x1xf32>
    %97 = vector.broadcast %96 : vector<1x8x1xf32> to vector<1x8x8xf32>
    %98 = arith.mulf %93, %97 : vector<1x8x8xf32>
    %99 = arith.truncf %98 : vector<1x8x8xf32> to vector<1x8x8xbf16>
    "tpu.trace_start"() <{level = 10 : i32, message = "zqk,zkd->zqd"}> : () -> ()
    %cst_28 = arith.constant dense<0.000000e+00> : vector<1x8x8xf32>
    %100 = tpu.matmul %99, %85, %cst_28 {dimension_numbers = #tpu.dot_dimension_numbers<[2], [1], [1], [2], [0, 0, 0, 1, 1, 2], [0], [0]>} : vector<1x8x8xbf16>, vector<1x8x8xbf16>, vector<1x8x8xf32> -> vector<1x8x8xf32>
    "tpu.trace_stop"() : () -> ()
    %101 = vector.shape_cast %100 : vector<1x8x8xf32> to vector<8x8xf32>
    %102 = arith.truncf %101 : vector<8x8xf32> to vector<8x8xbf16>
    %c0_29 = arith.constant 0 : index
    %c24 = arith.constant 24 : index
    %103 = vector.load %arg15[%c0_29, %c24] : memref<8x32xbf16, #tpu.memory_space<vmem>>, vector<8x8xbf16>
    tpu.vector_store %arg15[%c0_29, %c24], %102 {strides = array<i32>} : memref<8x32xbf16, #tpu.memory_space<vmem>>, vector<8x8xbf16>,
    %c0_30 = arith.constant 0 : index
    %c0_31 = arith.constant 0 : index
    %104 = vector.load %arg15[%c0_30, %c0_31] : memref<8x32xbf16, #tpu.memory_space<vmem>>, vector<8x32xbf16>
    %c0_32 = arith.constant 0 : index
    %c0_33 = arith.constant 0 : index
    %105 = vector.load %arg4[%c0_32, %c0_33] : memref<32x32xbf16, #tpu.memory_space<vmem>>, vector<32x32xbf16>
    %cst_34 = arith.constant dense<0.000000e+00> : vector<8x32xf32>
    %106 = tpu.matmul %104, %105, %cst_34 {dimension_numbers = #tpu.dot_dimension_numbers<[1], [0], [0], [1], [0, 0, 1, 1], [], []>} : vector<8x32xbf16>, vector<32x32xbf16>, vector<8x32xf32> -> vector<8x32xf32>
    %c0_35 = arith.constant 0 : index
    %c0_36 = arith.constant 0 : index
    %107 = vector.load %arg5[%c0_35, %c0_36] : memref<1x32xf32, #tpu.memory_space<vmem>>, vector<1x32xf32>
    %108 = vector.broadcast %107 : vector<1x32xf32> to vector<8x32xf32>
    %109 = arith.addf %106, %108 : vector<8x32xf32>
    %110 = arith.addf %0, %109 : vector<8x32xf32>
    %c0_37 = arith.constant 0 : index
    %c0_38 = arith.constant 0 : index
    %111 = vector.load %arg10[%c0_37, %c0_38] : memref<1x32xf32, #tpu.memory_space<vmem>>, vector<1x32xf32>
    %c0_39 = arith.constant 0 : index
    %c0_40 = arith.constant 0 : index
    %112 = vector.load %arg11[%c0_39, %c0_40] : memref<1x32xf32, #tpu.memory_space<vmem>>, vector<1x32xf32>
    %cst_41 = arith.constant dense<0.000000e+00> : vector<8xf32>
    %113 = vector.multi_reduction <add>, %110, %cst_41 [1] : vector<8x32xf32> to vector<8xf32>
    %114 = vector.shape_cast %113 : vector<8xf32> to vector<8x1xf32>
    %cst_42 = arith.constant 3.200000e+01 : f32
    %115 = vector.broadcast %cst_42 : f32 to vector<8x1xf32>
    %116 = arith.divf %114, %115 : vector<8x1xf32>
    %117 = vector.broadcast %116 : vector<8x1xf32> to vector<8x32xf32>
    %118 = arith.subf %110, %117 : vector<8x32xf32>
    %119 = arith.mulf %118, %118 : vector<8x32xf32>
    %cst_43 = arith.constant dense<0.000000e+00> : vector<8xf32>
    %120 = vector.multi_reduction <add>, %119, %cst_43 [1] : vector<8x32xf32> to vector<8xf32>
    %121 = vector.shape_cast %120 : vector<8xf32> to vector<8x1xf32>
    %cst_44 = arith.constant 3.200000e+01 : f32
    %122 = vector.broadcast %cst_44 : f32 to vector<8x1xf32>
    %123 = arith.divf %121, %122 : vector<8x1xf32>
    %cst_45 = arith.constant 9.99999974E-6 : f32
    %124 = vector.broadcast %cst_45 : f32 to vector<8x1xf32>
    %125 = arith.addf %123, %124 : vector<8x1xf32>
    %126 = math.rsqrt %125 : vector<8x1xf32>
    %127 = vector.broadcast %126 : vector<8x1xf32> to vector<8x32xf32>
    %128 = arith.mulf %118, %127 : vector<8x32xf32>
    %129 = vector.broadcast %111 : vector<1x32xf32> to vector<8x32xf32>
    %130 = arith.mulf %128, %129 : vector<8x32xf32>
    %131 = vector.broadcast %112 : vector<1x32xf32> to vector<8x32xf32>
    %132 = arith.addf %130, %131 : vector<8x32xf32>
    %133 = arith.truncf %132 : vector<8x32xf32> to vector<8x32xbf16>
    %c0_46 = arith.constant 0 : index
    %c0_47 = arith.constant 0 : index
    %134 = vector.load %arg6[%c0_46, %c0_47] : memref<32x64xbf16, #tpu.memory_space<vmem>>, vector<32x64xbf16>
    %cst_48 = arith.constant dense<0.000000e+00> : vector<8x64xf32>
    %135 = tpu.matmul %133, %134, %cst_48 {dimension_numbers = #tpu.dot_dimension_numbers<[1], [0], [0], [1], [0, 0, 1, 1], [], []>} : vector<8x32xbf16>, vector<32x64xbf16>, vector<8x64xf32> -> vector<8x64xf32>
    %c0_49 = arith.constant 0 : index
    %c0_50 = arith.constant 0 : index
    %136 = vector.load %arg7[%c0_49, %c0_50] : memref<1x64xf32, #tpu.memory_space<vmem>>, vector<1x64xf32>
    %137 = vector.broadcast %136 : vector<1x64xf32> to vector<8x64xf32>
    %138 = arith.addf %135, %137 : vector<8x64xf32>
    %cst_51 = arith.constant 0.000000e+00 : f32
    %139 = vector.broadcast %cst_51 : f32 to vector<8x64xf32>
    %140 = arith.maximumf %138, %139 : vector<8x64xf32>
    %141 = arith.truncf %140 : vector<8x64xf32> to vector<8x64xbf16>
    %c0_52 = arith.constant 0 : index
    %c0_53 = arith.constant 0 : index
    %142 = vector.load %arg8[%c0_52, %c0_53] : memref<64x32xbf16, #tpu.memory_space<vmem>>, vector<64x32xbf16>
    %cst_54 = arith.constant dense<0.000000e+00> : vector<8x32xf32>
    %143 = tpu.matmul %141, %142, %cst_54 {dimension_numbers = #tpu.dot_dimension_numbers<[1], [0], [0], [1], [0, 0, 1, 1], [], []>} : vector<8x64xbf16>, vector<64x32xbf16>, vector<8x32xf32> -> vector<8x32xf32>
    %c0_55 = arith.constant 0 : index
    %c0_56 = arith.constant 0 : index
    %144 = vector.load %arg9[%c0_55, %c0_56] : memref<1x32xf32, #tpu.memory_space<vmem>>, vector<1x32xf32>
    %145 = vector.broadcast %144 : vector<1x32xf32> to vector<8x32xf32>
    %146 = arith.addf %143, %145 : vector<8x32xf32>
    %147 = arith.addf %132, %146 : vector<8x32xf32>
    %c0_57 = arith.constant 0 : index
    %c0_58 = arith.constant 0 : index
    %148 = vector.load %arg12[%c0_57, %c0_58] : memref<1x32xf32, #tpu.memory_space<vmem>>, vector<1x32xf32>
    %c0_59 = arith.constant 0 : index
    %c0_60 = arith.constant 0 : index
    %149 = vector.load %arg13[%c0_59, %c0_60] : memref<1x32xf32, #tpu.memory_space<vmem>>, vector<1x32xf32>
    %cst_61 = arith.constant dense<0.000000e+00> : vector<8xf32>
    %150 = vector.multi_reduction <add>, %147, %cst_61 [1] : vector<8x32xf32> to vector<8xf32>
    %151 = vector.shape_cast %150 : vector<8xf32> to vector<8x1xf32>
    %cst_62 = arith.constant 3.200000e+01 : f32
    %152 = vector.broadcast %cst_62 : f32 to vector<8x1xf32>
    %153 = arith.divf %151, %152 : vector<8x1xf32>
    %154 = vector.broadcast %153 : vector<8x1xf32> to vector<8x32xf32>
    %155 = arith.subf %147, %154 : vector<8x32xf32>
    %156 = arith.mulf %155, %155 : vector<8x32xf32>
    %cst_63 = arith.constant dense<0.000000e+00> : vector<8xf32>
    %157 = vector.multi_reduction <add>, %156, %cst_63 [1] : vector<8x32xf32> to vector<8xf32>
    %158 = vector.shape_cast %157 : vector<8xf32> to vector<8x1xf32>
    %cst_64 = arith.constant 3.200000e+01 : f32
    %159 = vector.broadcast %cst_64 : f32 to vector<8x1xf32>
    %160 = arith.divf %158, %159 : vector<8x1xf32>
    %cst_65 = arith.constant 9.99999974E-6 : f32
    %161 = vector.broadcast %cst_65 : f32 to vector<8x1xf32>
    %162 = arith.addf %160, %161 : vector<8x1xf32>
    %163 = math.rsqrt %162 : vector<8x1xf32>
    %164 = vector.broadcast %163 : vector<8x1xf32> to vector<8x32xf32>
    %165 = arith.mulf %155, %164 : vector<8x32xf32>
    %166 = vector.broadcast %148 : vector<1x32xf32> to vector<8x32xf32>
    %167 = arith.mulf %165, %166 : vector<8x32xf32>
    %168 = vector.broadcast %149 : vector<1x32xf32> to vector<8x32xf32>
    %169 = arith.addf %167, %168 : vector<8x32xf32>
    %c0_66 = arith.constant 0 : index
    %c0_67 = arith.constant 0 : index
    %170 = vector.load %arg14[%c0_66, %c0_67] : memref<8x32xf32, #tpu.memory_space<vmem>>, vector<8x32xf32>
    tpu.vector_store %arg14[%c0_66, %c0_67], %169 {strides = array<i32>} : memref<8x32xf32, #tpu.memory_space<vmem>>, vector<8x32xf32>,
    return
  }
  func.func @transform_0(%arg0: i32) -> (i32, i32) {
    %c0_i32 = arith.constant 0 : i32
    %c0_i32_0 = arith.constant 0 : i32
    return %arg0, %c0_i32 : i32, i32
  }
  func.func @transform_1(%arg0: i32) -> (i32, i32) {
    %c0_i32 = arith.constant 0 : i32
    %c0_i32_0 = arith.constant 0 : i32
    %c0_i32_1 = arith.constant 0 : i32
    return %c0_i32, %c0_i32_0 : i32, i32
  }
  func.func @transform_2(%arg0: i32) -> (i32, i32) {
    %c0_i32 = arith.constant 0 : i32
    %c0_i32_0 = arith.constant 0 : i32
    %c0_i32_1 = arith.constant 0 : i32
    return %c0_i32, %c0_i32_0 : i32, i32
  }
  func.func @transform_3(%arg0: i32) -> (i32, i32) {
    %c0_i32 = arith.constant 0 : i32
    %c0_i32_0 = arith.constant 0 : i32
    %c0_i32_1 = arith.constant 0 : i32
    return %c0_i32, %c0_i32_0 : i32, i32
  }
  func.func @transform_4(%arg0: i32) -> (i32, i32) {
    %c0_i32 = arith.constant 0 : i32
    %c0_i32_0 = arith.constant 0 : i32
    %c0_i32_1 = arith.constant 0 : i32
    return %c0_i32, %c0_i32_0 : i32, i32
  }
  func.func @transform_5(%arg0: i32) -> (i32, i32) {
    %c0_i32 = arith.constant 0 : i32
    %c0_i32_0 = arith.constant 0 : i32
    %c0_i32_1 = arith.constant 0 : i32
    return %c0_i32, %c0_i32_0 : i32, i32
  }
  func.func @transform_6(%arg0: i32) -> (i32, i32) {
    %c0_i32 = arith.constant 0 : i32
    %c0_i32_0 = arith.constant 0 : i32
    %c0_i32_1 = arith.constant 0 : i32
    return %c0_i32, %c0_i32_0 : i32, i32
  }
  func.func @transform_7(%arg0: i32) -> (i32, i32) {
    %c0_i32 = arith.constant 0 : i32
    %c0_i32_0 = arith.constant 0 : i32
    %c0_i32_1 = arith.constant 0 : i32
    return %c0_i32, %c0_i32_0 : i32, i32
  }
  func.func @transform_8(%arg0: i32) -> (i32, i32) {
    %c0_i32 = arith.constant 0 : i32
    %c0_i32_0 = arith.constant 0 : i32
    %c0_i32_1 = arith.constant 0 : i32
    return %c0_i32, %c0_i32_0 : i32, i32
  }
  func.func @transform_9(%arg0: i32) -> (i32, i32) {
    %c0_i32 = arith.constant 0 : i32
    %c0_i32_0 = arith.constant 0 : i32
    %c0_i32_1 = arith.constant 0 : i32
    return %c0_i32, %c0_i32_0 : i32, i32
  }
  func.func @transform_10(%arg0: i32) -> (i32, i32) {
    %c0_i32 = arith.constant 0 : i32
    %c0_i32_0 = arith.constant 0 : i32
    %c0_i32_1 = arith.constant 0 : i32
    return %c0_i32, %c0_i32_0 : i32, i32
  }
  func.func @transform_11(%arg0: i32) -> (i32, i32) {
    %c0_i32 = arith.constant 0 : i32
    %c0_i32_0 = arith.constant 0 : i32
    %c0_i32_1 = arith.constant 0 : i32
    return %c0_i32, %c0_i32_0 : i32, i32
  }
  func.func @transform_12(%arg0: i32) -> (i32, i32) {
    %c0_i32 = arith.constant 0 : i32
    %c0_i32_0 = arith.constant 0 : i32
    %c0_i32_1 = arith.constant 0 : i32
    return %c0_i32, %c0_i32_0 : i32, i32
  }
  func.func @transform_13(%arg0: i32) -> (i32, i32) {
    %c0_i32 = arith.constant 0 : i32
    %c0_i32_0 = arith.constant 0 : i32
    return %arg0, %c0_i32 : i32, i32
  }
}

</mosaic_0001>

<bundles_post_ra>
// kernel: tpu_custom_call.1
= control target key start
LH: loop header
LB: loop body
LE: loop exit
PB: predicated region body
PF: predicated region fallthrough
CT: control target
= control target key end

     0   :  { %s2189_s0 = inlined_call_operand.vmem [shape: f32[16,32], index: 0, kind: input, shape index: {}]   ;;  %s2190_s1 = inlined_call_operand.vmem [shape: bf16[32,96], index: 1, kind: input, shape index: {}]   ;;  %s2191_s2 = inlined_call_operand.vmem [shape: f32[1,96], index: 2, kind: input, shape index: {}]   ;;  %s2192_s3 = inlined_call_operand.vmem [shape: bf16[32,32], index: 3, kind: input, shape index: {}]   ;;  %s2193_s4 = inlined_call_operand.vmem [shape: f32[1,32], index: 4, kind: input, shape index: {}]   ;;  %s2194_s5 = inlined_call_operand.hbm [shape: bf16[32,64], index: 5, kind: input, shape index: {}]   ;;  %s2195_s6 = inlined_call_operand.vmem [shape: f32[1,64], index: 6, kind: input, shape index: {}]   ;;  %s2196_s7 = inlined_call_operand.vmem [shape: bf16[64,32], index: 7, kind: input, shape index: {}]   ;;  %s2197_s8 = inlined_call_operand.vmem [shape: f32[1,32], index: 8, kind: input, shape index: {}]   ;;  %s2198_s9 = inlined_call_operand.vmem [shape: f32[1,32], index: 9, kind: input, shape index: {}]   ;;  %s2199_s10 = inlined_call_operand.vmem [shape: f32[1,32], index: 10, kind: input, shape index: {}]   ;;  %s2200_s11 = inlined_call_operand.vmem [shape: f32[1,32], index: 11, kind: input, shape index: {}]   ;;  %s2201_s12 = inlined_call_operand.vmem [shape: f32[1,32], index: 12, kind: input, shape index: {}]   ;;  %s2202_s13 = inlined_call_operand.hbm [shape: f32[16,32], index: 13, kind: output, shape index: {}]  }
   0x1   :  { %2204 = sst [smem:[#allocation11_spill]] %s2189_s0 }
   0x2   :  { %2205 = sst [smem:[#allocation12_spill]] %s2194_s5 }
   0x3   :  { %18 = vsyncpa [#allocation4], 0 }
   0x4   :  { %19 = vsyncpa [#allocation5], 0 }
   0x5   :  { %21 = vsyncpa [#allocation5 + $0x1], 0  ;;  %s1836_s25 = smov 0   ;;  %s1838_s26 = smov 0  }
   0x6   :  { %s1840_s27 = smov 0   ;;  %s1842_s28 = smov 0  }
   0x7 LB: > { %2206 = sst [smem:[#allocation9_spill]] %s1746_s27  ;;  %s1857_s29 = sadd.s32 4294967295, %s1750_s28   ;;  %s1750_s28 = sphi %s1842_s28, %s2216_s28   ;;  %s1746_s27 = sphi %s1840_s27, %s2213_s27   ;;  %s1742_s26 = sphi %s1838_s26, %s2215_s26   ;;  %s1738_s25 = sphi %s1836_s25, %s2214_s25  }
   0x8   : > { %s1487_s30 = sadd.s32 4294967294, %s1750_s28   ;;  %s1861_s14 = sadd.s32 1, %s1750_s28  }
   0x9   : > { %s312_s15 = sadd.s32 1, %s1746_s27  ;;  %s309_s16 = ssub.s32 %s1750_s28, %s1861_s14 }
   0xa   : > { %p322_p0 = scmp.ne.s32.totalorder %s1746_s27, %s1742_s26  ;;  %p310_p1 = scmp.eq.s32.totalorder %s309_s16, 0 }
   0xb   : > { %p323_p2 = scmp.eq.s32.totalorder %s1857_s29, 1  ;;  %p328_p3 = scmp.ne.s32.totalorder %s1742_s26, %s1738_s25 }
   0xc   : > { %p329_p4 = scmp.eq.s32.totalorder %s1487_s30, 1  ;;  %p1488_p7 = scmp.ge.s32.totalorder %s1750_s28, 1 }
   0xd   : > { %s1872_s17 = scalar_select %p310_p1, %s1746_s27, %s312_s15  }
   0xe   : > { %p1874_p5 = por %p323_p2, %p322_p0  ;;  %p1878_p6 = por %p329_p4, %p328_p3 }
   0xf   : > { %2207 = sst [smem:[#allocation10_spill]] %s1872_s17  ;;  %p336_p8 = scmp.lt.s32.totalorder %s1750_s28, 3 }
  0x10   : > { %p1575_p9 = scmp.eq.s32.totalorder %s1857_s29, 0  ;;  %s2210_s5 = sld [smem:[#allocation12_spill]] }
  0x11   : > { %p337_p10 = pnand %p1488_p7, %p336_p8  ;;  %s1752_s23 = smov [#allocation3]  }
  0x12   : > { %s361_s24 = sshll.u32 %s1752_s23, 4  ;;  %s1753_s30 = smov 64   ;;  %s362_s24 = int_to_ptr.vmem [resolvable:$true] %s361_s24 }
  0x13   : > { %p1567_p11 = pneg %p337_p10  ;;  %s1754_s15 = smov 4  }
  0x14   : > { %405 = sbr.rel (%p337_p10) target bundleno = 2051 (0x803), region = 72 }
  0x15   : > { %p1568_p12 = pnand %p1575_p9, %p1567_p11 }
  0x16   : > { %s359_s22 = sshll.u32 %s2210_s5, 4  ;;  %s360_s22 = int_to_ptr.hbm [resolvable:$true] %s359_s22 }
  0x17   : > { %1570 = dma.hbm_to_vmem [thread:$0]  (!%p1568_p12), %s360_s22, 256, %s362_s24, [#allocation4], %s1753_s30, %s1753_s30, %s1754_s15  }
  0x19   : > { %1729 = dma.done.wait (%p1575_p9), [#allocation4], 256  }
  0x1a   : > { %1731 = vsyncadd (%p1575_p9), [#allocation4], 4294967040  ;;  %p449_p13 = scmp.lt.s32.totalorder %s1857_s29, 1  ;;  %s2211_s0 = sld [smem:[#allocation11_spill]]  ;;  %v1552_v0 = vld [vmem:[%s2190_s1 + $0x8] sm:$0xff]  ;;  %v1551_v1 = vld [vmem:[%s2190_s1] sm:$0xff] }
  0x1b   : > { %486 = vmatpush.bf16.msra.mxu0 %v1552_v0  ;;  %vm476_vm0 = vcmask 261120   ;;  %v1624_v4 = vld [vmem:[%s2191_s2] ss:$0 sm:$0xff]  ;;  %s1755_s27 = smov 104   ;;  %s1756_s17 = smov 120   ;;  %vm524_vm1 = vcmask 1047556  }
  0x1c   : > { %s450_s16 = scalar_select %p449_p13, %s1857_s29, 1  ;;  %v1760_v13 = vmov 1983009808   ;;  %v1761_v25 = vmov 1934713408   ;;  %vm860_vm2 = vcmask 64512  }
  0x1d   : > { %v515_v14 = vunpack.c.l.s4 %v1760_v13  ;;  %v529_v26 = vunpack.c.l.s4 %v1761_v25  ;;  %vm992_vm3 = vcmask 1043456   ;;  %s1762_s21 = smov 24   ;;  %s1763_s23 = smov 16   ;;  %vm1190_vm4 = vcmask 130048  }
  0x1e   : > { %s1494_s20 = sshll.u32 %s450_s16, 3  ;;  %s1758_s16 = smov 112   ;;  %vm1192_vm5 = vcmask 195584   ;;  %vm1195_vm6 = vcmask 257024   ;;  %vm1349_vm11 = vcmask 523264  }
  0x1f   : > { %487 = vmatpush.bf16.msra.mxu0 %v1551_v1  ;;  %v1926_v19 = vunpack.c.0.s8 %v515_v14  ;;  %v1935_v31 = vunpack.c.0.s8 %v529_v26  ;;  %s1764_s22 = smov 8   ;;  %s446_s24 = sand.u32 1, %s1742_s26  }
  0x20   : > { %s452_s5 = scalar_lea.vmem %s2211_s0, %s1494_s20  ;;  %s1759_s20 = smov 64  }
  0x21   : > { %v1905_v2 = vld [vmem:[%s452_s5] sm:$0xff]  ;;  %s1757_s5 = smov 96   ;;  %s1493_s30 = sshll.u32 %s446_s24, 3 }
  0x22   : > { %v455_v3 = vpack.c.bf16 %v1905_v2, %v1905_v2  ;;  %s1548_s15 = sshll.u32 %s1857_s29, 3 }
  0x24   : > { %1503 = vmatmul.msk.bf16.vlgmr.msra.gmra.mxu0 %vm476_vm0, %v455_v3 }
  0xa1   : > { %v489_v5 = vpop.f32.mrf.mxu0 }
  0xa2   : > { %v490_v6 = vadd.f32 %v1624_v4, %v489_v5 }
  0xa4   : > { %v493_v7 = vpack.c.bf16 %v490_v6, %v490_v6 }
  0xa6   : > { %499 = vrot.lane.b32.xlu1 %v493_v7, %s1755_s27  ;;  %495 = vrot.lane.b32.xlu0 %v493_v7, %s1756_s17  ;;  %v504_v15 = vshrl.u32 %v493_v7, 16  ;;  %s1401_s27 = scalar_lea.sflag [#allocation5], %s446_s24 }
  0xa9   : > { %v491_v8 = vpop.f32.mrf.mxu0 }
  0xae   : > { %616 = vrot.lane.b32.xlu1 %v493_v7, %s1757_s5  ;;  %497 = vrot.lane.b32.xlu0 %v493_v7, %s1758_s16 }
  0xb6   : > { %738 = vrot.lane.b32.xlu1 %v493_v7, %s1759_s20 }
 0x118   : > { %v1914_v9 = vpop.permute.xlu1 %499  ;;  %v1916_v10 = vpop.permute.xlu0 %495 }
 0x119   : > { %622 = vrot.lane.b32.xlu0 %v1914_v9, %s1757_s5  ;;  %618 = vrot.lane.b32.xlu2 %v1916_v10, %s1757_s5  ;;  %v505_v12 = vshrl.u32 %v1916_v10, 16  ;;  %v511_v17 = vshrl.u32 %v1914_v9, 16  ;;  %v503_v20 = vpack.i.b16 %v1916_v10, %v493_v7 }
 0x11b   : > { %v506_v18 = vpack.i.b16 %v505_v12, %v504_v15  ;;  %v517_v24 = vperm.slane %v503_v20, %v1926_v19 }
 0x11d   : > { %v544_v23 = vperm.slane %v506_v18, %v1926_v19  ;;  %v526_v30 = vrot.slane %v517_v24, 4 }
 0x11f   : > { %v552_v29 = vrot.slane %v544_v23, 4 }
 0x120   : > { %v1920_v11 = vpop.permute.xlu0 %497  ;;  %v617_v38 = vpop.permute.xlu1 %616 }
 0x121   : > { %620 = vrot.lane.b32.xlu2 %v1920_v11, %s1757_s5  ;;  %v510_v16 = vshrl.u32 %v1920_v11, 16  ;;  %v509_v22 = vpack.i.b16 %v1914_v9, %v1920_v11  ;;  %v627_v43 = vshrl.u32 %v617_v38, 16 }
 0x123   : > { %v512_v21 = vpack.i.b16 %v511_v17, %v510_v16  ;;  %v522_v28 = vperm.slane %v509_v22, %v1926_v19 }
 0x125   : > { %v549_v27 = vperm.slane %v512_v21, %v1926_v19  ;;  %v523_v35 = vrot.slane %v522_v28, 4  ;;  %v527_v36 = vsel %vm524_vm1, %v522_v28, %v526_v30 }
 0x126   : > { %v535_v39 = vperm.slane %v527_v36, %v1935_v31 }
 0x127   : > { %v550_v32 = vrot.slane %v549_v27, 4  ;;  %v553_v33 = vsel %vm524_vm1, %v549_v27, %v552_v29  ;;  %v525_v41 = vsel %vm524_vm1, %v523_v35, %v517_v24 }
 0x128   : > { %v561_v37 = vperm.slane %v553_v33, %v1935_v31  ;;  %v531_v47 = vperm.slane %v525_v41, %v1935_v31  ;;  %v538_v48 = vrot.slane %v535_v39, 4 }
 0x129   : > { %v551_v40 = vsel %vm524_vm1, %v550_v32, %v544_v23 }
 0x12a   : > { %v557_v44 = vperm.slane %v551_v40, %v1935_v31  ;;  %v564_v45 = vrot.slane %v561_v37, 4  ;;  %v536_v54 = vrot.slane %v531_v47, 4  ;;  %v539_v55 = vsel %vm524_vm1, 0, %v538_v48 }
 0x12b   : > { %v571_v3 = vrot.slane %v539_v55, 4  ;;  %v566_v40 = vsel %vm524_vm1, %v538_v48, %v531_v47 }
 0x12c   : > { %v562_v51 = vrot.slane %v557_v44, 4  ;;  %v565_v52 = vsel %vm524_vm1, 0, %v564_v45  ;;  %v537_v4 = vsel %vm524_vm1, 0, %v536_v54  ;;  %v585_v37 = vsel %vm524_vm1, %v564_v45, %v557_v44 }
 0x12d   : > { %v590_v61 = vrot.slane %v565_v52, 4  ;;  %v572_v21 = vsel %vm524_vm1, %v571_v3, %v537_v4  ;;  %v589_v52 = vperm.slane %v585_v37, %v1926_v19  ;;  %v570_v44 = vperm.slane %v566_v40, %v1926_v19 }
 0x12e   : > { %v563_v1 = vsel %vm524_vm1, 0, %v562_v51  ;;  %v576_v29 = vperm.slane %v572_v21, %v1926_v19 }
 0x12f   : > { %v591_v13 = vsel %vm524_vm1, %v590_v61, %v563_v1 }
 0x130   : > { %v595_v23 = vperm.slane %v591_v13, %v1926_v19 }
 0x132   : > { %v596_v41 = vrot.slane %v595_v23, 4 }
 0x134   : > { %v597_v48 = vsel %vm524_vm1, %v596_v41, %v589_v52 }
 0x173   : > { %v619_v34 = vpop.permute.xlu2 %618 }
 0x174   : > { %v628_v42 = vshrl.u32 %v619_v34, 16  ;;  %v626_v46 = vpack.i.b16 %v619_v34, %v617_v38 }
 0x176   : > { %v629_v49 = vpack.i.b16 %v628_v42, %v627_v43  ;;  %v640_v53 = vperm.slane %v626_v46, %v1926_v19  ;;  %v577_v46 = vrot.slane %v576_v29, 4 }
 0x178   : > { %v666_v57 = vperm.slane %v629_v49, %v1926_v19  ;;  %v648_v62 = vrot.slane %v640_v53, 4  ;;  %v578_v55 = vsel %vm524_vm1, %v577_v46, %v570_v44 }
 0x179   : > { %v582_v61 = vperm.slane %v578_v55, %v1935_v31 }
 0x17a   : > { %v674_v5 = vrot.slane %v666_v57, 4 }
 0x17b   : > { %v621_v50 = vpop.permute.xlu2 %620 }
 0x17c   : > { %v633_v58 = vshrl.u32 %v621_v50, 16 }
 0x18b   : > { %v623_v56 = vpop.permute.xlu0 %622 }
 0x18c   : > { %v632_v59 = vpack.i.b16 %v623_v56, %v621_v50  ;;  %v634_v60 = vshrl.u32 %v623_v56, 16 }
 0x18e   : > { %v635_v63 = vpack.i.b16 %v634_v60, %v633_v58  ;;  %v645_v0 = vperm.slane %v632_v59, %v1926_v19  ;;  %v601_v59 = vperm.slane %v597_v48, %v1935_v31 }
 0x190   : > { %v646_v6 = vrot.slane %v645_v0, 4  ;;  %v649_v7 = vsel %vm524_vm1, %v645_v0, %v648_v62  ;;  %v671_v8 = vperm.slane %v635_v63, %v1926_v19  ;;  %v606_v21 = vpack.i.b16 %v601_v59, %v582_v61 }
 0x191   : > { %v657_v12 = vperm.slane %v649_v7, %v1935_v31 }
 0x192   : > { %v647_v14 = vsel %vm524_vm1, %v646_v6, %v640_v53  ;;  %v672_v15 = vrot.slane %v671_v8, 4  ;;  %v675_v16 = vsel %vm524_vm1, %v671_v8, %v674_v5  ;;  %v602_v6 = vrot.slane %v601_v59, 4 }
 0x193   : > { %v653_v17 = vperm.slane %v647_v14, %v1935_v31  ;;  %v660_v18 = vrot.slane %v657_v12, 4  ;;  %v683_v20 = vperm.slane %v675_v16, %v1935_v31  ;;  %v583_v14 = vrot.slane %v582_v61, 4 }
 0x194   : > { %v673_v22 = vsel %vm524_vm1, %v672_v15, %v666_v57 }
 0x195   : > { %v658_v24 = vrot.slane %v653_v17, 4  ;;  %v661_v25 = vsel %vm524_vm1, 0, %v660_v18  ;;  %v679_v26 = vperm.slane %v673_v22, %v1935_v31  ;;  %v686_v27 = vrot.slane %v683_v20, 4 }
 0x196   : > { %v693_v28 = vrot.slane %v661_v25, 4  ;;  %v688_v35 = vsel %vm524_vm1, %v660_v18, %v653_v17  ;;  %v608_v17 = vshrl.u32 %v601_v59, 16  ;;  %v603_v18 = vsel %vm524_vm1, 0, %v602_v6 }
 0x197   : > { %v659_v30 = vsel %vm524_vm1, 0, %v658_v24  ;;  %v684_v32 = vrot.slane %v679_v26, 4  ;;  %v687_v33 = vsel %vm524_vm1, 0, %v686_v27  ;;  %v707_v42 = vsel %vm524_vm1, %v686_v27, %v679_v26 }
 0x198   : > { %v712_v34 = vrot.slane %v687_v33, 4  ;;  %v694_v36 = vsel %vm524_vm1, %v693_v28, %v659_v30  ;;  %v692_v49 = vperm.slane %v688_v35, %v1926_v19  ;;  %v711_v53 = vperm.slane %v707_v42, %v1926_v19 }
 0x199   : > { %v685_v38 = vsel %vm524_vm1, 0, %v684_v32  ;;  %v698_v39 = vperm.slane %v694_v36, %v1926_v19  ;;  %v607_v22 = vshrl.u32 %v582_v61, 16  ;;  %v584_v23 = vsel %vm524_vm1, 0, %v583_v14 }
 0x19a   : > { %v713_v43 = vsel %vm524_vm1, %v712_v34, %v685_v38  ;;  %v614_v24 = vshrl.u32 %v603_v18, 16  ;;  %v612_v26 = vpack.i.b16 %v603_v18, %v584_v23  ;;  %v613_v27 = vshrl.u32 %v584_v23, 16 }
 0x19b   : > { %v699_v50 = vrot.slane %v698_v39, 4  ;;  %v717_v51 = vperm.slane %v713_v43, %v1926_v19  ;;  %v609_v25 = vpack.i.b16 %v608_v17, %v607_v22 }
 0x19c   : > { %v615_v28 = vpack.i.b16 %v614_v24, %v613_v27 }
 0x19d   : > { %v700_v45 = vsel %vm524_vm1, %v699_v50, %v692_v49  ;;  %v718_v47 = vrot.slane %v717_v51, 4  ;;  %v739_v51 = vpop.permute.xlu1 %738 }
 0x19e   : > { %v704_v54 = vperm.slane %v700_v45, %v1935_v31 }
 0x19f   : > { %v719_v56 = vsel %vm524_vm1, %v718_v47, %v711_v53 }
 0x1a0   : > { %v723_v57 = vperm.slane %v719_v56, %v1935_v31  ;;  %v705_v58 = vrot.slane %v704_v54, 4  ;;  %v729_v60 = vshrl.u32 %v704_v54, 16 }
 0x1a2   : > { %v728_v62 = vpack.i.b16 %v723_v57, %v704_v54  ;;  %v730_v63 = vshrl.u32 %v723_v57, 16  ;;  %v706_v0 = vsel %vm524_vm1, 0, %v705_v58  ;;  %v724_v1 = vrot.slane %v723_v57, 4 }
 0x1a3   : > { %v735_v8 = vshrl.u32 %v706_v0, 16 }
 0x1a4   : > { %v865_v3 = vsel %vm860_vm2, %v728_v62, 0  ;;  %v731_v4 = vpack.i.b16 %v730_v63, %v729_v60  ;;  %v725_v5 = vsel %vm524_vm1, 0, %v724_v1  ;;  %v749_v1 = vshrl.u32 %v739_v51, 16 }
 0x1a5   : > { %874 = vmatpush.bf16.xpose.msra.mxu1 %v865_v3  ;;  %v734_v7 = vpack.i.b16 %v725_v5, %v706_v0  ;;  %v736_v12 = vshrl.u32 %v725_v5, 16 }
 0x1a6   : > { %v884_v13 = vsel %vm860_vm2, %v731_v4, 0 }
 0x1a7   : > { %893 = vmatpush.bf16.xpose.msra.mxu2 %v884_v13  ;;  %v903_v15 = vsel %vm860_vm2, %v734_v7, 0  ;;  %v737_v16 = vpack.i.b16 %v736_v12, %v735_v8 }
 0x1a8   : > { %912 = vmatpush.bf16.xpose.msra.mxu3 %v903_v15 }
 0x1a9   : > { %v922_v20 = vsel %vm860_vm2, %v737_v16, 0 }
 0x1aa   : > { %931 = vmatpush.bf16.xpose.msrb.mxu0 %v922_v20 }
 0x1ac   : > { %1504 = vmatmul.msk.bf16.vlgmr.msra.gmra.mxu1 %vm860_vm2, %v606_v21 }
 0x1ae   : > { %1505 = vmatmul.msk.bf16.vlgmr.msra.gmra.mxu2 %vm860_vm2, %v609_v25 }
 0x1af   : > { %1506 = vmatmul.msk.bf16.vlgmr.msra.gmra.mxu3 %vm860_vm2, %v612_v26 }
 0x1b1   : > { %1507 = vmatmul.msk.bf16.vlgmr.msrb.gmra.mxu0 %vm860_vm2, %v615_v28 }
 0x229   : > { %v876_v29 = vpop.f32.mrf.mxu1 }
 0x22a   : > { %v937_v30 = vmul.f32 0.35355338, %v876_v29 }
 0x22c   : > { %v941_v32 = vsel %vm860_vm2, %v937_v30, -inf }
 0x22d   : > { %942 = vmax.xlane.f32.xlu0 %v941_v32 }
 0x22e   : > { %v933_v33 = vpop.f32.mrf.mxu0 }
 0x22f   : > { %v940_v34 = vmul.f32 0.35355338, %v933_v33 }
 0x231   : > { %v878_v35 = vpop.f32.mrf.mxu1  ;;  %v895_v36 = vpop.f32.mrf.mxu2  ;;  %v950_v37 = vsel %vm860_vm2, %v940_v34, -inf }
 0x232   : > { %951 = vmax.xlane.f32.xlu2 %v950_v37  ;;  %v914_v38 = vpop.f32.mrf.mxu3  ;;  %v938_v40 = vmul.f32 0.35355338, %v895_v36 }
 0x233   : > { %v939_v39 = vmul.f32 0.35355338, %v914_v38 }
 0x234   : > { %v944_v46 = vsel %vm860_vm2, %v938_v40, -inf }
 0x235   : > { %v947_v41 = vsel %vm860_vm2, %v939_v39, -inf }
 0x236   : > { %v935_v42 = vpop.f32.mrf.mxu0  ;;  %948 = vmax.xlane.f32.xlu1 %v947_v41 }
 0x239   : > { %v897_v43 = vpop.f32.mrf.mxu2 }
 0x23a   : > { %945 = vmax.xlane.f32.xlu2 %v944_v46  ;;  %v916_v49 = vpop.f32.mrf.mxu3 }
 0x241   : > { %742 = vrot.lane.b32.xlu0 %v1920_v11, %s1759_s20 }
 0x24f   : > { %744 = vrot.lane.b32.xlu1 %v1914_v9, %s1759_s20 }
 0x252   : > { %740 = vrot.lane.b32.xlu2 %v1916_v10, %s1759_s20  ;;  %s1411_s20 = scalar_lea.hbm %s2202_s13, %s1548_s15 }
 0x253   : > { %s1415_s0 = sshll.u32 %s1411_s20, 4  ;;  %s1416_s0 = int_to_ptr.hbm [resolvable:$true] %s1415_s0 }
 0x254   : > { %s1698_s17 = sshra.s32 %s1416_s0, 4  ;;  %s1699_s17 = int_to_ptr.hbm [resolvable:$true] %s1698_s17 }
 0x255   : > { %s1700_s15 = scalar_lea.hbm %s1699_s17, 8  ;;  %p1705_p3 = scmp.lt.s32.totalorder %s1699_s17, %s2202_s13 }
 0x256   : > { %p1701_p0 = scmp.ne.s32.totalorder %s1699_s17, %s1700_s15 }
 0x258   : > { %p1702_p1 = pnand %p1701_p0, %p1874_p5 }
 0x25a   : > { %p1703_p2 = pneg %p1702_p1 }
 0x2a0   : > { %v943_v50 = vpop.xlane.xlu0 %942 }
 0x2a1   : > { %v953_v52 = vsub.f32 %v937_v30, %v943_v50 }
 0x2a3   : > { %v957_v44 = vmul.f32 1.442695, %v953_v52 }
 0x2a5   : > { %1632 = vpow2.f32 %v957_v44  ;;  %v952_v45 = vpop.xlane.xlu2 %951 }
 0x2a6   : > { %v956_v54 = vsub.f32 %v940_v34, %v952_v45 }
 0x2a8   : > { %v963_v10 = vmul.f32 1.442695, %v956_v54 }
 0x2a9   : > { %v949_v53 = vpop.xlane.xlu1 %948 }
 0x2aa   : > { %v955_v47 = vsub.f32 %v939_v39, %v949_v53 }
 0x2ab   : > { %v2011_v48 = vpop.eup %1632 }
 0x2ac   : > { %v961_v55 = vmul.f32 1.442695, %v955_v47  ;;  %v965_v11 = vsel %vm860_vm2, %v2011_v48, 0.0 }
 0x2ad   : > { %v946_v56 = vpop.xlane.xlu2 %945  ;;  %966 = vadd.xlane.f32.xlu1 %v965_v11 }
 0x2ae   : > { %1634 = vpow2.f32 %v961_v55  ;;  %v954_v9 = vsub.f32 %v938_v40, %v946_v56 }
 0x2b0   : > { %v959_v57 = vmul.f32 1.442695, %v954_v9 }
 0x2b2   : > { %1636 = vpow2.f32 %v959_v57 }
 0x2b3   : > { %1638 = vpow2.f32 %v963_v10  ;;  %v743_v6 = vpop.permute.xlu0 %742 }
 0x2b4   : > { %v2015_v58 = vpop.eup %1634  ;;  %v755_v12 = vshrl.u32 %v743_v6, 16 }
 0x2b5   : > { %v971_v59 = vsel %vm860_vm2, %v2015_v58, 0.0  ;;  %v741_v60 = vpop.permute.xlu2 %740 }
 0x2b6   : > { %972 = vadd.xlane.f32.xlu0 %v971_v59  ;;  %v750_v0 = vshrl.u32 %v741_v60, 16  ;;  %v748_v3 = vpack.i.b16 %v741_v60, %v739_v51 }
 0x2b8   : > { %v2019_v61 = vpop.eup %1636  ;;  %v751_v5 = vpack.i.b16 %v750_v0, %v749_v1  ;;  %v762_v7 = vperm.slane %v748_v3, %v1926_v19 }
 0x2b9   : > { %v968_v62 = vsel %vm860_vm2, %v2019_v61, 0.0  ;;  %v2023_v63 = vpop.eup %1638 }
 0x2ba   : > { %969 = vadd.xlane.f32.xlu2 %v968_v62  ;;  %v974_v4 = vsel %vm860_vm2, %v2023_v63, 0.0  ;;  %v788_v13 = vperm.slane %v751_v5, %v1926_v19  ;;  %v770_v16 = vrot.slane %v762_v7, 4 }
 0x2bc   : > { %v796_v20 = vrot.slane %v788_v13, 4 }
 0x2be   : > { %975 = vadd.xlane.f32.xlu0 %v974_v4 }
 0x2c1   : > { %v745_v8 = vpop.permute.xlu1 %744 }
 0x2c2   : > { %v754_v14 = vpack.i.b16 %v745_v8, %v743_v6  ;;  %v756_v15 = vshrl.u32 %v745_v8, 16 }
 0x2c4   : > { %v757_v17 = vpack.i.b16 %v756_v15, %v755_v12  ;;  %v767_v18 = vperm.slane %v754_v14, %v1926_v19 }
 0x2c6   : > { %v768_v21 = vrot.slane %v767_v18, 4  ;;  %v771_v22 = vsel %vm524_vm1, %v767_v18, %v770_v16  ;;  %v793_v23 = vperm.slane %v757_v17, %v1926_v19 }
 0x2c7   : > { %v779_v24 = vperm.slane %v771_v22, %v1935_v31 }
 0x2c8   : > { %v769_v25 = vsel %vm524_vm1, %v768_v21, %v762_v7  ;;  %v794_v26 = vrot.slane %v793_v23, 4  ;;  %v797_v27 = vsel %vm524_vm1, %v793_v23, %v796_v20 }
 0x2c9   : > { %v775_v28 = vperm.slane %v769_v25, %v1935_v31  ;;  %v782_v29 = vrot.slane %v779_v24, 4  ;;  %v805_v30 = vperm.slane %v797_v27, %v1935_v31 }
 0x2ca   : > { %v795_v32 = vsel %vm524_vm1, %v794_v26, %v788_v13 }
 0x2cb   : > { %v780_v33 = vrot.slane %v775_v28, 4  ;;  %v783_v34 = vsel %vm524_vm1, 0, %v782_v29  ;;  %v801_v35 = vperm.slane %v795_v32, %v1935_v31  ;;  %v808_v36 = vrot.slane %v805_v30, 4 }
 0x2cc   : > { %v815_v37 = vrot.slane %v783_v34, 4  ;;  %v810_v42 = vsel %vm524_vm1, %v782_v29, %v775_v28 }
 0x2cd   : > { %v781_v38 = vsel %vm524_vm1, 0, %v780_v33  ;;  %v806_v39 = vrot.slane %v801_v35, 4  ;;  %v809_v40 = vsel %vm524_vm1, 0, %v808_v36  ;;  %v829_v50 = vsel %vm524_vm1, %v808_v36, %v801_v35 }
 0x2ce   : > { %v834_v41 = vrot.slane %v809_v40, 4  ;;  %v816_v43 = vsel %vm524_vm1, %v815_v37, %v781_v38  ;;  %v814_v52 = vperm.slane %v810_v42, %v1926_v19  ;;  %v833_v47 = vperm.slane %v829_v50, %v1926_v19 }
 0x2cf   : > { %v807_v46 = vsel %vm524_vm1, 0, %v806_v39  ;;  %v820_v49 = vperm.slane %v816_v43, %v1926_v19 }
 0x2d0   : > { %v835_v51 = vsel %vm524_vm1, %v834_v41, %v807_v46 }
 0x2d1   : > { %v821_v44 = vrot.slane %v820_v49, 4  ;;  %v839_v45 = vperm.slane %v835_v51, %v1926_v19 }
 0x2d3   : > { %v822_v53 = vsel %vm524_vm1, %v821_v44, %v814_v52  ;;  %v840_v54 = vrot.slane %v839_v45, 4 }
 0x2d4   : > { %v826_v55 = vperm.slane %v822_v53, %v1935_v31 }
 0x2d5   : > { %v841_v11 = vsel %vm524_vm1, %v840_v54, %v833_v47 }
 0x2d6   : > { %v845_v56 = vperm.slane %v841_v11, %v1935_v31  ;;  %v827_v9 = vrot.slane %v826_v55, 4  ;;  %v851_v10 = vshrl.u32 %v826_v55, 16 }
 0x2d8   : > { %v850_v57 = vpack.i.b16 %v845_v56, %v826_v55  ;;  %v852_v59 = vshrl.u32 %v845_v56, 16  ;;  %v828_v60 = vsel %vm524_vm1, 0, %v827_v9  ;;  %v846_v62 = vrot.slane %v845_v56, 4 }
 0x2d9   : > { %v857_v5 = vshrl.u32 %v828_v60, 16 }
 0x2da   : > { %v994_v0 = vsel %vm992_vm3, %v850_v57, 0  ;;  %v853_v1 = vpack.i.b16 %v852_v59, %v851_v10  ;;  %v847_v3 = vsel %vm524_vm1, 0, %v846_v62 }
 0x2db   : > { %1003 = vmatpush.bf16.msrb.mxu1 %v994_v0  ;;  %v856_v4 = vpack.i.b16 %v847_v3, %v828_v60  ;;  %v858_v6 = vshrl.u32 %v847_v3, 16 }
 0x2dc   : > { %v1013_v7 = vsel %vm992_vm3, %v853_v1, 0 }
 0x2dd   : > { %1022 = vmatpush.bf16.msrb.mxu2 %v1013_v7  ;;  %v1032_v8 = vsel %vm992_vm3, %v856_v4, 0  ;;  %v859_v12 = vpack.i.b16 %v858_v6, %v857_v5 }
 0x2de   : > { %1041 = vmatpush.bf16.msrb.mxu3 %v1032_v8 }
 0x2df   : > { %v1051_v13 = vsel %vm992_vm3, %v859_v12, 0 }
 0x2e0   : > { %1060 = vmatpush.bf16.msra.mxu0 %v1051_v13 }
 0x320   : > { %v967_v14 = vpop.xlane.xlu1 %966 }
 0x321   : > { %1640 = vrcp.f32 %v967_v14 }
 0x327   : > { %v1641_v15 = vpop.eup %1640 }
 0x328   : > { %v981_v16 = vmul.f32 %v1641_v15, %v2011_v48 }
 0x329   : > { %v973_v17 = vpop.xlane.xlu0 %972 }
 0x32a   : > { %1642 = vrcp.f32 %v973_v17  ;;  %v985_v18 = vpack.c.bf16 %v981_v16, %v981_v16 }
 0x32c   : > { %1508 = vmatmul.msk.bf16.vlgmr.msrb.gmra.mxu1 %vm860_vm2, %v985_v18 }
 0x32d   : > { %v970_v20 = vpop.xlane.xlu2 %969 }
 0x32e   : > { %1644 = vrcp.f32 %v970_v20 }
 0x330   : > { %v1643_v21 = vpop.eup %1642 }
 0x331   : > { %v983_v22 = vmul.f32 %v1643_v21, %v2015_v58  ;;  %v976_v23 = vpop.xlane.xlu0 %975 }
 0x332   : > { %1646 = vrcp.f32 %v976_v23 }
 0x333   : > { %v987_v24 = vpack.c.bf16 %v983_v22, %v983_v22 }
 0x334   : > { %v1645_v25 = vpop.eup %1644 }
 0x335   : > { %v982_v26 = vmul.f32 %v1645_v25, %v2019_v61  ;;  %1510 = vmatmul.msk.bf16.vlgmr.msrb.gmra.mxu3 %vm860_vm2, %v987_v24 }
 0x337   : > { %v986_v27 = vpack.c.bf16 %v982_v26, %v982_v26 }
 0x338   : > { %v1647_v48 = vpop.eup %1646 }
 0x339   : > { %v984_v28 = vmul.f32 %v1647_v48, %v2023_v63  ;;  %1509 = vmatmul.msk.bf16.vlgmr.msrb.gmra.mxu2 %vm860_vm2, %v986_v27 }
 0x33b   : > { %v988_v29 = vpack.c.bf16 %v984_v28, %v984_v28 }
 0x33d   : > { %1511 = vmatmul.msk.bf16.vlgmr.msra.gmra.mxu0 %vm860_vm2, %v988_v29 }
 0x3a9   : > { %v1005_v30 = vpop.f32.mrf.mxu1 }
 0x3aa   : > { %v1069_v58 = vrot.slane %v1005_v30, 4 }
 0x3b1   : > { %v1007_v32 = vpop.f32.mrf.mxu1 }
 0x3b8   : > { %v1043_v33 = vpop.f32.mrf.mxu3 }
 0x3b9   : > { %v1066_v34 = vrot.slane %v1043_v33, 4  ;;  %v1070_v35 = vsel %vm524_vm1, %v1043_v33, %v1069_v58 }
 0x3ba   : > { %v1062_v36 = vpop.f32.mrf.mxu0  ;;  %v1078_v63 = vperm.slane %v1070_v35, %v1926_v19 }
 0x3bb   : > { %v1068_v61 = vsel %vm524_vm1, %v1066_v34, %v1005_v30  ;;  %v1079_v37 = vrot.slane %v1062_v36, 4 }
 0x3bc   : > { %v1074_v38 = vperm.slane %v1068_v61, %v1926_v19  ;;  %v1024_v39 = vpop.f32.mrf.mxu2  ;;  %v1105_v49 = vrot.slane %v1078_v63, 4 }
 0x3bd   : > { %v1080_v40 = vsel %vm524_vm1, %v1079_v37, %v1024_v39  ;;  %v1081_v41 = vrot.slane %v1024_v39, 4  ;;  %v1554_v37 = vld [vmem:[%s2192_s3 + $0x8] sm:$0xff] }
 0x3be   : > { %v1093_v42 = vrot.slane %v1074_v38, 4  ;;  %v1086_v43 = vperm.slane %v1080_v40, %v1926_v19  ;;  %1227 = vmatpush.bf16.msra.mxu1 %v1554_v37 }
 0x3bf   : > { %v1082_v46 = vsel %vm524_vm1, %v1062_v36, %v1081_v41 }
 0x3c0   : > { %v1090_v50 = vperm.slane %v1082_v46, %v1926_v19  ;;  %v1091_v51 = vrot.slane %v1086_v43, 4  ;;  %v1094_v52 = vsel %vm524_vm1, %v1086_v43, %v1093_v42  ;;  %v1045_v44 = vpop.f32.mrf.mxu3 }
 0x3c1   : > { %v1102_v45 = vperm.slane %v1094_v52, %v1935_v31 }
 0x3c2   : > { %v1092_v53 = vsel %vm524_vm1, %v1091_v51, %v1074_v38  ;;  %v1103_v47 = vrot.slane %v1090_v50, 4  ;;  %v1106_v54 = vsel %vm524_vm1, %v1090_v50, %v1105_v49  ;;  %v1064_v55 = vpop.f32.mrf.mxu0  ;;  %v1625_v49 = vld [vmem:[%s2193_s4] ss:$0 sm:$0xff] }
 0x3c3   : > { %v1098_v11 = vperm.slane %v1092_v53, %v1935_v31  ;;  %v1114_v56 = vperm.slane %v1106_v54, %v1935_v31  ;;  %v1117_v9 = vrot.slane %v1102_v45, 4  ;;  %v1765_v53 = vmov 32.0  }
 0x3c4   : > { %v1104_v10 = vsel %vm524_vm1, %v1103_v47, %v1078_v63  ;;  %v1026_v57 = vpop.f32.mrf.mxu2  ;;  %1648 = vrcp.f32 %v1765_v53 }
 0x3c5   : > { %v1110_v59 = vperm.slane %v1104_v10, %v1935_v31  ;;  %v1115_v60 = vrot.slane %v1098_v11, 4  ;;  %v1118_v62 = vsel %vm524_vm1, 0.0, %v1117_v9  ;;  %v1121_v0 = vrot.slane %v1114_v56, 4 }
 0x3c6   : > { %v1123_v1 = vsel %vm524_vm1, %v1117_v9, %v1098_v11  ;;  %v1128_v3 = vrot.slane %v1118_v62, 4 }
 0x3c7   : > { %v1116_v4 = vsel %vm524_vm1, 0.0, %v1115_v60  ;;  %v1119_v5 = vrot.slane %v1110_v59, 4  ;;  %v1122_v6 = vsel %vm524_vm1, 0.0, %v1121_v0  ;;  %v1127_v7 = vperm.slane %v1123_v1, %v1926_v19  ;;  %v1560_v1 = vld [vmem:[%s2196_s7 + $0x18] sm:$0xff] }
 0x3c8   : > { %v1139_v8 = vrot.slane %v1122_v6, 4  ;;  %v1129_v12 = vsel %vm524_vm1, %v1128_v3, %v1116_v4  ;;  %v1134_v13 = vsel %vm524_vm1, %v1121_v0, %v1110_v59  ;;  %v1555_v0 = vld [vmem:[#allocation3] sm:$0xff]  ;;  %1357 = vmatpush.bf16.msra.mxu3 %v1560_v1 }
 0x3c9   : > { %v1120_v14 = vsel %vm524_vm1, 0.0, %v1119_v5  ;;  %v1133_v15 = vperm.slane %v1129_v12, %v1926_v19  ;;  %v1138_v16 = vperm.slane %v1134_v13, %v1926_v19  ;;  %v1147_v17 = vrot.slane %v1127_v7, 4  ;;  %v1559_v5 = vld [vmem:[%s2196_s7 + $0x10] sm:$0xff] }
 0x3ca   : > { %v1140_v18 = vsel %vm524_vm1, %v1139_v8, %v1120_v14  ;;  %v1649_v47 = vpop.eup %1648 }
 0x3cb   : > { %v1144_v20 = vperm.slane %v1140_v18, %v1926_v19  ;;  %v1148_v21 = vsel %vm524_vm1, %v1133_v15, %v1147_v17  ;;  %v1159_v22 = vrot.slane %v1138_v16, 4  ;;  %v1145_v23 = vrot.slane %v1133_v15, 4  ;;  %v1627_v18 = vld [vmem:[%s2199_s10] ss:$0 sm:$0xff] }
 0x3cc   : > { %v1156_v24 = vperm.slane %v1148_v21, %v1935_v31  ;;  %v1241_v54 = vmul.f32 32.0, %v1649_v47  ;;  %vm1245_vm7 = vweird.f32 %v1649_v47  ;;  %1358 = vmatpush.bf16.msra.mxu3 %v1559_v5 }
 0x3cd   : > { %v1160_v25 = vsel %vm524_vm1, %v1144_v20, %v1159_v22  ;;  %v1146_v26 = vsel %vm524_vm1, %v1145_v23, %v1127_v7  ;;  %v1157_v27 = vrot.slane %v1144_v20, 4 }
 0x3ce   : > { %v1168_v48 = vperm.slane %v1160_v25, %v1935_v31  ;;  %v1175_v28 = vrot.slane %v1156_v24, 4  ;;  %v1152_v29 = vperm.slane %v1146_v26, %v1935_v31  ;;  %v1242_v55 = vsub.f32 1.0, %v1241_v54  ;;  %v1557_v25 = vld [vmem:[%s2196_s7] sm:$0xff] }
 0x3cf   : > { %v1158_v30 = vsel %vm524_vm1, %v1157_v27, %v1138_v16  ;;  %v1626_v16 = vld [vmem:[%s2198_s9] ss:$0 sm:$0xff] }
 0x3d0   : > { %v1176_v19 = vsel %vm524_vm1, %v1168_v48, %v1175_v28  ;;  %v1173_v32 = vrot.slane %v1168_v48, 4  ;;  %v1164_v58 = vperm.slane %v1158_v30, %v1935_v31  ;;  %v1171_v33 = vrot.slane %v1152_v29, 4  ;;  %v1553_v31 = vld [vmem:[%s2192_s3] sm:$0xff] }
 0x3d1   : > { %1186 = vrot.lane.b32.xlu0 %v1176_v19, %s1762_s21  ;;  %1228 = vmatpush.bf16.msra.mxu1 %v1553_v31  ;;  %v1243_v11 = vmul.f32 %v1649_v47, %v1242_v55  ;;  %v1628_v26 = vld [vmem:[%s2195_s6] ss:$0 sm:$0xff] }
 0x3d2   : > { %v1174_v34 = vsel %vm524_vm1, %v1173_v32, %v1156_v24  ;;  %v1169_v35 = vrot.slane %v1164_v58, 4  ;;  %v1172_v36 = vsel %vm524_vm1, %v1164_v58, %v1171_v33  ;;  %v1558_v24 = vld [vmem:[%s2196_s7 + $0x8] sm:$0xff]  ;;  %v1629_v19 = vld [vmem:[%s2197_s8] ss:$0 sm:$0xff] }
 0x3d3   : > { %1182 = vrot.lane.b32.xlu1 %v1174_v34, %s1763_s23  ;;  %1178 = vrot.lane.b32.xlu2 %v1172_v36, %s1764_s22  ;;  %v1244_v56 = vadd.f32 %v1649_v47, %v1243_v11  ;;  %s448_s22 = scalar_lea.vmem [#allocation6], %s1493_s30  ;;  %s1704_s30 = scalar_lea.hbm %s2202_s13, 16 }
 0x3d4   : > { %v1170_v61 = vsel %vm524_vm1, %v1169_v35, %v1152_v29  ;;  %1359 = vmatpush.bf16.msra.mxu3 %v1558_v24  ;;  %s1413_s29 = sshll.u32 %s448_s22, 4  ;;  %p1706_p4 = scmp.lt.s32.totalorder %s1704_s30, %s1700_s15  ;;  %s1414_s29 = int_to_ptr.vmem [resolvable:$true] %s1413_s29 }
 0x3d5   : > { %v1246_v9 = vsel %vm1245_vm7, %v1649_v47, %v1244_v56 }
 0x3d6   : > { %p1707_p7 = por %p1706_p4, %p1705_p3 }
 0x3d8   : > { %1360 = vmatpush.bf16.msra.mxu3 %v1557_v25  ;;  %p1708_p8 = pnand %p1707_p7, %p1703_p2 }
 0x42d   : > { %v1179_v38 = vpop.permute.xlu2 %1178 }
 0x42e   : > { %v1189_v63 = vsel %vm860_vm2, %v1170_v61, %v1179_v38 }
 0x443   : > { %v1187_v40 = vpop.permute.xlu0 %1186 }
 0x445   : > { %v1183_v39 = vpop.permute.xlu1 %1182 }
 0x446   : > { %v1191_v41 = vsel %vm1190_vm4, %v1189_v63, %v1183_v39 }
 0x447   : > { %v1193_v42 = vsel %vm1192_vm5, %v1191_v41, %v1187_v40 }
 0x448   : > { %v1194_v43 = vpack.c.bf16 %v1193_v42, %v1193_v42 }
 0x44a   : > { %1196 = vst.msk [vmem:[#allocation2] sm:$0xf] %vm1195_vm6, %v1194_v43 }
 0x451   : > { %v1197_v46 = vld [vmem:[#allocation2] sm:$0xf] }
 0x452   : > { %1520 = vmatmul.msk.bf16.vlgmr.msra.gmra.mxu1 %vm476_vm0, %v1197_v46 }
 0x4cf   : > { %v1230_v50 = vpop.f32.mrf.mxu1 }
 0x4d0   : > { %v1231_v51 = vadd.f32 %v1625_v49, %v1230_v50 }
 0x4d2   : > { %v1234_v52 = vadd.f32 %v1231_v51, %v1905_v2  ;;  %v1556_v2 = vld [vmem:[#allocation3 + $0x8] sm:$0xff]  ;;  %v1630_v51 = vld [vmem:[%s2200_s11] ss:$0 sm:$0xff] }
 0x4d3   : > { %1304 = vmatpush.bf16.msra.mxu2 %v1556_v2 }
 0x4d4   : > { %v1237_v44 = vsel %vm476_vm0, %v1234_v52, 0.0 }
 0x4d5   : > { %1238 = vadd.xlane.f32.xlu2 %v1237_v44 }
 0x4d7   : > { %v1232_v45 = vpop.f32.mrf.mxu1  ;;  %1305 = vmatpush.bf16.msra.mxu2 %v1555_v0 }
 0x4d8   : > { %v1631_v45 = vld [vmem:[%s2201_s12] ss:$0 sm:$0xff] }
 0x548   : > { %v1239_v10 = vpop.xlane.xlu2 %1238 }
 0x549   : > { %v1247_v57 = vmul.f32 %v1246_v9, %v1239_v10 }
 0x54b   : > { %v1248_v59 = vsub.f32 %v1234_v52, %v1247_v57 }
 0x54d   : > { %v1249_v60 = vmul.f32 %v1248_v59, %v1248_v59 }
 0x54f   : > { %v1250_v62 = vsel %vm476_vm0, %v1249_v60, 0.0 }
 0x550   : > { %1251 = vadd.xlane.f32.xlu0 %v1250_v62 }
 0x5c3   : > { %v1252_v3 = vpop.xlane.xlu0 %1251 }
 0x5c4   : > { %v1253_v4 = vmul.f32 %v1252_v3, %v1246_v9 }
 0x5c6   : > { %v1254_v6 = vadd.f32 1e-05, %v1253_v4 }
 0x5c8   : > { %1650 = vrsqrt.f32 %v1254_v6  ;;  %vm1261_vm9 = vweird.f32 %v1254_v6 }
 0x5ce   : > { %v1651_v7 = vpop.eup %1650 }
 0x5cf   : > { %v1256_v8 = vmul.f32 %v1651_v7, %v1254_v6  ;;  %vm1262_vm8 = vweird.f32 %v1651_v7 }
 0x5d0   : > { %vm1263_vm10 = vmor %vm1261_vm9, %vm1262_vm8 }
 0x5d1   : > { %v1257_v12 = vmul.f32 %v1651_v7, %v1256_v8 }
 0x5d3   : > { %v1258_v13 = vmul.f32 0.5, %v1257_v12 }
 0x5d5   : > { %v1259_v14 = vsub.f32 1.5, %v1258_v13 }
 0x5d7   : > { %v1260_v15 = vmul.f32 %v1651_v7, %v1259_v14 }
 0x5d9   : > { %v1264_v17 = vsel %vm1263_vm10, %v1651_v7, %v1260_v15 }
 0x5da   : > { %v1265_v20 = vmul.f32 %v1264_v17, %v1248_v59 }
 0x5dc   : > { %v1269_v21 = vmul.f32 %v1626_v16, %v1265_v20 }
 0x5de   : > { %v1273_v22 = vadd.f32 %v1627_v18, %v1269_v21 }
 0x5e0   : > { %v1274_v23 = vpack.c.bf16 %v1273_v22, %v1273_v22 }
 0x5e2   : > { %1529 = vmatmul.msk.bf16.vlgmr.msra.gmra.mxu2 %vm476_vm0, %v1274_v23 }
 0x665   : > { %v1307_v27 = vpop.f32.mrf.mxu2 }
 0x666   : > { %v1308_v48 = vadd.f32 %v1628_v26, %v1307_v27 }
 0x668   : > { %v1311_v28 = vmax.f32 %v1308_v48, 0.0 }
 0x66a   : > { %v1312_v29 = vpack.c.bf16 %v1311_v28, %v1311_v28 }
 0x66c   : > { %1546 = vmatmul.msk.bf16.vlgmr.msra.gmra.mxu3 %vm1349_vm11, %v1312_v29 }
 0x66d   : > { %v1309_v30 = vpop.f32.mrf.mxu2 }
 0x6ef   : > { %v1362_v32 = vpop.f32.mrf.mxu3 }
 0x6f0   : > { %v1363_v58 = vadd.f32 %v1629_v19, %v1362_v32 }
 0x6f2   : > { %v1366_v33 = vadd.f32 %v1363_v58, %v1273_v22 }
 0x6f4   : > { %v1369_v34 = vsel %vm476_vm0, %v1366_v33, 0.0 }
 0x6f5   : > { %1370 = vadd.xlane.f32.xlu1 %v1369_v34 }
 0x6f7   : > { %v1364_v35 = vpop.f32.mrf.mxu3 }
 0x768   : > { %v1371_v36 = vpop.xlane.xlu1 %1370 }
 0x769   : > { %v1372_v61 = vmul.f32 %v1371_v36, %v1246_v9 }
 0x76b   : > { %v1373_v37 = vsub.f32 %v1366_v33, %v1372_v61 }
 0x76d   : > { %v1374_v31 = vmul.f32 %v1373_v37, %v1373_v37 }
 0x76f   : > { %v1375_v38 = vsel %vm476_vm0, %v1374_v31, 0.0 }
 0x770   : > { %1376 = vadd.xlane.f32.xlu2 %v1375_v38 }
 0x7e3   : > { %v1377_v63 = vpop.xlane.xlu2 %1376 }
 0x7e4   : > { %v1378_v39 = vmul.f32 %v1377_v63, %v1246_v9 }
 0x7e6   : > { %v1379_v40 = vadd.f32 1e-05, %v1378_v39 }
 0x7e8   : > { %1652 = vrsqrt.f32 %v1379_v40  ;;  %vm1386_vm13 = vweird.f32 %v1379_v40 }
 0x7ee   : > { %v1653_v41 = vpop.eup %1652 }
 0x7ef   : > { %v1381_v42 = vmul.f32 %v1653_v41, %v1379_v40  ;;  %vm1387_vm12 = vweird.f32 %v1653_v41 }
 0x7f0   : > { %vm1388_vm14 = vmor %vm1386_vm13, %vm1387_vm12 }
 0x7f1   : > { %v1382_v43 = vmul.f32 %v1653_v41, %v1381_v42 }
 0x7f3   : > { %v1383_v46 = vmul.f32 0.5, %v1382_v43 }
 0x7f5   : > { %v1384_v49 = vsub.f32 1.5, %v1383_v46 }
 0x7f7   : > { %v1385_v50 = vmul.f32 %v1653_v41, %v1384_v49 }
 0x7f9   : > { %v1389_v52 = vsel %vm1388_vm14, %v1653_v41, %v1385_v50 }
 0x7fa   : > { %v1390_v44 = vmul.f32 %v1389_v52, %v1373_v37 }
 0x7fc   : > { %v1394_v53 = vmul.f32 %v1630_v51, %v1390_v44 }
 0x7fe   : > { %v1398_v47 = vadd.f32 %v1631_v45, %v1394_v53 }
 0x800   : > { %1399 = vst.msk [vmem:[%s448_s22] sm:$0xff] %vm476_vm0, %v1398_v47 }
 0x801   : > { %1711 = shalt.err (!%p1708_p8)
}
 0x802   : > { %1565 = dma.vmem_to_hbm [thread:$0]  (%p1874_p5), %s1414_s29, 128, %s1416_s0, %s1401_s27  }
 0x803 PF: > { %p1577_p9 = scmp.ge.s32.totalorder %s1750_s28, 2  ;;  %s1427_s24 = sand.u32 1, %s1738_s25  }
 0x804   : > { %s1428_s23 = scalar_lea.sflag [#allocation5], %s1427_s24 }
 0x805   : > { %p1572_p10 = pnand %p1577_p9, %p1878_p6 }
 0x807   : > { %p1573_p11 = pneg %p1572_p10 }
 0x809   : > { %1733 = dma.done.wait (%p1573_p11), %s1428_s23, 128  }
 0x80a   : > { %1735 = vsyncadd (%p1573_p11), %s1428_s23, 4294967168  ;;  %s2212_s22 = sld [smem:[#allocation9_spill]]  ;;  %p24_p12 = scmp.ge.s32.totalorder %s1861_s14, 4  }
 0x80b   : > { %s2213_s27 = sld [smem:[#allocation10_spill]]  ;;  %s2214_s25 = smov %s1742_s26 }
 0x80c   : > { %s2216_s28 = smov %s1861_s14  ;;  %26 = sbr.rel (!%p24_p12) target bundleno = 7 (0x7), region = 112 }
 0x810   : > { %s2215_s26 = smov %s2212_s22 }
 0x811   :  { %1434 = vsyncpa [#allocation4], 1 }
 0x812   :  { %1436 = vsyncpa [#allocation4 + $0x1], 1 }
 0x813   :  { %1437 = vsyncpa [#allocation5], 1 }
 0x814   :  { %1439 = vsyncpa [#allocation5 + $0x1], 1 }

// kernel: tpu_custom_call.1
= control target key start
LH: loop header
LB: loop body
LE: loop exit
PB: predicated region body
PF: predicated region fallthrough
CT: control target
= control target key end

     0   :  { %s2189_s0 = inlined_call_operand.vmem [shape: f32[16,32], index: 0, kind: input, shape index: {}]   ;;  %s2190_s1 = inlined_call_operand.vmem [shape: bf16[32,96], index: 1, kind: input, shape index: {}]   ;;  %s2191_s2 = inlined_call_operand.vmem [shape: f32[1,96], index: 2, kind: input, shape index: {}]   ;;  %s2192_s3 = inlined_call_operand.vmem [shape: bf16[32,32], index: 3, kind: input, shape index: {}]   ;;  %s2193_s4 = inlined_call_operand.vmem [shape: f32[1,32], index: 4, kind: input, shape index: {}]   ;;  %s2194_s5 = inlined_call_operand.hbm [shape: bf16[32,64], index: 5, kind: input, shape index: {}]   ;;  %s2195_s6 = inlined_call_operand.vmem [shape: f32[1,64], index: 6, kind: input, shape index: {}]   ;;  %s2196_s7 = inlined_call_operand.vmem [shape: bf16[64,32], index: 7, kind: input, shape index: {}]   ;;  %s2197_s8 = inlined_call_operand.vmem [shape: f32[1,32], index: 8, kind: input, shape index: {}]   ;;  %s2198_s9 = inlined_call_operand.vmem [shape: f32[1,32], index: 9, kind: input, shape index: {}]   ;;  %s2199_s10 = inlined_call_operand.vmem [shape: f32[1,32], index: 10, kind: input, shape index: {}]   ;;  %s2200_s11 = inlined_call_operand.vmem [shape: f32[1,32], index: 11, kind: input, shape index: {}]   ;;  %s2201_s12 = inlined_call_operand.vmem [shape: f32[1,32], index: 12, kind: input, shape index: {}]   ;;  %s2202_s13 = inlined_call_operand.hbm [shape: f32[16,32], index: 13, kind: output, shape index: {}]  }
   0x1   :  { %2204 = sst [smem:[#allocation11_spill]] %s2189_s0 }
   0x2   :  { %2205 = sst [smem:[#allocation12_spill]] %s2194_s5 }
   0x3   :  { %18 = vsyncpa [#allocation4], 0 }
   0x4   :  { %19 = vsyncpa [#allocation5], 0 }
   0x5   :  { %21 = vsyncpa [#allocation5 + $0x1], 0  ;;  %s1836_s25 = smov 0   ;;  %s1838_s26 = smov 0  }
   0x6   :  { %s1840_s27 = smov 0   ;;  %s1842_s28 = smov 0  }
   0x7 LB: > { %2206 = sst [smem:[#allocation9_spill]] %s1746_s27  ;;  %s1857_s29 = sadd.s32 4294967295, %s1750_s28   ;;  %s1750_s28 = sphi %s1842_s28, %s2216_s28   ;;  %s1746_s27 = sphi %s1840_s27, %s2213_s27   ;;  %s1742_s26 = sphi %s1838_s26, %s2215_s26   ;;  %s1738_s25 = sphi %s1836_s25, %s2214_s25  }
   0x8   : > { %s1487_s30 = sadd.s32 4294967294, %s1750_s28   ;;  %s1861_s14 = sadd.s32 1, %s1750_s28  }
   0x9   : > { %s312_s15 = sadd.s32 1, %s1746_s27  ;;  %s309_s16 = ssub.s32 %s1750_s28, %s1861_s14 }
   0xa   : > { %p322_p0 = scmp.ne.s32.totalorder %s1746_s27, %s1742_s26  ;;  %p310_p1 = scmp.eq.s32.totalorder %s309_s16, 0 }
   0xb   : > { %p323_p2 = scmp.eq.s32.totalorder %s1857_s29, 1  ;;  %p328_p3 = scmp.ne.s32.totalorder %s1742_s26, %s1738_s25 }
   0xc   : > { %p329_p4 = scmp.eq.s32.totalorder %s1487_s30, 1  ;;  %p1488_p7 = scmp.ge.s32.totalorder %s1750_s28, 1 }
   0xd   : > { %s1872_s17 = scalar_select %p310_p1, %s1746_s27, %s312_s15  }
   0xe   : > { %p1874_p5 = por %p323_p2, %p322_p0  ;;  %p1878_p6 = por %p329_p4, %p328_p3 }
   0xf   : > { %2207 = sst [smem:[#allocation10_spill]] %s1872_s17  ;;  %p336_p8 = scmp.lt.s32.totalorder %s1750_s28, 3 }
  0x10   : > { %p1575_p9 = scmp.eq.s32.totalorder %s1857_s29, 0  ;;  %s2210_s5 = sld [smem:[#allocation12_spill]] }
  0x11   : > { %p337_p10 = pnand %p1488_p7, %p336_p8  ;;  %s1752_s23 = smov [#allocation3]  }
  0x12   : > { %s361_s24 = sshll.u32 %s1752_s23, 4  ;;  %s1753_s30 = smov 64   ;;  %s362_s24 = int_to_ptr.vmem [resolvable:$true] %s361_s24 }
  0x13   : > { %p1567_p11 = pneg %p337_p10  ;;  %s1754_s15 = smov 4  }
  0x14   : > { %405 = sbr.rel (%p337_p10) target bundleno = 2051 (0x803), region = 72 }
  0x15   : > { %p1568_p12 = pnand %p1575_p9, %p1567_p11 }
  0x16   : > { %s359_s22 = sshll.u32 %s2210_s5, 4  ;;  %s360_s22 = int_to_ptr.hbm [resolvable:$true] %s359_s22 }
  0x17   : > { %1570 = dma.hbm_to_vmem [thread:$0]  (!%p1568_p12), %s360_s22, 256, %s362_s24, [#allocation4], %s1753_s30, %s1753_s30, %s1754_s15  }
  0x19   : > { %1729 = dma.done.wait (%p1575_p9), [#allocation4], 256  }
  0x1a   : > { %1731 = vsyncadd (%p1575_p9), [#allocation4], 4294967040  ;;  %p449_p13 = scmp.lt.s32.totalorder %s1857_s29, 1  ;;  %s2211_s0 = sld [smem:[#allocation11_spill]]  ;;  %v1552_v0 = vld [vmem:[%s2190_s1 + $0x8] sm:$0xff]  ;;  %v1551_v1 = vld [vmem:[%s2190_s1] sm:$0xff] }
  0x1b   : > { %486 = vmatpush.bf16.msra.mxu0 %v1552_v0  ;;  %vm476_vm0 = vcmask 261120   ;;  %v1624_v4 = vld [vmem:[%s2191_s2] ss:$0 sm:$0xff]  ;;  %s1755_s27 = smov 104   ;;  %s1756_s17 = smov 120   ;;  %vm524_vm1 = vcmask 1047556  }
  0x1c   : > { %s450_s16 = scalar_select %p449_p13, %s1857_s29, 1  ;;  %v1760_v13 = vmov 1983009808   ;;  %v1761_v25 = vmov 1934713408   ;;  %vm860_vm2 = vcmask 64512  }
  0x1d   : > { %v515_v14 = vunpack.c.l.s4 %v1760_v13  ;;  %v529_v26 = vunpack.c.l.s4 %v1761_v25  ;;  %vm992_vm3 = vcmask 1043456   ;;  %s1762_s21 = smov 24   ;;  %s1763_s23 = smov 16   ;;  %vm1190_vm4 = vcmask 130048  }
  0x1e   : > { %s1494_s20 = sshll.u32 %s450_s16, 3  ;;  %s1758_s16 = smov 112   ;;  %vm1192_vm5 = vcmask 195584   ;;  %vm1195_vm6 = vcmask 257024   ;;  %vm1349_vm11 = vcmask 523264  }
  0x1f   : > { %487 = vmatpush.bf16.msra.mxu0 %v1551_v1  ;;  %v1926_v19 = vunpack.c.0.s8 %v515_v14  ;;  %v1935_v31 = vunpack.c.0.s8 %v529_v26  ;;  %s1764_s22 = smov 8   ;;  %s446_s24 = sand.u32 1, %s1742_s26  }
  0x20   : > { %s452_s5 = scalar_lea.vmem %s2211_s0, %s1494_s20  ;;  %s1759_s20 = smov 64  }
  0x21   : > { %v1905_v2 = vld [vmem:[%s452_s5] sm:$0xff]  ;;  %s1757_s5 = smov 96   ;;  %s1493_s30 = sshll.u32 %s446_s24, 3 }
  0x22   : > { %v455_v3 = vpack.c.bf16 %v1905_v2, %v1905_v2  ;;  %s1548_s15 = sshll.u32 %s1857_s29, 3 }
  0x24   : > { %1503 = vmatmul.msk.bf16.vlgmr.msra.gmra.mxu0 %vm476_vm0, %v455_v3 }
  0xa1   : > { %v489_v5 = vpop.f32.mrf.mxu0 }
  0xa2   : > { %v490_v6 = vadd.f32 %v1624_v4, %v489_v5 }
  0xa4   : > { %v493_v7 = vpack.c.bf16 %v490_v6, %v490_v6 }
  0xa6   : > { %499 = vrot.lane.b32.xlu1 %v493_v7, %s1755_s27  ;;  %495 = vrot.lane.b32.xlu0 %v493_v7, %s1756_s17  ;;  %v504_v15 = vshrl.u32 %v493_v7, 16  ;;  %s1401_s27 = scalar_lea.sflag [#allocation5], %s446_s24 }
  0xa9   : > { %v491_v8 = vpop.f32.mrf.mxu0 }
  0xae   : > { %616 = vrot.lane.b32.xlu1 %v493_v7, %s1757_s5  ;;  %497 = vrot.lane.b32.xlu0 %v493_v7, %s1758_s16 }
  0xb6   : > { %738 = vrot.lane.b32.xlu1 %v493_v7, %s1759_s20 }
 0x118   : > { %v1914_v9 = vpop.permute.xlu1 %499  ;;  %v1916_v10 = vpop.permute.xlu0 %495 }
 0x119   : > { %622 = vrot.lane.b32.xlu0 %v1914_v9, %s1757_s5  ;;  %618 = vrot.lane.b32.xlu2 %v1916_v10, %s1757_s5  ;;  %v505_v12 = vshrl.u32 %v1916_v10, 16  ;;  %v511_v17 = vshrl.u32 %v1914_v9, 16  ;;  %v503_v20 = vpack.i.b16 %v1916_v10, %v493_v7 }
 0x11b   : > { %v506_v18 = vpack.i.b16 %v505_v12, %v504_v15  ;;  %v517_v24 = vperm.slane %v503_v20, %v1926_v19 }
 0x11d   : > { %v544_v23 = vperm.slane %v506_v18, %v1926_v19  ;;  %v526_v30 = vrot.slane %v517_v24, 4 }
 0x11f   : > { %v552_v29 = vrot.slane %v544_v23, 4 }
 0x120   : > { %v1920_v11 = vpop.permute.xlu0 %497  ;;  %v617_v38 = vpop.permute.xlu1 %616 }
 0x121   : > { %620 = vrot.lane.b32.xlu2 %v1920_v11, %s1757_s5  ;;  %v510_v16 = vshrl.u32 %v1920_v11, 16  ;;  %v509_v22 = vpack.i.b16 %v1914_v9, %v1920_v11  ;;  %v627_v43 = vshrl.u32 %v617_v38, 16 }
 0x123   : > { %v512_v21 = vpack.i.b16 %v511_v17, %v510_v16  ;;  %v522_v28 = vperm.slane %v509_v22, %v1926_v19 }
 0x125   : > { %v549_v27 = vperm.slane %v512_v21, %v1926_v19  ;;  %v523_v35 = vrot.slane %v522_v28, 4  ;;  %v527_v36 = vsel %vm524_vm1, %v522_v28, %v526_v30 }
 0x126   : > { %v535_v39 = vperm.slane %v527_v36, %v1935_v31 }
 0x127   : > { %v550_v32 = vrot.slane %v549_v27, 4  ;;  %v553_v33 = vsel %vm524_vm1, %v549_v27, %v552_v29  ;;  %v525_v41 = vsel %vm524_vm1, %v523_v35, %v517_v24 }
 0x128   : > { %v561_v37 = vperm.slane %v553_v33, %v1935_v31  ;;  %v531_v47 = vperm.slane %v525_v41, %v1935_v31  ;;  %v538_v48 = vrot.slane %v535_v39, 4 }
 0x129   : > { %v551_v40 = vsel %vm524_vm1, %v550_v32, %v544_v23 }
 0x12a   : > { %v557_v44 = vperm.slane %v551_v40, %v1935_v31  ;;  %v564_v45 = vrot.slane %v561_v37, 4  ;;  %v536_v54 = vrot.slane %v531_v47, 4  ;;  %v539_v55 = vsel %vm524_vm1, 0, %v538_v48 }
 0x12b   : > { %v571_v3 = vrot.slane %v539_v55, 4  ;;  %v566_v40 = vsel %vm524_vm1, %v538_v48, %v531_v47 }
 0x12c   : > { %v562_v51 = vrot.slane %v557_v44, 4  ;;  %v565_v52 = vsel %vm524_vm1, 0, %v564_v45  ;;  %v537_v4 = vsel %vm524_vm1, 0, %v536_v54  ;;  %v585_v37 = vsel %vm524_vm1, %v564_v45, %v557_v44 }
 0x12d   : > { %v590_v61 = vrot.slane %v565_v52, 4  ;;  %v572_v21 = vsel %vm524_vm1, %v571_v3, %v537_v4  ;;  %v589_v52 = vperm.slane %v585_v37, %v1926_v19  ;;  %v570_v44 = vperm.slane %v566_v40, %v1926_v19 }
 0x12e   : > { %v563_v1 = vsel %vm524_vm1, 0, %v562_v51  ;;  %v576_v29 = vperm.slane %v572_v21, %v1926_v19 }
 0x12f   : > { %v591_v13 = vsel %vm524_vm1, %v590_v61, %v563_v1 }
 0x130   : > { %v595_v23 = vperm.slane %v591_v13, %v1926_v19 }
 0x132   : > { %v596_v41 = vrot.slane %v595_v23, 4 }
 0x134   : > { %v597_v48 = vsel %vm524_vm1, %v596_v41, %v589_v52 }
 0x173   : > { %v619_v34 = vpop.permute.xlu2 %618 }
 0x174   : > { %v628_v42 = vshrl.u32 %v619_v34, 16  ;;  %v626_v46 = vpack.i.b16 %v619_v34, %v617_v38 }
 0x176   : > { %v629_v49 = vpack.i.b16 %v628_v42, %v627_v43  ;;  %v640_v53 = vperm.slane %v626_v46, %v1926_v19  ;;  %v577_v46 = vrot.slane %v576_v29, 4 }
 0x178   : > { %v666_v57 = vperm.slane %v629_v49, %v1926_v19  ;;  %v648_v62 = vrot.slane %v640_v53, 4  ;;  %v578_v55 = vsel %vm524_vm1, %v577_v46, %v570_v44 }
 0x179   : > { %v582_v61 = vperm.slane %v578_v55, %v1935_v31 }
 0x17a   : > { %v674_v5 = vrot.slane %v666_v57, 4 }
 0x17b   : > { %v621_v50 = vpop.permute.xlu2 %620 }
 0x17c   : > { %v633_v58 = vshrl.u32 %v621_v50, 16 }
 0x18b   : > { %v623_v56 = vpop.permute.xlu0 %622 }
 0x18c   : > { %v632_v59 = vpack.i.b16 %v623_v56, %v621_v50  ;;  %v634_v60 = vshrl.u32 %v623_v56, 16 }
 0x18e   : > { %v635_v63 = vpack.i.b16 %v634_v60, %v633_v58  ;;  %v645_v0 = vperm.slane %v632_v59, %v1926_v19  ;;  %v601_v59 = vperm.slane %v597_v48, %v1935_v31 }
 0x190   : > { %v646_v6 = vrot.slane %v645_v0, 4  ;;  %v649_v7 = vsel %vm524_vm1, %v645_v0, %v648_v62  ;;  %v671_v8 = vperm.slane %v635_v63, %v1926_v19  ;;  %v606_v21 = vpack.i.b16 %v601_v59, %v582_v61 }
 0x191   : > { %v657_v12 = vperm.slane %v649_v7, %v1935_v31 }
 0x192   : > { %v647_v14 = vsel %vm524_vm1, %v646_v6, %v640_v53  ;;  %v672_v15 = vrot.slane %v671_v8, 4  ;;  %v675_v16 = vsel %vm524_vm1, %v671_v8, %v674_v5  ;;  %v602_v6 = vrot.slane %v601_v59, 4 }
 0x193   : > { %v653_v17 = vperm.slane %v647_v14, %v1935_v31  ;;  %v660_v18 = vrot.slane %v657_v12, 4  ;;  %v683_v20 = vperm.slane %v675_v16, %v1935_v31  ;;  %v583_v14 = vrot.slane %v582_v61, 4 }
 0x194   : > { %v673_v22 = vsel %vm524_vm1, %v672_v15, %v666_v57 }
 0x195   : > { %v658_v24 = vrot.slane %v653_v17, 4  ;;  %v661_v25 = vsel %vm524_vm1, 0, %v660_v18  ;;  %v679_v26 = vperm.slane %v673_v22, %v1935_v31  ;;  %v686_v27 = vrot.slane %v683_v20, 4 }
 0x196   : > { %v693_v28 = vrot.slane %v661_v25, 4  ;;  %v688_v35 = vsel %vm524_vm1, %v660_v18, %v653_v17  ;;  %v608_v17 = vshrl.u32 %v601_v59, 16  ;;  %v603_v18 = vsel %vm524_vm1, 0, %v602_v6 }
 0x197   : > { %v659_v30 = vsel %vm524_vm1, 0, %v658_v24  ;;  %v684_v32 = vrot.slane %v679_v26, 4  ;;  %v687_v33 = vsel %vm524_vm1, 0, %v686_v27  ;;  %v707_v42 = vsel %vm524_vm1, %v686_v27, %v679_v26 }
 0x198   : > { %v712_v34 = vrot.slane %v687_v33, 4  ;;  %v694_v36 = vsel %vm524_vm1, %v693_v28, %v659_v30  ;;  %v692_v49 = vperm.slane %v688_v35, %v1926_v19  ;;  %v711_v53 = vperm.slane %v707_v42, %v1926_v19 }
 0x199   : > { %v685_v38 = vsel %vm524_vm1, 0, %v684_v32  ;;  %v698_v39 = vperm.slane %v694_v36, %v1926_v19  ;;  %v607_v22 = vshrl.u32 %v582_v61, 16  ;;  %v584_v23 = vsel %vm524_vm1, 0, %v583_v14 }
 0x19a   : > { %v713_v43 = vsel %vm524_vm1, %v712_v34, %v685_v38  ;;  %v614_v24 = vshrl.u32 %v603_v18, 16  ;;  %v612_v26 = vpack.i.b16 %v603_v18, %v584_v23  ;;  %v613_v27 = vshrl.u32 %v584_v23, 16 }
 0x19b   : > { %v699_v50 = vrot.slane %v698_v39, 4  ;;  %v717_v51 = vperm.slane %v713_v43, %v1926_v19  ;;  %v609_v25 = vpack.i.b16 %v608_v17, %v607_v22 }
 0x19c   : > { %v615_v28 = vpack.i.b16 %v614_v24, %v613_v27 }
 0x19d   : > { %v700_v45 = vsel %vm524_vm1, %v699_v50, %v692_v49  ;;  %v718_v47 = vrot.slane %v717_v51, 4  ;;  %v739_v51 = vpop.permute.xlu1 %738 }
 0x19e   : > { %v704_v54 = vperm.slane %v700_v45, %v1935_v31 }
 0x19f   : > { %v719_v56 = vsel %vm524_vm1, %v718_v47, %v711_v53 }
 0x1a0   : > { %v723_v57 = vperm.slane %v719_v56, %v1935_v31  ;;  %v705_v58 = vrot.slane %v704_v54, 4  ;;  %v729_v60 = vshrl.u32 %v704_v54, 16 }
 0x1a2   : > { %v728_v62 = vpack.i.b16 %v723_v57, %v704_v54  ;;  %v730_v63 = vshrl.u32 %v723_v57, 16  ;;  %v706_v0 = vsel %vm524_vm1, 0, %v705_v58  ;;  %v724_v1 = vrot.slane %v723_v57, 4 }
 0x1a3   : > { %v735_v8 = vshrl.u32 %v706_v0, 16 }
 0x1a4   : > { %v865_v3 = vsel %vm860_vm2, %v728_v62, 0  ;;  %v731_v4 = vpack.i.b16 %v730_v63, %v729_v60  ;;  %v725_v5 = vsel %vm524_vm1, 0, %v724_v1  ;;  %v749_v1 = vshrl.u32 %v739_v51, 16 }
 0x1a5   : > { %874 = vmatpush.bf16.xpose.msra.mxu1 %v865_v3  ;;  %v734_v7 = vpack.i.b16 %v725_v5, %v706_v0  ;;  %v736_v12 = vshrl.u32 %v725_v5, 16 }
 0x1a6   : > { %v884_v13 = vsel %vm860_vm2, %v731_v4, 0 }
 0x1a7   : > { %893 = vmatpush.bf16.xpose.msra.mxu2 %v884_v13  ;;  %v903_v15 = vsel %vm860_vm2, %v734_v7, 0  ;;  %v737_v16 = vpack.i.b16 %v736_v12, %v735_v8 }
 0x1a8   : > { %912 = vmatpush.bf16.xpose.msra.mxu3 %v903_v15 }
 0x1a9   : > { %v922_v20 = vsel %vm860_vm2, %v737_v16, 0 }
 0x1aa   : > { %931 = vmatpush.bf16.xpose.msrb.mxu0 %v922_v20 }
 0x1ac   : > { %1504 = vmatmul.msk.bf16.vlgmr.msra.gmra.mxu1 %vm860_vm2, %v606_v21 }
 0x1ae   : > { %1505 = vmatmul.msk.bf16.vlgmr.msra.gmra.mxu2 %vm860_vm2, %v609_v25 }
 0x1af   : > { %1506 = vmatmul.msk.bf16.vlgmr.msra.gmra.mxu3 %vm860_vm2, %v612_v26 }
 0x1b1   : > { %1507 = vmatmul.msk.bf16.vlgmr.msrb.gmra.mxu0 %vm860_vm2, %v615_v28 }
 0x229   : > { %v876_v29 = vpop.f32.mrf.mxu1 }
 0x22a   : > { %v937_v30 = vmul.f32 0.35355338, %v876_v29 }
 0x22c   : > { %v941_v32 = vsel %vm860_vm2, %v937_v30, -inf }
 0x22d   : > { %942 = vmax.xlane.f32.xlu0 %v941_v32 }
 0x22e   : > { %v933_v33 = vpop.f32.mrf.mxu0 }
 0x22f   : > { %v940_v34 = vmul.f32 0.35355338, %v933_v33 }
 0x231   : > { %v878_v35 = vpop.f32.mrf.mxu1  ;;  %v895_v36 = vpop.f32.mrf.mxu2  ;;  %v950_v37 = vsel %vm860_vm2, %v940_v34, -inf }
 0x232   : > { %951 = vmax.xlane.f32.xlu2 %v950_v37  ;;  %v914_v38 = vpop.f32.mrf.mxu3  ;;  %v938_v40 = vmul.f32 0.35355338, %v895_v36 }
 0x233   : > { %v939_v39 = vmul.f32 0.35355338, %v914_v38 }
 0x234   : > { %v944_v46 = vsel %vm860_vm2, %v938_v40, -inf }
 0x235   : > { %v947_v41 = vsel %vm860_vm2, %v939_v39, -inf }
 0x236   : > { %v935_v42 = vpop.f32.mrf.mxu0  ;;  %948 = vmax.xlane.f32.xlu1 %v947_v41 }
 0x239   : > { %v897_v43 = vpop.f32.mrf.mxu2 }
 0x23a   : > { %945 = vmax.xlane.f32.xlu2 %v944_v46  ;;  %v916_v49 = vpop.f32.mrf.mxu3 }
 0x241   : > { %742 = vrot.lane.b32.xlu0 %v1920_v11, %s1759_s20 }
 0x24f   : > { %744 = vrot.lane.b32.xlu1 %v1914_v9, %s1759_s20 }
 0x252   : > { %740 = vrot.lane.b32.xlu2 %v1916_v10, %s1759_s20  ;;  %s1411_s20 = scalar_lea.hbm %s2202_s13, %s1548_s15 }
 0x253   : > { %s1415_s0 = sshll.u32 %s1411_s20, 4  ;;  %s1416_s0 = int_to_ptr.hbm [resolvable:$true] %s1415_s0 }
 0x254   : > { %s1698_s17 = sshra.s32 %s1416_s0, 4  ;;  %s1699_s17 = int_to_ptr.hbm [resolvable:$true] %s1698_s17 }
 0x255   : > { %s1700_s15 = scalar_lea.hbm %s1699_s17, 8  ;;  %p1705_p3 = scmp.lt.s32.totalorder %s1699_s17, %s2202_s13 }
 0x256   : > { %p1701_p0 = scmp.ne.s32.totalorder %s1699_s17, %s1700_s15 }
 0x258   : > { %p1702_p1 = pnand %p1701_p0, %p1874_p5 }
 0x25a   : > { %p1703_p2 = pneg %p1702_p1 }
 0x2a0   : > { %v943_v50 = vpop.xlane.xlu0 %942 }
 0x2a1   : > { %v953_v52 = vsub.f32 %v937_v30, %v943_v50 }
 0x2a3   : > { %v957_v44 = vmul.f32 1.442695, %v953_v52 }
 0x2a5   : > { %1632 = vpow2.f32 %v957_v44  ;;  %v952_v45 = vpop.xlane.xlu2 %951 }
 0x2a6   : > { %v956_v54 = vsub.f32 %v940_v34, %v952_v45 }
 0x2a8   : > { %v963_v10 = vmul.f32 1.442695, %v956_v54 }
 0x2a9   : > { %v949_v53 = vpop.xlane.xlu1 %948 }
 0x2aa   : > { %v955_v47 = vsub.f32 %v939_v39, %v949_v53 }
 0x2ab   : > { %v2011_v48 = vpop.eup %1632 }
 0x2ac   : > { %v961_v55 = vmul.f32 1.442695, %v955_v47  ;;  %v965_v11 = vsel %vm860_vm2, %v2011_v48, 0.0 }
 0x2ad   : > { %v946_v56 = vpop.xlane.xlu2 %945  ;;  %966 = vadd.xlane.f32.xlu1 %v965_v11 }
 0x2ae   : > { %1634 = vpow2.f32 %v961_v55  ;;  %v954_v9 = vsub.f32 %v938_v40, %v946_v56 }
 0x2b0   : > { %v959_v57 = vmul.f32 1.442695, %v954_v9 }
 0x2b2   : > { %1636 = vpow2.f32 %v959_v57 }
 0x2b3   : > { %1638 = vpow2.f32 %v963_v10  ;;  %v743_v6 = vpop.permute.xlu0 %742 }
 0x2b4   : > { %v2015_v58 = vpop.eup %1634  ;;  %v755_v12 = vshrl.u32 %v743_v6, 16 }
 0x2b5   : > { %v971_v59 = vsel %vm860_vm2, %v2015_v58, 0.0  ;;  %v741_v60 = vpop.permute.xlu2 %740 }
 0x2b6   : > { %972 = vadd.xlane.f32.xlu0 %v971_v59  ;;  %v750_v0 = vshrl.u32 %v741_v60, 16  ;;  %v748_v3 = vpack.i.b16 %v741_v60, %v739_v51 }
 0x2b8   : > { %v2019_v61 = vpop.eup %1636  ;;  %v751_v5 = vpack.i.b16 %v750_v0, %v749_v1  ;;  %v762_v7 = vperm.slane %v748_v3, %v1926_v19 }
 0x2b9   : > { %v968_v62 = vsel %vm860_vm2, %v2019_v61, 0.0  ;;  %v2023_v63 = vpop.eup %1638 }
 0x2ba   : > { %969 = vadd.xlane.f32.xlu2 %v968_v62  ;;  %v974_v4 = vsel %vm860_vm2, %v2023_v63, 0.0  ;;  %v788_v13 = vperm.slane %v751_v5, %v1926_v19  ;;  %v770_v16 = vrot.slane %v762_v7, 4 }
 0x2bc   : > { %v796_v20 = vrot.slane %v788_v13, 4 }
 0x2be   : > { %975 = vadd.xlane.f32.xlu0 %v974_v4 }
 0x2c1   : > { %v745_v8 = vpop.permute.xlu1 %744 }
 0x2c2   : > { %v754_v14 = vpack.i.b16 %v745_v8, %v743_v6  ;;  %v756_v15 = vshrl.u32 %v745_v8, 16 }
 0x2c4   : > { %v757_v17 = vpack.i.b16 %v756_v15, %v755_v12  ;;  %v767_v18 = vperm.slane %v754_v14, %v1926_v19 }
 0x2c6   : > { %v768_v21 = vrot.slane %v767_v18, 4  ;;  %v771_v22 = vsel %vm524_vm1, %v767_v18, %v770_v16  ;;  %v793_v23 = vperm.slane %v757_v17, %v1926_v19 }
 0x2c7   : > { %v779_v24 = vperm.slane %v771_v22, %v1935_v31 }
 0x2c8   : > { %v769_v25 = vsel %vm524_vm1, %v768_v21, %v762_v7  ;;  %v794_v26 = vrot.slane %v793_v23, 4  ;;  %v797_v27 = vsel %vm524_vm1, %v793_v23, %v796_v20 }
 0x2c9   : > { %v775_v28 = vperm.slane %v769_v25, %v1935_v31  ;;  %v782_v29 = vrot.slane %v779_v24, 4  ;;  %v805_v30 = vperm.slane %v797_v27, %v1935_v31 }
 0x2ca   : > { %v795_v32 = vsel %vm524_vm1, %v794_v26, %v788_v13 }
 0x2cb   : > { %v780_v33 = vrot.slane %v775_v28, 4  ;;  %v783_v34 = vsel %vm524_vm1, 0, %v782_v29  ;;  %v801_v35 = vperm.slane %v795_v32, %v1935_v31  ;;  %v808_v36 = vrot.slane %v805_v30, 4 }
 0x2cc   : > { %v815_v37 = vrot.slane %v783_v34, 4  ;;  %v810_v42 = vsel %vm524_vm1, %v782_v29, %v775_v28 }
 0x2cd   : > { %v781_v38 = vsel %vm524_vm1, 0, %v780_v33  ;;  %v806_v39 = vrot.slane %v801_v35, 4  ;;  %v809_v40 = vsel %vm524_vm1, 0, %v808_v36  ;;  %v829_v50 = vsel %vm524_vm1, %v808_v36, %v801_v35 }
 0x2ce   : > { %v834_v41 = vrot.slane %v809_v40, 4  ;;  %v816_v43 = vsel %vm524_vm1, %v815_v37, %v781_v38  ;;  %v814_v52 = vperm.slane %v810_v42, %v1926_v19  ;;  %v833_v47 = vperm.slane %v829_v50, %v1926_v19 }
 0x2cf   : > { %v807_v46 = vsel %vm524_vm1, 0, %v806_v39  ;;  %v820_v49 = vperm.slane %v816_v43, %v1926_v19 }
 0x2d0   : > { %v835_v51 = vsel %vm524_vm1, %v834_v41, %v807_v46 }
 0x2d1   : > { %v821_v44 = vrot.slane %v820_v49, 4  ;;  %v839_v45 = vperm.slane %v835_v51, %v1926_v19 }
 0x2d3   : > { %v822_v53 = vsel %vm524_vm1, %v821_v44, %v814_v52  ;;  %v840_v54 = vrot.slane %v839_v45, 4 }
 0x2d4   : > { %v826_v55 = vperm.slane %v822_v53, %v1935_v31 }
 0x2d5   : > { %v841_v11 = vsel %vm524_vm1, %v840_v54, %v833_v47 }
 0x2d6   : > { %v845_v56 = vperm.slane %v841_v11, %v1935_v31  ;;  %v827_v9 = vrot.slane %v826_v55, 4  ;;  %v851_v10 = vshrl.u32 %v826_v55, 16 }
 0x2d8   : > { %v850_v57 = vpack.i.b16 %v845_v56, %v826_v55  ;;  %v852_v59 = vshrl.u32 %v845_v56, 16  ;;  %v828_v60 = vsel %vm524_vm1, 0, %v827_v9  ;;  %v846_v62 = vrot.slane %v845_v56, 4 }
 0x2d9   : > { %v857_v5 = vshrl.u32 %v828_v60, 16 }
 0x2da   : > { %v994_v0 = vsel %vm992_vm3, %v850_v57, 0  ;;  %v853_v1 = vpack.i.b16 %v852_v59, %v851_v10  ;;  %v847_v3 = vsel %vm524_vm1, 0, %v846_v62 }
 0x2db   : > { %1003 = vmatpush.bf16.msrb.mxu1 %v994_v0  ;;  %v856_v4 = vpack.i.b16 %v847_v3, %v828_v60  ;;  %v858_v6 = vshrl.u32 %v847_v3, 16 }
 0x2dc   : > { %v1013_v7 = vsel %vm992_vm3, %v853_v1, 0 }
 0x2dd   : > { %1022 = vmatpush.bf16.msrb.mxu2 %v1013_v7  ;;  %v1032_v8 = vsel %vm992_vm3, %v856_v4, 0  ;;  %v859_v12 = vpack.i.b16 %v858_v6, %v857_v5 }
 0x2de   : > { %1041 = vmatpush.bf16.msrb.mxu3 %v1032_v8 }
 0x2df   : > { %v1051_v13 = vsel %vm992_vm3, %v859_v12, 0 }
 0x2e0   : > { %1060 = vmatpush.bf16.msra.mxu0 %v1051_v13 }
 0x320   : > { %v967_v14 = vpop.xlane.xlu1 %966 }
 0x321   : > { %1640 = vrcp.f32 %v967_v14 }
 0x327   : > { %v1641_v15 = vpop.eup %1640 }
 0x328   : > { %v981_v16 = vmul.f32 %v1641_v15, %v2011_v48 }
 0x329   : > { %v973_v17 = vpop.xlane.xlu0 %972 }
 0x32a   : > { %1642 = vrcp.f32 %v973_v17  ;;  %v985_v18 = vpack.c.bf16 %v981_v16, %v981_v16 }
 0x32c   : > { %1508 = vmatmul.msk.bf16.vlgmr.msrb.gmra.mxu1 %vm860_vm2, %v985_v18 }
 0x32d   : > { %v970_v20 = vpop.xlane.xlu2 %969 }
 0x32e   : > { %1644 = vrcp.f32 %v970_v20 }
 0x330   : > { %v1643_v21 = vpop.eup %1642 }
 0x331   : > { %v983_v22 = vmul.f32 %v1643_v21, %v2015_v58  ;;  %v976_v23 = vpop.xlane.xlu0 %975 }
 0x332   : > { %1646 = vrcp.f32 %v976_v23 }
 0x333   : > { %v987_v24 = vpack.c.bf16 %v983_v22, %v983_v22 }
 0x334   : > { %v1645_v25 = vpop.eup %1644 }
 0x335   : > { %v982_v26 = vmul.f32 %v1645_v25, %v2019_v61  ;;  %1510 = vmatmul.msk.bf16.vlgmr.msrb.gmra.mxu3 %vm860_vm2, %v987_v24 }
 0x337   : > { %v986_v27 = vpack.c.bf16 %v982_v26, %v982_v26 }
 0x338   : > { %v1647_v48 = vpop.eup %1646 }
 0x339   : > { %v984_v28 = vmul.f32 %v1647_v48, %v2023_v63  ;;  %1509 = vmatmul.msk.bf16.vlgmr.msrb.gmra.mxu2 %vm860_vm2, %v986_v27 }
 0x33b   : > { %v988_v29 = vpack.c.bf16 %v984_v28, %v984_v28 }
 0x33d   : > { %1511 = vmatmul.msk.bf16.vlgmr.msra.gmra.mxu0 %vm860_vm2, %v988_v29 }
 0x3a9   : > { %v1005_v30 = vpop.f32.mrf.mxu1 }
 0x3aa   : > { %v1069_v58 = vrot.slane %v1005_v30, 4 }
 0x3b1   : > { %v1007_v32 = vpop.f32.mrf.mxu1 }
 0x3b8   : > { %v1043_v33 = vpop.f32.mrf.mxu3 }
 0x3b9   : > { %v1066_v34 = vrot.slane %v1043_v33, 4  ;;  %v1070_v35 = vsel %vm524_vm1, %v1043_v33, %v1069_v58 }
 0x3ba   : > { %v1062_v36 = vpop.f32.mrf.mxu0  ;;  %v1078_v63 = vperm.slane %v1070_v35, %v1926_v19 }
 0x3bb   : > { %v1068_v61 = vsel %vm524_vm1, %v1066_v34, %v1005_v30  ;;  %v1079_v37 = vrot.slane %v1062_v36, 4 }
 0x3bc   : > { %v1074_v38 = vperm.slane %v1068_v61, %v1926_v19  ;;  %v1024_v39 = vpop.f32.mrf.mxu2  ;;  %v1105_v49 = vrot.slane %v1078_v63, 4 }
 0x3bd   : > { %v1080_v40 = vsel %vm524_vm1, %v1079_v37, %v1024_v39  ;;  %v1081_v41 = vrot.slane %v1024_v39, 4  ;;  %v1554_v37 = vld [vmem:[%s2192_s3 + $0x8] sm:$0xff] }
 0x3be   : > { %v1093_v42 = vrot.slane %v1074_v38, 4  ;;  %v1086_v43 = vperm.slane %v1080_v40, %v1926_v19  ;;  %1227 = vmatpush.bf16.msra.mxu1 %v1554_v37 }
 0x3bf   : > { %v1082_v46 = vsel %vm524_vm1, %v1062_v36, %v1081_v41 }
 0x3c0   : > { %v1090_v50 = vperm.slane %v1082_v46, %v1926_v19  ;;  %v1091_v51 = vrot.slane %v1086_v43, 4  ;;  %v1094_v52 = vsel %vm524_vm1, %v1086_v43, %v1093_v42  ;;  %v1045_v44 = vpop.f32.mrf.mxu3 }
 0x3c1   : > { %v1102_v45 = vperm.slane %v1094_v52, %v1935_v31 }
 0x3c2   : > { %v1092_v53 = vsel %vm524_vm1, %v1091_v51, %v1074_v38  ;;  %v1103_v47 = vrot.slane %v1090_v50, 4  ;;  %v1106_v54 = vsel %vm524_vm1, %v1090_v50, %v1105_v49  ;;  %v1064_v55 = vpop.f32.mrf.mxu0  ;;  %v1625_v49 = vld [vmem:[%s2193_s4] ss:$0 sm:$0xff] }
 0x3c3   : > { %v1098_v11 = vperm.slane %v1092_v53, %v1935_v31  ;;  %v1114_v56 = vperm.slane %v1106_v54, %v1935_v31  ;;  %v1117_v9 = vrot.slane %v1102_v45, 4  ;;  %v1765_v53 = vmov 32.0  }
 0x3c4   : > { %v1104_v10 = vsel %vm524_vm1, %v1103_v47, %v1078_v63  ;;  %v1026_v57 = vpop.f32.mrf.mxu2  ;;  %1648 = vrcp.f32 %v1765_v53 }
 0x3c5   : > { %v1110_v59 = vperm.slane %v1104_v10, %v1935_v31  ;;  %v1115_v60 = vrot.slane %v1098_v11, 4  ;;  %v1118_v62 = vsel %vm524_vm1, 0.0, %v1117_v9  ;;  %v1121_v0 = vrot.slane %v1114_v56, 4 }
 0x3c6   : > { %v1123_v1 = vsel %vm524_vm1, %v1117_v9, %v1098_v11  ;;  %v1128_v3 = vrot.slane %v1118_v62, 4 }
 0x3c7   : > { %v1116_v4 = vsel %vm524_vm1, 0.0, %v1115_v60  ;;  %v1119_v5 = vrot.slane %v1110_v59, 4  ;;  %v1122_v6 = vsel %vm524_vm1, 0.0, %v1121_v0  ;;  %v1127_v7 = vperm.slane %v1123_v1, %v1926_v19  ;;  %v1560_v1 = vld [vmem:[%s2196_s7 + $0x18] sm:$0xff] }
 0x3c8   : > { %v1139_v8 = vrot.slane %v1122_v6, 4  ;;  %v1129_v12 = vsel %vm524_vm1, %v1128_v3, %v1116_v4  ;;  %v1134_v13 = vsel %vm524_vm1, %v1121_v0, %v1110_v59  ;;  %v1555_v0 = vld [vmem:[#allocation3] sm:$0xff]  ;;  %1357 = vmatpush.bf16.msra.mxu3 %v1560_v1 }
 0x3c9   : > { %v1120_v14 = vsel %vm524_vm1, 0.0, %v1119_v5  ;;  %v1133_v15 = vperm.slane %v1129_v12, %v1926_v19  ;;  %v1138_v16 = vperm.slane %v1134_v13, %v1926_v19  ;;  %v1147_v17 = vrot.slane %v1127_v7, 4  ;;  %v1559_v5 = vld [vmem:[%s2196_s7 + $0x10] sm:$0xff] }
 0x3ca   : > { %v1140_v18 = vsel %vm524_vm1, %v1139_v8, %v1120_v14  ;;  %v1649_v47 = vpop.eup %1648 }
 0x3cb   : > { %v1144_v20 = vperm.slane %v1140_v18, %v1926_v19  ;;  %v1148_v21 = vsel %vm524_vm1, %v1133_v15, %v1147_v17  ;;  %v1159_v22 = vrot.slane %v1138_v16, 4  ;;  %v1145_v23 = vrot.slane %v1133_v15, 4  ;;  %v1627_v18 = vld [vmem:[%s2199_s10] ss:$0 sm:$0xff] }
 0x3cc   : > { %v1156_v24 = vperm.slane %v1148_v21, %v1935_v31  ;;  %v1241_v54 = vmul.f32 32.0, %v1649_v47  ;;  %vm1245_vm7 = vweird.f32 %v1649_v47  ;;  %1358 = vmatpush.bf16.msra.mxu3 %v1559_v5 }
 0x3cd   : > { %v1160_v25 = vsel %vm524_vm1, %v1144_v20, %v1159_v22  ;;  %v1146_v26 = vsel %vm524_vm1, %v1145_v23, %v1127_v7  ;;  %v1157_v27 = vrot.slane %v1144_v20, 4 }
 0x3ce   : > { %v1168_v48 = vperm.slane %v1160_v25, %v1935_v31  ;;  %v1175_v28 = vrot.slane %v1156_v24, 4  ;;  %v1152_v29 = vperm.slane %v1146_v26, %v1935_v31  ;;  %v1242_v55 = vsub.f32 1.0, %v1241_v54  ;;  %v1557_v25 = vld [vmem:[%s2196_s7] sm:$0xff] }
 0x3cf   : > { %v1158_v30 = vsel %vm524_vm1, %v1157_v27, %v1138_v16  ;;  %v1626_v16 = vld [vmem:[%s2198_s9] ss:$0 sm:$0xff] }
 0x3d0   : > { %v1176_v19 = vsel %vm524_vm1, %v1168_v48, %v1175_v28  ;;  %v1173_v32 = vrot.slane %v1168_v48, 4  ;;  %v1164_v58 = vperm.slane %v1158_v30, %v1935_v31  ;;  %v1171_v33 = vrot.slane %v1152_v29, 4  ;;  %v1553_v31 = vld [vmem:[%s2192_s3] sm:$0xff] }
 0x3d1   : > { %1186 = vrot.lane.b32.xlu0 %v1176_v19, %s1762_s21  ;;  %1228 = vmatpush.bf16.msra.mxu1 %v1553_v31  ;;  %v1243_v11 = vmul.f32 %v1649_v47, %v1242_v55  ;;  %v1628_v26 = vld [vmem:[%s2195_s6] ss:$0 sm:$0xff] }
 0x3d2   : > { %v1174_v34 = vsel %vm524_vm1, %v1173_v32, %v1156_v24  ;;  %v1169_v35 = vrot.slane %v1164_v58, 4  ;;  %v1172_v36 = vsel %vm524_vm1, %v1164_v58, %v1171_v33  ;;  %v1558_v24 = vld [vmem:[%s2196_s7 + $0x8] sm:$0xff]  ;;  %v1629_v19 = vld [vmem:[%s2197_s8] ss:$0 sm:$0xff] }
 0x3d3   : > { %1182 = vrot.lane.b32.xlu1 %v1174_v34, %s1763_s23  ;;  %1178 = vrot.lane.b32.xlu2 %v1172_v36, %s1764_s22  ;;  %v1244_v56 = vadd.f32 %v1649_v47, %v1243_v11  ;;  %s448_s22 = scalar_lea.vmem [#allocation6], %s1493_s30  ;;  %s1704_s30 = scalar_lea.hbm %s2202_s13, 16 }
 0x3d4   : > { %v1170_v61 = vsel %vm524_vm1, %v1169_v35, %v1152_v29  ;;  %1359 = vmatpush.bf16.msra.mxu3 %v1558_v24  ;;  %s1413_s29 = sshll.u32 %s448_s22, 4  ;;  %p1706_p4 = scmp.lt.s32.totalorder %s1704_s30, %s1700_s15  ;;  %s1414_s29 = int_to_ptr.vmem [resolvable:$true] %s1413_s29 }
 0x3d5   : > { %v1246_v9 = vsel %vm1245_vm7, %v1649_v47, %v1244_v56 }
 0x3d6   : > { %p1707_p7 = por %p1706_p4, %p1705_p3 }
 0x3d8   : > { %1360 = vmatpush.bf16.msra.mxu3 %v1557_v25  ;;  %p1708_p8 = pnand %p1707_p7, %p1703_p2 }
 0x42d   : > { %v1179_v38 = vpop.permute.xlu2 %1178 }
 0x42e   : > { %v1189_v63 = vsel %vm860_vm2, %v1170_v61, %v1179_v38 }
 0x443   : > { %v1187_v40 = vpop.permute.xlu0 %1186 }
 0x445   : > { %v1183_v39 = vpop.permute.xlu1 %1182 }
 0x446   : > { %v1191_v41 = vsel %vm1190_vm4, %v1189_v63, %v1183_v39 }
 0x447   : > { %v1193_v42 = vsel %vm1192_vm5, %v1191_v41, %v1187_v40 }
 0x448   : > { %v1194_v43 = vpack.c.bf16 %v1193_v42, %v1193_v42 }
 0x44a   : > { %1196 = vst.msk [vmem:[#allocation2] sm:$0xf] %vm1195_vm6, %v1194_v43 }
 0x451   : > { %v1197_v46 = vld [vmem:[#allocation2] sm:$0xf] }
 0x452   : > { %1520 = vmatmul.msk.bf16.vlgmr.msra.gmra.mxu1 %vm476_vm0, %v1197_v46 }
 0x4cf   : > { %v1230_v50 = vpop.f32.mrf.mxu1 }
 0x4d0   : > { %v1231_v51 = vadd.f32 %v1625_v49, %v1230_v50 }
 0x4d2   : > { %v1234_v52 = vadd.f32 %v1231_v51, %v1905_v2  ;;  %v1556_v2 = vld [vmem:[#allocation3 + $0x8] sm:$0xff]  ;;  %v1630_v51 = vld [vmem:[%s2200_s11] ss:$0 sm:$0xff] }
 0x4d3   : > { %1304 = vmatpush.bf16.msra.mxu2 %v1556_v2 }
 0x4d4   : > { %v1237_v44 = vsel %vm476_vm0, %v1234_v52, 0.0 }
 0x4d5   : > { %1238 = vadd.xlane.f32.xlu2 %v1237_v44 }
 0x4d7   : > { %v1232_v45 = vpop.f32.mrf.mxu1  ;;  %1305 = vmatpush.bf16.msra.mxu2 %v1555_v0 }
 0x4d8   : > { %v1631_v45 = vld [vmem:[%s2201_s12] ss:$0 sm:$0xff] }
 0x548   : > { %v1239_v10 = vpop.xlane.xlu2 %1238 }
 0x549   : > { %v1247_v57 = vmul.f32 %v1246_v9, %v1239_v10 }
 0x54b   : > { %v1248_v59 = vsub.f32 %v1234_v52, %v1247_v57 }
 0x54d   : > { %v1249_v60 = vmul.f32 %v1248_v59, %v1248_v59 }
 0x54f   : > { %v1250_v62 = vsel %vm476_vm0, %v1249_v60, 0.0 }
 0x550   : > { %1251 = vadd.xlane.f32.xlu0 %v1250_v62 }
 0x5c3   : > { %v1252_v3 = vpop.xlane.xlu0 %1251 }
 0x5c4   : > { %v1253_v4 = vmul.f32 %v1252_v3, %v1246_v9 }
 0x5c6   : > { %v1254_v6 = vadd.f32 1e-05, %v1253_v4 }
 0x5c8   : > { %1650 = vrsqrt.f32 %v1254_v6  ;;  %vm1261_vm9 = vweird.f32 %v1254_v6 }
 0x5ce   : > { %v1651_v7 = vpop.eup %1650 }
 0x5cf   : > { %v1256_v8 = vmul.f32 %v1651_v7, %v1254_v6  ;;  %vm1262_vm8 = vweird.f32 %v1651_v7 }
 0x5d0   : > { %vm1263_vm10 = vmor %vm1261_vm9, %vm1262_vm8 }
 0x5d1   : > { %v1257_v12 = vmul.f32 %v1651_v7, %v1256_v8 }
 0x5d3   : > { %v1258_v13 = vmul.f32 0.5, %v1257_v12 }
 0x5d5   : > { %v1259_v14 = vsub.f32 1.5, %v1258_v13 }
 0x5d7   : > { %v1260_v15 = vmul.f32 %v1651_v7, %v1259_v14 }
 0x5d9   : > { %v1264_v17 = vsel %vm1263_vm10, %v1651_v7, %v1260_v15 }
 0x5da   : > { %v1265_v20 = vmul.f32 %v1264_v17, %v1248_v59 }
 0x5dc   : > { %v1269_v21 = vmul.f32 %v1626_v16, %v1265_v20 }
 0x5de   : > { %v1273_v22 = vadd.f32 %v1627_v18, %v1269_v21 }
 0x5e0   : > { %v1274_v23 = vpack.c.bf16 %v1273_v22, %v1273_v22 }
 0x5e2   : > { %1529 = vmatmul.msk.bf16.vlgmr.msra.gmra.mxu2 %vm476_vm0, %v1274_v23 }
 0x665   : > { %v1307_v27 = vpop.f32.mrf.mxu2 }
 0x666   : > { %v1308_v48 = vadd.f32 %v1628_v26, %v1307_v27 }
 0x668   : > { %v1311_v28 = vmax.f32 %v1308_v48, 0.0 }
 0x66a   : > { %v1312_v29 = vpack.c.bf16 %v1311_v28, %v1311_v28 }
 0x66c   : > { %1546 = vmatmul.msk.bf16.vlgmr.msra.gmra.mxu3 %vm1349_vm11, %v1312_v29 }
 0x66d   : > { %v1309_v30 = vpop.f32.mrf.mxu2 }
 0x6ef   : > { %v1362_v32 = vpop.f32.mrf.mxu3 }
 0x6f0   : > { %v1363_v58 = vadd.f32 %v1629_v19, %v1362_v32 }
 0x6f2   : > { %v1366_v33 = vadd.f32 %v1363_v58, %v1273_v22 }
 0x6f4   : > { %v1369_v34 = vsel %vm476_vm0, %v1366_v33, 0.0 }
 0x6f5   : > { %1370 = vadd.xlane.f32.xlu1 %v1369_v34 }
 0x6f7   : > { %v1364_v35 = vpop.f32.mrf.mxu3 }
 0x768   : > { %v1371_v36 = vpop.xlane.xlu1 %1370 }
 0x769   : > { %v1372_v61 = vmul.f32 %v1371_v36, %v1246_v9 }
 0x76b   : > { %v1373_v37 = vsub.f32 %v1366_v33, %v1372_v61 }
 0x76d   : > { %v1374_v31 = vmul.f32 %v1373_v37, %v1373_v37 }
 0x76f   : > { %v1375_v38 = vsel %vm476_vm0, %v1374_v31, 0.0 }
 0x770   : > { %1376 = vadd.xlane.f32.xlu2 %v1375_v38 }
 0x7e3   : > { %v1377_v63 = vpop.xlane.xlu2 %1376 }
 0x7e4   : > { %v1378_v39 = vmul.f32 %v1377_v63, %v1246_v9 }
 0x7e6   : > { %v1379_v40 = vadd.f32 1e-05, %v1378_v39 }
 0x7e8   : > { %1652 = vrsqrt.f32 %v1379_v40  ;;  %vm1386_vm13 = vweird.f32 %v1379_v40 }
 0x7ee   : > { %v1653_v41 = vpop.eup %1652 }
 0x7ef   : > { %v1381_v42 = vmul.f32 %v1653_v41, %v1379_v40  ;;  %vm1387_vm12 = vweird.f32 %v1653_v41 }
 0x7f0   : > { %vm1388_vm14 = vmor %vm1386_vm13, %vm1387_vm12 }
 0x7f1   : > { %v1382_v43 = vmul.f32 %v1653_v41, %v1381_v42 }
 0x7f3   : > { %v1383_v46 = vmul.f32 0.5, %v1382_v43 }
 0x7f5   : > { %v1384_v49 = vsub.f32 1.5, %v1383_v46 }
 0x7f7   : > { %v1385_v50 = vmul.f32 %v1653_v41, %v1384_v49 }
 0x7f9   : > { %v1389_v52 = vsel %vm1388_vm14, %v1653_v41, %v1385_v50 }
 0x7fa   : > { %v1390_v44 = vmul.f32 %v1389_v52, %v1373_v37 }
 0x7fc   : > { %v1394_v53 = vmul.f32 %v1630_v51, %v1390_v44 }
 0x7fe   : > { %v1398_v47 = vadd.f32 %v1631_v45, %v1394_v53 }
 0x800   : > { %1399 = vst.msk [vmem:[%s448_s22] sm:$0xff] %vm476_vm0, %v1398_v47 }
 0x801   : > { %1711 = shalt.err (!%p1708_p8)
}
 0x802   : > { %1565 = dma.vmem_to_hbm [thread:$0]  (%p1874_p5), %s1414_s29, 128, %s1416_s0, %s1401_s27  }
 0x803 PF: > { %p1577_p9 = scmp.ge.s32.totalorder %s1750_s28, 2  ;;  %s1427_s24 = sand.u32 1, %s1738_s25  }
 0x804   : > { %s1428_s23 = scalar_lea.sflag [#allocation5], %s1427_s24 }
 0x805   : > { %p1572_p10 = pnand %p1577_p9, %p1878_p6 }
 0x807   : > { %p1573_p11 = pneg %p1572_p10 }
 0x809   : > { %1733 = dma.done.wait (%p1573_p11), %s1428_s23, 128  }
 0x80a   : > { %1735 = vsyncadd (%p1573_p11), %s1428_s23, 4294967168  ;;  %s2212_s22 = sld [smem:[#allocation9_spill]]  ;;  %p24_p12 = scmp.ge.s32.totalorder %s1861_s14, 4  }
 0x80b   : > { %s2213_s27 = sld [smem:[#allocation10_spill]]  ;;  %s2214_s25 = smov %s1742_s26 }
 0x80c   : > { %s2216_s28 = smov %s1861_s14  ;;  %26 = sbr.rel (!%p24_p12) target bundleno = 7 (0x7), region = 112 }
 0x810   : > { %s2215_s26 = smov %s2212_s22 }
 0x811   :  { %1434 = vsyncpa [#allocation4], 1 }
 0x812   :  { %1436 = vsyncpa [#allocation4 + $0x1], 1 }
 0x813   :  { %1437 = vsyncpa [#allocation5], 1 }
 0x814   :  { %1439 = vsyncpa [#allocation5 + $0x1], 1 }

// kernel: tpu_custom_call.1
= control target key start
LH: loop header
LB: loop body
LE: loop exit
PB: predicated region body
PF: predicated region fallthrough
CT: control target
= control target key end

     0   :  { %s1589_s0 = inlined_call_operand.vmem [shape: f32[16,32], index: 0, kind: input, shape index: {}]   ;;  %s1590_s1 = inlined_call_operand.vmem [shape: bf16[32,96], index: 1, kind: input, shape index: {}]   ;;  %s1591_s2 = inlined_call_operand.vmem [shape: f32[1,96], index: 2, kind: input, shape index: {}]   ;;  %s1592_s3 = inlined_call_operand.vmem [shape: bf16[32,32], index: 3, kind: input, shape index: {}]   ;;  %s1593_s4 = inlined_call_operand.vmem [shape: f32[1,32], index: 4, kind: input, shape index: {}]   ;;  %s1594_s5 = inlined_call_operand.hbm [shape: bf16[32,64], index: 5, kind: input, shape index: {}]   ;;  %s1595_s6 = inlined_call_operand.vmem [shape: f32[1,64], index: 6, kind: input, shape index: {}]   ;;  %s1596_s7 = inlined_call_operand.vmem [shape: bf16[64,32], index: 7, kind: input, shape index: {}]   ;;  %s1597_s8 = inlined_call_operand.vmem [shape: f32[1,32], index: 8, kind: input, shape index: {}]   ;;  %s1598_s9 = inlined_call_operand.vmem [shape: f32[1,32], index: 9, kind: input, shape index: {}]   ;;  %s1599_s10 = inlined_call_operand.vmem [shape: f32[1,32], index: 10, kind: input, shape index: {}]   ;;  %s1600_s11 = inlined_call_operand.vmem [shape: f32[1,32], index: 11, kind: input, shape index: {}]   ;;  %s1601_s12 = inlined_call_operand.vmem [shape: f32[1,32], index: 12, kind: input, shape index: {}]   ;;  %s1602_s13 = inlined_call_operand.hbm [shape: f32[16,32], index: 13, kind: output, shape index: {}]  }
   0x1   :  { %1604 = sst [smem:[#allocation11_spill]] %s1589_s0 }
   0x2   :  { %1605 = sst [smem:[#allocation12_spill]] %s1594_s5 }
   0x3   :  { %18 = vsyncpa [#allocation4], 0 }
   0x4   :  { %19 = vsyncpa [#allocation5], 0 }
   0x5   :  { %21 = vsyncpa [#allocation5 + $0x1], 0  ;;  %s1396_s25 = smov 0   ;;  %s1398_s26 = smov 0  }
   0x6   :  { %s1400_s27 = smov 0   ;;  %s1402_s28 = smov 0  }
   0x7 LB: > { %1606 = sst [smem:[#allocation9_spill]] %s1302_s27  ;;  %s1417_s29 = sadd.s32 4294967295, %s1306_s28   ;;  %s1306_s28 = sphi %s1402_s28, %s1616_s28   ;;  %s1302_s27 = sphi %s1400_s27, %s1613_s27   ;;  %s1298_s26 = sphi %s1398_s26, %s1615_s26   ;;  %s1294_s25 = sphi %s1396_s25, %s1614_s25  }
   0x8   : > { %s1039_s30 = sadd.s32 4294967294, %s1306_s28   ;;  %s1421_s14 = sadd.s32 1, %s1306_s28  }
   0x9   : > { %s312_s15 = sadd.s32 1, %s1302_s27  ;;  %s309_s16 = ssub.s32 %s1306_s28, %s1421_s14 }
   0xa   : > { %p322_p0 = scmp.ne.s32.totalorder %s1302_s27, %s1298_s26  ;;  %p310_p1 = scmp.eq.s32.totalorder %s309_s16, 0 }
   0xb   : > { %p323_p2 = scmp.eq.s32.totalorder %s1417_s29, 1  ;;  %p328_p3 = scmp.ne.s32.totalorder %s1298_s26, %s1294_s25 }
   0xc   : > { %p329_p4 = scmp.eq.s32.totalorder %s1039_s30, 1  ;;  %p1040_p7 = scmp.ge.s32.totalorder %s1306_s28, 1 }
   0xd   : > { %s1432_s17 = scalar_select %p310_p1, %s1302_s27, %s312_s15  }
   0xe   : > { %p1434_p5 = por %p323_p2, %p322_p0  ;;  %p1438_p6 = por %p329_p4, %p328_p3 }
   0xf   : > { %1607 = sst [smem:[#allocation10_spill]] %s1432_s17  ;;  %p336_p8 = scmp.lt.s32.totalorder %s1306_s28, 3 }
  0x10   : > { %p1127_p9 = scmp.eq.s32.totalorder %s1417_s29, 0  ;;  %s1610_s5 = sld [smem:[#allocation12_spill]] }
  0x11   : > { %p337_p10 = pnand %p1040_p7, %p336_p8  ;;  %s1308_s23 = smov [#allocation3]  }
  0x12   : > { %s361_s24 = sshll.u32 %s1308_s23, 4  ;;  %s1309_s30 = smov 64   ;;  %s362_s24 = int_to_ptr.vmem [resolvable:$true] %s361_s24 }
  0x13   : > { %p1119_p11 = pneg %p337_p10  ;;  %s1310_s15 = smov 4  }
  0x14   : > { %405 = sbr.rel (%p337_p10) target bundleno = 1920 (0x780), region = 72 }
  0x15   : > { %p1120_p12 = pnand %p1127_p9, %p1119_p11 }
  0x16   : > { %s359_s22 = sshll.u32 %s1610_s5, 4  ;;  %s360_s22 = int_to_ptr.hbm [resolvable:$true] %s359_s22 }
  0x17   : > { %1122 = dma.hbm_to_vmem [thread:$0]  (!%p1120_p12), %s360_s22, 256, %s362_s24, [#allocation4], %s1309_s30, %s1309_s30, %s1310_s15  }
  0x19   : > { %1285 = dma.done.wait (%p1127_p9), [#allocation4], 256  }
  0x1a   : > { %1287 = vsyncadd (%p1127_p9), [#allocation4], 4294967040  ;;  %p449_p13 = scmp.lt.s32.totalorder %s1417_s29, 1  ;;  %s1611_s0 = sld [smem:[#allocation11_spill]]  ;;  %v1104_v0 = vld [vmem:[%s1590_s1 + $0x8] sm:$0xff]  ;;  %v1103_v1 = vld [vmem:[%s1590_s1] sm:$0xff] }
  0x1b   : > { %486 = vmatpush.bf16.msra.mxu0 %v1104_v0  ;;  %vm476_vm0 = vcmask 261120   ;;  %v1180_v4 = vld [vmem:[%s1591_s2] ss:$0 sm:$0xff]  ;;  %s1312_s27 = smov 120   ;;  %s1313_s17 = smov 96   ;;  %vm499_vm1 = vcmask 64512  }
  0x1c   : > { %s450_s16 = scalar_select %p449_p13, %s1417_s29, 1  ;;  %vm537_vm2 = vcmask 1043456   ;;  %vm555_vm3 = vcmask 60416   ;;  %vm619_vm4 = vcmask 126016   ;;  %vm683_vm5 = vcmask 191616  }
  0x1d   : > { %s1316_s21 = smov 88   ;;  %s1317_s23 = smov 112   ;;  %vm747_vm6 = vcmask 257216   ;;  %vm901_vm11 = vcmask 523264  }
  0x1e   : > { %s1046_s20 = sshll.u32 %s450_s16, 3  ;;  %s1314_s16 = smov 80  }
  0x1f   : > { %487 = vmatpush.bf16.msra.mxu0 %v1103_v1  ;;  %s1318_s22 = smov 64   ;;  %s1319_s24 = smov 40  }
  0x20   : > { %s452_s5 = scalar_lea.vmem %s1611_s0, %s1046_s20  ;;  %s1315_s20 = smov 72  }
  0x21   : > { %v1465_v2 = vld [vmem:[%s452_s5] sm:$0xff]  ;;  %s1311_s5 = smov 104   ;;  %s1320_s30 = smov 56  }
  0x22   : > { %v455_v3 = vpack.c.bf16 %v1465_v2, %v1465_v2  ;;  %s1321_s15 = smov 48  }
  0x24   : > { %1055 = vmatmul.msk.bf16.vlgmr.msra.gmra.mxu0 %vm476_vm0, %v455_v3 }
  0xa1   : > { %v489_v5 = vpop.f32.mrf.mxu0 }
  0xa2   : > { %v490_v6 = vadd.f32 %v1180_v4, %v489_v5 }
  0xa4   : > { %v493_v7 = vpack.c.bf16 %v490_v6, %v490_v6 }
  0xa6   : > { %v495_v8 = vunpack.c.l.b16 %v493_v7 }
  0xa8   : > { %v1473_v9 = vpack.c.b16 %v495_v8, %v495_v8 }
  0xa9   : > { %v491_v10 = vpop.f32.mrf.mxu0 }
  0xaa   : > { %685 = vrot.lane.b32.xlu2 %v1473_v9, %s1311_s5  ;;  %557 = vrot.lane.b32.xlu1 %v1473_v9, %s1312_s27  ;;  %s1322_s5 = smov 8   ;;  %s1323_s27 = smov 16  }
  0xab   : > { %497 = vrot.lane.b32.xlu0 %v1473_v9, %s1313_s17  ;;  %s1324_s17 = smov 24  }
  0xb2   : > { %623 = vrot.lane.b32.xlu2 %v1473_v9, %s1314_s16  ;;  %687 = vrot.lane.b32.xlu1 %v1473_v9, %s1315_s20  ;;  %s446_s16 = sand.u32 1, %s1298_s26  }
  0xb3   : > { %559 = vrot.lane.b32.xlu0 %v1473_v9, %s1316_s21  ;;  %s1045_s20 = sshll.u32 %s446_s16, 3  ;;  %s1100_s21 = sshll.u32 %s1417_s29, 3 }
  0xbb   : > { %621 = vrot.lane.b32.xlu0 %v1473_v9, %s1317_s23  ;;  %s953_s23 = scalar_lea.sflag [#allocation5], %s446_s16 }
 0x104   : > { %v686_v11 = vpop.permute.xlu2 %685 }
 0x10c   : > { %v624_v12 = vpop.permute.xlu2 %623 }
 0x10d   : > { %v629_v13 = vsel %vm499_vm1, %v624_v12, 0 }
 0x10e   : > { %638 = vmatpush.bf16.xpose.msrb.mxu0 %v629_v13 }
 0x11c   : > { %v558_v14 = vpop.permute.xlu1 %557 }
 0x11d   : > { %v498_v15 = vpop.permute.xlu0 %497 }
 0x11e   : > { %v504_v16 = vsel %vm499_vm1, %v498_v15, 0 }
 0x11f   : > { %513 = vmatpush.bf16.xpose.msra.mxu1 %v504_v16 }
 0x124   : > { %v688_v17 = vpop.permute.xlu1 %687 }
 0x125   : > { %v560_v18 = vpop.permute.xlu0 %559  ;;  %v693_v19 = vsel %vm499_vm1, %v688_v17, 0 }
 0x126   : > { %1056 = vmatmul.msk.bf16.vlgmr.msra.gmra.mxu1 %vm499_vm1, %v493_v7  ;;  %v565_v20 = vsel %vm499_vm1, %v560_v18, 0 }
 0x127   : > { %574 = vmatpush.bf16.xpose.msra.mxu3 %v565_v20 }
 0x12d   : > { %v622_v21 = vpop.permute.xlu0 %621 }
 0x12e   : > { %1058 = vmatmul.msk.bf16.vlgmr.msra.gmra.mxu3 %vm499_vm1, %v558_v14  ;;  %1060 = vmatmul.msk.bf16.vlgmr.msrb.gmra.mxu0 %vm499_vm1, %v622_v21 }
 0x12f   : > { %702 = vmatpush.bf16.xpose.msrb.mxu3 %v693_v19 }
 0x13e   : > { %1062 = vmatmul.msk.bf16.vlgmr.msrb.gmra.mxu3 %vm499_vm1, %v686_v11 }
 0x1a3   : > { %v515_v22 = vpop.f32.mrf.mxu1 }
 0x1a4   : > { %v519_v23 = vmul.f32 0.35355338, %v515_v22 }
 0x1a6   : > { %v520_v24 = vsel %vm499_vm1, %v519_v23, -inf }
 0x1a7   : > { %521 = vmax.xlane.f32.xlu1 %v520_v24 }
 0x1ab   : > { %v517_v25 = vpop.f32.mrf.mxu1  ;;  %v640_v26 = vpop.f32.mrf.mxu0 }
 0x1ac   : > { %v644_v31 = vmul.f32 0.35355338, %v640_v26 }
 0x1ae   : > { %v645_v33 = vsel %vm499_vm1, %v644_v31, -inf }
 0x1b1   : > { %v576_v27 = vpop.f32.mrf.mxu3 }
 0x1b2   : > { %v580_v28 = vmul.f32 0.35355338, %v576_v27 }
 0x1b3   : > { %v642_v29 = vpop.f32.mrf.mxu0 }
 0x1b4   : > { %v581_v30 = vsel %vm499_vm1, %v580_v28, -inf }
 0x1b5   : > { %582 = vmax.xlane.f32.xlu2 %v581_v30 }
 0x1b9   : > { %v578_v32 = vpop.f32.mrf.mxu3 }
 0x1ba   : > { %v1105_v32 = vld [vmem:[%s1592_s3] sm:$0xff] }
 0x1bd   : > { %646 = vmax.xlane.f32.xlu2 %v645_v33 }
 0x1c1   : > { %v704_v34 = vpop.f32.mrf.mxu3 }
 0x1c2   : > { %v708_v35 = vmul.f32 0.35355338, %v704_v34 }
 0x1c4   : > { %v709_v36 = vsel %vm499_vm1, %v708_v35, -inf }
 0x1c5   : > { %710 = vmax.xlane.f32.xlu0 %v709_v36 }
 0x1c9   : > { %v706_v37 = vpop.f32.mrf.mxu3 }
 0x1ca   : > { %v1181_v37 = vld [vmem:[%s1593_s4] ss:$0 sm:$0xff] }
 0x1d5   : > { %532 = vrot.lane.b32.xlu2 %v1473_v9, %s1318_s22 }
 0x1dd   : > { %721 = vrot.lane.b32.xlu2 %v1473_v9, %s1319_s24 }
 0x21a   : > { %v522_v38 = vpop.xlane.xlu1 %521 }
 0x21b   : > { %v523_v39 = vsub.f32 %v519_v23, %v522_v38 }
 0x21d   : > { %v524_v40 = vmul.f32 1.442695, %v523_v39 }
 0x21f   : > { %1188 = vpow2.f32 %v524_v40 }
 0x225   : > { %v1189_v41 = vpop.eup %1188 }
 0x226   : > { %v526_v42 = vsel %vm499_vm1, %v1189_v41, 0.0 }
 0x227   : > { %527 = vadd.xlane.f32.xlu1 %v526_v42 }
 0x228   : > { %v583_v43 = vpop.xlane.xlu2 %582 }
 0x229   : > { %v584_v46 = vsub.f32 %v580_v28, %v583_v43  ;;  %v1325_v43 = vmov 32.0  }
 0x22b   : > { %v585_v48 = vmul.f32 1.442695, %v584_v46 }
 0x230   : > { %v647_v44 = vpop.xlane.xlu2 %646 }
 0x231   : > { %v648_v45 = vsub.f32 %v644_v31, %v647_v44  ;;  %v1106_v31 = vld [vmem:[%s1592_s3 + $0x8] sm:$0xff] }
 0x232   : > { %779 = vmatpush.bf16.msra.mxu0 %v1106_v31 }
 0x233   : > { %v649_v47 = vmul.f32 1.442695, %v648_v45 }
 0x235   : > { %1190 = vpow2.f32 %v649_v47 }
 0x236   : > { %1192 = vpow2.f32 %v585_v48  ;;  %780 = vmatpush.bf16.msra.mxu0 %v1105_v32 }
 0x238   : > { %v533_v49 = vpop.permute.xlu2 %532  ;;  %v711_v50 = vpop.xlane.xlu0 %710 }
 0x239   : > { %v539_v51 = vsel %vm537_vm2, %v533_v49, 0  ;;  %v712_v53 = vsub.f32 %v708_v35, %v711_v50 }
 0x23a   : > { %548 = vmatpush.bf16.msra.mxu2 %v539_v51 }
 0x23b   : > { %v1191_v52 = vpop.eup %1190  ;;  %v713_v55 = vmul.f32 1.442695, %v712_v53 }
 0x23c   : > { %v651_v54 = vsel %vm499_vm1, %v1191_v52, 0.0  ;;  %v1193_v56 = vpop.eup %1192 }
 0x23d   : > { %652 = vadd.xlane.f32.xlu0 %v651_v54  ;;  %1194 = vpow2.f32 %v713_v55  ;;  %v587_v57 = vsel %vm499_vm1, %v1193_v56, 0.0  ;;  %v1107_v55 = vld [vmem:[#allocation3] sm:$0xff] }
 0x240   : > { %593 = vrot.lane.b32.xlu1 %v1473_v9, %s1320_s30  ;;  %v722_v1 = vpop.permute.xlu2 %721 }
 0x241   : > { %v727_v5 = vsel %vm537_vm2, %v722_v1, 0 }
 0x243   : > { %v1195_v58 = vpop.eup %1194 }
 0x244   : > { %v715_v59 = vsel %vm499_vm1, %v1195_v58, 0.0 }
 0x245   : > { %588 = vadd.xlane.f32.xlu0 %v587_v57 }
 0x24d   : > { %716 = vadd.xlane.f32.xlu0 %v715_v59  ;;  %v1111_v59 = vld [vmem:[%s1596_s7 + $0x10] sm:$0xff] }
 0x261   : > { %657 = vrot.lane.b32.xlu0 %v1473_v9, %s1321_s15  ;;  %s963_s15 = scalar_lea.hbm %s1602_s13, %s1100_s21 }
 0x262   : > { %s967_s0 = sshll.u32 %s963_s15, 4  ;;  %s968_s0 = int_to_ptr.hbm [resolvable:$true] %s967_s0 }
 0x263   : > { %s1254_s22 = sshra.s32 %s968_s0, 4  ;;  %s1255_s22 = int_to_ptr.hbm [resolvable:$true] %s1254_s22 }
 0x264   : > { %s1256_s21 = scalar_lea.hbm %s1255_s22, 8  ;;  %p1261_p3 = scmp.lt.s32.totalorder %s1255_s22, %s1602_s13 }
 0x265   : > { %p1257_p0 = scmp.ne.s32.totalorder %s1255_s22, %s1256_s21 }
 0x267   : > { %p1258_p1 = pnand %p1257_p0, %p1434_p5 }
 0x269   : > { %p1259_p2 = pneg %p1258_p1 }
 0x29a   : > { %v528_v60 = vpop.xlane.xlu1 %527 }
 0x29b   : > { %1196 = vrcp.f32 %v528_v60 }
 0x2a1   : > { %v1197_v61 = vpop.eup %1196 }
 0x2a2   : > { %v530_v62 = vmul.f32 %v1197_v61, %v1189_v41  ;;  %v1110_v61 = vld [vmem:[%s1596_s7 + $0x8] sm:$0xff] }
 0x2a4   : > { %v531_v63 = vpack.c.bf16 %v530_v62, %v530_v62 }
 0x2a6   : > { %1057 = vmatmul.msk.bf16.vlgmr.msra.gmra.mxu2 %vm499_vm1, %v531_v63 }
 0x2b0   : > { %v653_v0 = vpop.xlane.xlu0 %652 }
 0x2b2   : > { %v594_v3 = vpop.permute.xlu1 %593 }
 0x2b3   : > { %v599_v4 = vsel %vm537_vm2, %v594_v3, 0 }
 0x2b4   : > { %608 = vmatpush.bf16.msrb.mxu2 %v599_v4 }
 0x2b8   : > { %736 = vmatpush.bf16.msra.mxu2 %v727_v5  ;;  %v589_v6 = vpop.xlane.xlu0 %588  ;;  %v1182_v5 = vld [vmem:[%s1598_s9] ss:$0 sm:$0xff] }
 0x2b9   : > { %1198 = vrcp.f32 %v589_v6 }
 0x2bf   : > { %v1199_v7 = vpop.eup %1198 }
 0x2c0   : > { %v591_v8 = vmul.f32 %v1199_v7, %v1193_v56  ;;  %v717_v9 = vpop.xlane.xlu0 %716  ;;  %v1112_v56 = vld [vmem:[%s1596_s7 + $0x18] sm:$0xff]  ;;  %v1183_v7 = vld [vmem:[%s1599_s10] ss:$0 sm:$0xff] }
 0x2c1   : > { %1200 = vrcp.f32 %v717_v9  ;;  %909 = vmatpush.bf16.msra.mxu3 %v1112_v56 }
 0x2c2   : > { %v592_v10 = vpack.c.bf16 %v591_v8, %v591_v8  ;;  %1202 = vrcp.f32 %v653_v0 }
 0x2c3   : > { %1204 = vrcp.f32 %v1325_v43 }
 0x2c4   : > { %1059 = vmatmul.msk.bf16.vlgmr.msrb.gmra.mxu2 %vm499_vm1, %v592_v10 }
 0x2c5   : > { %910 = vmatpush.bf16.msra.mxu3 %v1111_v59 }
 0x2c7   : > { %v1201_v11 = vpop.eup %1200 }
 0x2c8   : > { %v719_v12 = vmul.f32 %v1201_v11, %v1195_v58  ;;  %v1203_v13 = vpop.eup %1202 }
 0x2c9   : > { %v655_v14 = vmul.f32 %v1203_v13, %v1191_v52  ;;  %v1205_v44 = vpop.eup %1204  ;;  %911 = vmatpush.bf16.msra.mxu3 %v1110_v61  ;;  %v1184_v13 = vld [vmem:[%s1595_s6] ss:$0 sm:$0xff] }
 0x2ca   : > { %v720_v15 = vpack.c.bf16 %v719_v12, %v719_v12  ;;  %v793_v45 = vmul.f32 32.0, %v1205_v44  ;;  %vm797_vm7 = vweird.f32 %v1205_v44  ;;  %v1109_v12 = vld [vmem:[%s1596_s7] sm:$0xff] }
 0x2cb   : > { %v656_v18 = vpack.c.bf16 %v655_v14, %v655_v14 }
 0x2cc   : > { %v794_v46 = vsub.f32 1.0, %v793_v45 }
 0x2cd   : > { %912 = vmatpush.bf16.msra.mxu3 %v1109_v12 }
 0x2ce   : > { %v795_v47 = vmul.f32 %v1205_v44, %v794_v46 }
 0x2d0   : > { %v796_v48 = vadd.f32 %v1205_v44, %v795_v47 }
 0x2d2   : > { %v798_v49 = vsel %vm797_vm7, %v1205_v44, %v796_v48 }
 0x2d3   : > { %v658_v16 = vpop.permute.xlu0 %657 }
 0x2d4   : > { %1063 = vmatmul.msk.bf16.vlgmr.msra.gmra.mxu2 %vm499_vm1, %v720_v15  ;;  %v663_v17 = vsel %vm537_vm2, %v658_v16, 0 }
 0x2d5   : > { %672 = vmatpush.bf16.msrb.mxu1 %v663_v17 }
 0x2d8   : > { %1061 = vmatmul.msk.bf16.vlgmr.msrb.gmra.mxu1 %vm499_vm1, %v656_v18 }
 0x329   : > { %v550_v19 = vpop.f32.mrf.mxu2 }
 0x32a   : > { %v554_v20 = vpack.c.bf16 %v550_v19, %v550_v19  ;;  %v1185_v19 = vld [vmem:[%s1597_s8] ss:$0 sm:$0xff] }
 0x32c   : > { %556 = vst.msk [vmem:[#allocation2] sm:$0xf] %vm555_vm3, %v554_v20 }
 0x331   : > { %v552_v21 = vpop.f32.mrf.mxu2 }
 0x347   : > { %v610_v22 = vpop.f32.mrf.mxu2 }
 0x348   : > { %v614_v23 = vpack.c.bf16 %v610_v22, %v610_v22 }
 0x34a   : > { %616 = vrot.lane.b32.xlu1 %v614_v23, %s1322_s5 }
 0x34f   : > { %v612_v24 = vpop.f32.mrf.mxu2 }
 0x355   : > { %v674_v25 = vpop.f32.mrf.mxu1 }
 0x356   : > { %v678_v26 = vpack.c.bf16 %v674_v25, %v674_v25 }
 0x357   : > { %v738_v27 = vpop.f32.mrf.mxu2 }
 0x358   : > { %v742_v28 = vpack.c.bf16 %v738_v27, %v738_v27  ;;  %680 = vrot.lane.b32.xlu2 %v678_v26, %s1323_s27 }
 0x35a   : > { %744 = vrot.lane.b32.xlu1 %v742_v28, %s1324_s17  ;;  %s448_s17 = scalar_lea.vmem [#allocation6], %s1045_s20  ;;  %s1260_s20 = scalar_lea.hbm %s1602_s13, 16 }
 0x35b   : > { %s965_s29 = sshll.u32 %s448_s17, 4  ;;  %p1262_p4 = scmp.lt.s32.totalorder %s1260_s20, %s1256_s21  ;;  %s966_s29 = int_to_ptr.vmem [resolvable:$true] %s965_s29 }
 0x35d   : > { %v676_v29 = vpop.f32.mrf.mxu1  ;;  %p1263_p7 = por %p1262_p4, %p1261_p3 }
 0x35f   : > { %v740_v30 = vpop.f32.mrf.mxu2  ;;  %p1264_p8 = pnand %p1263_p7, %p1259_p2 }
 0x3b2   : > { %v681_v34 = vpop.permute.xlu2 %680 }
 0x3bc   : > { %v617_v33 = vpop.permute.xlu1 %616 }
 0x3bd   : > { %620 = vst.msk [vmem:[#allocation2] sm:$0xf] %vm619_vm4, %v617_v33 }
 0x3be   : > { %684 = vst.msk [vmem:[#allocation2] sm:$0xf] %vm683_vm5, %v681_v34 }
 0x3cc   : > { %v745_v35 = vpop.permute.xlu1 %744 }
 0x3cd   : > { %748 = vst.msk [vmem:[#allocation2] sm:$0xf] %vm747_vm6, %v745_v35 }
 0x3d4   : > { %v749_v36 = vld [vmem:[#allocation2] sm:$0xf] }
 0x3d5   : > { %1072 = vmatmul.msk.bf16.vlgmr.msra.gmra.mxu0 %vm476_vm0, %v749_v36 }
 0x452   : > { %v782_v38 = vpop.f32.mrf.mxu0 }
 0x453   : > { %v783_v39 = vadd.f32 %v1181_v37, %v782_v38 }
 0x455   : > { %v786_v40 = vadd.f32 %v783_v39, %v1465_v2  ;;  %v1108_v2 = vld [vmem:[#allocation3 + $0x8] sm:$0xff]  ;;  %v1186_v39 = vld [vmem:[%s1600_s11] ss:$0 sm:$0xff] }
 0x456   : > { %856 = vmatpush.bf16.msra.mxu1 %v1108_v2 }
 0x457   : > { %v789_v41 = vsel %vm476_vm0, %v786_v40, 0.0 }
 0x458   : > { %790 = vadd.xlane.f32.xlu2 %v789_v41 }
 0x45a   : > { %v784_v42 = vpop.f32.mrf.mxu0  ;;  %857 = vmatpush.bf16.msra.mxu1 %v1107_v55 }
 0x45b   : > { %v1187_v42 = vld [vmem:[%s1601_s12] ss:$0 sm:$0xff] }
 0x4cb   : > { %v791_v50 = vpop.xlane.xlu2 %790 }
 0x4cc   : > { %v799_v51 = vmul.f32 %v798_v49, %v791_v50 }
 0x4ce   : > { %v800_v52 = vsub.f32 %v786_v40, %v799_v51 }
 0x4d0   : > { %v801_v53 = vmul.f32 %v800_v52, %v800_v52 }
 0x4d2   : > { %v802_v54 = vsel %vm476_vm0, %v801_v53, 0.0 }
 0x4d3   : > { %803 = vadd.xlane.f32.xlu1 %v802_v54 }
 0x546   : > { %v804_v57 = vpop.xlane.xlu1 %803 }
 0x547   : > { %v805_v58 = vmul.f32 %v804_v57, %v798_v49 }
 0x549   : > { %v806_v60 = vadd.f32 1e-05, %v805_v58 }
 0x54b   : > { %1206 = vrsqrt.f32 %v806_v60  ;;  %vm813_vm9 = vweird.f32 %v806_v60 }
 0x551   : > { %v1207_v62 = vpop.eup %1206 }
 0x552   : > { %v808_v63 = vmul.f32 %v1207_v62, %v806_v60  ;;  %vm814_vm8 = vweird.f32 %v1207_v62 }
 0x553   : > { %vm815_vm10 = vmor %vm813_vm9, %vm814_vm8 }
 0x554   : > { %v809_v0 = vmul.f32 %v1207_v62, %v808_v63 }
 0x556   : > { %v810_v1 = vmul.f32 0.5, %v809_v0 }
 0x558   : > { %v811_v3 = vsub.f32 1.5, %v810_v1 }
 0x55a   : > { %v812_v4 = vmul.f32 %v1207_v62, %v811_v3 }
 0x55c   : > { %v816_v6 = vsel %vm815_vm10, %v1207_v62, %v812_v4 }
 0x55d   : > { %v817_v8 = vmul.f32 %v816_v6, %v800_v52 }
 0x55f   : > { %v821_v9 = vmul.f32 %v1182_v5, %v817_v8 }
 0x561   : > { %v825_v10 = vadd.f32 %v1183_v7, %v821_v9 }
 0x563   : > { %v826_v11 = vpack.c.bf16 %v825_v10, %v825_v10 }
 0x565   : > { %1081 = vmatmul.msk.bf16.vlgmr.msra.gmra.mxu1 %vm476_vm0, %v826_v11 }
 0x5e2   : > { %v859_v14 = vpop.f32.mrf.mxu1 }
 0x5e3   : > { %v860_v15 = vadd.f32 %v1184_v13, %v859_v14 }
 0x5e5   : > { %v863_v16 = vmax.f32 %v860_v15, 0.0 }
 0x5e7   : > { %v864_v17 = vpack.c.bf16 %v863_v16, %v863_v16 }
 0x5e9   : > { %1098 = vmatmul.msk.bf16.vlgmr.msra.gmra.mxu3 %vm901_vm11, %v864_v17 }
 0x5ea   : > { %v861_v18 = vpop.f32.mrf.mxu1 }
 0x66c   : > { %v914_v20 = vpop.f32.mrf.mxu3 }
 0x66d   : > { %v915_v21 = vadd.f32 %v1185_v19, %v914_v20 }
 0x66f   : > { %v918_v22 = vadd.f32 %v915_v21, %v825_v10 }
 0x671   : > { %v921_v23 = vsel %vm476_vm0, %v918_v22, 0.0 }
 0x672   : > { %922 = vadd.xlane.f32.xlu0 %v921_v23 }
 0x674   : > { %v916_v24 = vpop.f32.mrf.mxu3 }
 0x6e5   : > { %v923_v25 = vpop.xlane.xlu0 %922 }
 0x6e6   : > { %v924_v26 = vmul.f32 %v923_v25, %v798_v49 }
 0x6e8   : > { %v925_v27 = vsub.f32 %v918_v22, %v924_v26 }
 0x6ea   : > { %v926_v28 = vmul.f32 %v925_v27, %v925_v27 }
 0x6ec   : > { %v927_v29 = vsel %vm476_vm0, %v926_v28, 0.0 }
 0x6ed   : > { %928 = vadd.xlane.f32.xlu2 %v927_v29 }
 0x760   : > { %v929_v30 = vpop.xlane.xlu2 %928 }
 0x761   : > { %v930_v31 = vmul.f32 %v929_v30, %v798_v49 }
 0x763   : > { %v931_v32 = vadd.f32 1e-05, %v930_v31 }
 0x765   : > { %1208 = vrsqrt.f32 %v931_v32  ;;  %vm938_vm13 = vweird.f32 %v931_v32 }
 0x76b   : > { %v1209_v33 = vpop.eup %1208 }
 0x76c   : > { %v933_v34 = vmul.f32 %v1209_v33, %v931_v32  ;;  %vm939_vm12 = vweird.f32 %v1209_v33 }
 0x76d   : > { %vm940_vm14 = vmor %vm938_vm13, %vm939_vm12 }
 0x76e   : > { %v934_v35 = vmul.f32 %v1209_v33, %v933_v34 }
 0x770   : > { %v935_v36 = vmul.f32 0.5, %v934_v35 }
 0x772   : > { %v936_v37 = vsub.f32 1.5, %v935_v36 }
 0x774   : > { %v937_v38 = vmul.f32 %v1209_v33, %v936_v37 }
 0x776   : > { %v941_v40 = vsel %vm940_vm14, %v1209_v33, %v937_v38 }
 0x777   : > { %v942_v41 = vmul.f32 %v941_v40, %v925_v27 }
 0x779   : > { %v946_v43 = vmul.f32 %v1186_v39, %v942_v41 }
 0x77b   : > { %v950_v44 = vadd.f32 %v1187_v42, %v946_v43 }
 0x77d   : > { %951 = vst.msk [vmem:[%s448_s17] sm:$0xff] %vm476_vm0, %v950_v44 }
 0x77e   : > { %1267 = shalt.err (!%p1264_p8)
}
 0x77f   : > { %1117 = dma.vmem_to_hbm [thread:$0]  (%p1434_p5), %s966_s29, 128, %s968_s0, %s953_s23  }
 0x780 PF: > { %p1129_p9 = scmp.ge.s32.totalorder %s1306_s28, 2  ;;  %s979_s16 = sand.u32 1, %s1294_s25  }
 0x781   : > { %s980_s27 = scalar_lea.sflag [#allocation5], %s979_s16 }
 0x782   : > { %p1124_p10 = pnand %p1129_p9, %p1438_p6 }
 0x784   : > { %p1125_p11 = pneg %p1124_p10 }
 0x786   : > { %1289 = dma.done.wait (%p1125_p11), %s980_s27, 128  }
 0x787   : > { %1291 = vsyncadd (%p1125_p11), %s980_s27, 4294967168  ;;  %s1612_s17 = sld [smem:[#allocation9_spill]]  ;;  %p24_p12 = scmp.ge.s32.totalorder %s1421_s14, 4  }
 0x788   : > { %s1613_s27 = sld [smem:[#allocation10_spill]]  ;;  %s1614_s25 = smov %s1298_s26 }
 0x789   : > { %s1616_s28 = smov %s1421_s14  ;;  %26 = sbr.rel (!%p24_p12) target bundleno = 7 (0x7), region = 112 }
 0x78d   : > { %s1615_s26 = smov %s1612_s17 }
 0x78e   :  { %986 = vsyncpa [#allocation4], 1 }
 0x78f   :  { %988 = vsyncpa [#allocation4 + $0x1], 1 }
 0x790   :  { %989 = vsyncpa [#allocation5], 1 }
 0x791   :  { %991 = vsyncpa [#allocation5 + $0x1], 1 }

// kernel: tpu_custom_call.1
= control target key start
LH: loop header
LB: loop body
LE: loop exit
PB: predicated region body
PF: predicated region fallthrough
CT: control target
= control target key end

     0   :  { %s1589_s0 = inlined_call_operand.vmem [shape: f32[16,32], index: 0, kind: input, shape index: {}]   ;;  %s1590_s1 = inlined_call_operand.vmem [shape: bf16[32,96], index: 1, kind: input, shape index: {}]   ;;  %s1591_s2 = inlined_call_operand.vmem [shape: f32[1,96], index: 2, kind: input, shape index: {}]   ;;  %s1592_s3 = inlined_call_operand.vmem [shape: bf16[32,32], index: 3, kind: input, shape index: {}]   ;;  %s1593_s4 = inlined_call_operand.vmem [shape: f32[1,32], index: 4, kind: input, shape index: {}]   ;;  %s1594_s5 = inlined_call_operand.hbm [shape: bf16[32,64], index: 5, kind: input, shape index: {}]   ;;  %s1595_s6 = inlined_call_operand.vmem [shape: f32[1,64], index: 6, kind: input, shape index: {}]   ;;  %s1596_s7 = inlined_call_operand.vmem [shape: bf16[64,32], index: 7, kind: input, shape index: {}]   ;;  %s1597_s8 = inlined_call_operand.vmem [shape: f32[1,32], index: 8, kind: input, shape index: {}]   ;;  %s1598_s9 = inlined_call_operand.vmem [shape: f32[1,32], index: 9, kind: input, shape index: {}]   ;;  %s1599_s10 = inlined_call_operand.vmem [shape: f32[1,32], index: 10, kind: input, shape index: {}]   ;;  %s1600_s11 = inlined_call_operand.vmem [shape: f32[1,32], index: 11, kind: input, shape index: {}]   ;;  %s1601_s12 = inlined_call_operand.vmem [shape: f32[1,32], index: 12, kind: input, shape index: {}]   ;;  %s1602_s13 = inlined_call_operand.hbm [shape: f32[16,32], index: 13, kind: output, shape index: {}]  }
   0x1   :  { %1604 = sst [smem:[#allocation11_spill]] %s1589_s0 }
   0x2   :  { %1605 = sst [smem:[#allocation12_spill]] %s1594_s5 }
   0x3   :  { %18 = vsyncpa [#allocation4], 0 }
   0x4   :  { %19 = vsyncpa [#allocation5], 0 }
   0x5   :  { %21 = vsyncpa [#allocation5 + $0x1], 0  ;;  %s1396_s25 = smov 0   ;;  %s1398_s26 = smov 0  }
   0x6   :  { %s1400_s27 = smov 0   ;;  %s1402_s28 = smov 0  }
   0x7 LB: > { %1606 = sst [smem:[#allocation9_spill]] %s1302_s27  ;;  %s1417_s29 = sadd.s32 4294967295, %s1306_s28   ;;  %s1306_s28 = sphi %s1402_s28, %s1616_s28   ;;  %s1302_s27 = sphi %s1400_s27, %s1613_s27   ;;  %s1298_s26 = sphi %s1398_s26, %s1615_s26   ;;  %s1294_s25 = sphi %s1396_s25, %s1614_s25  }
   0x8   : > { %s1039_s30 = sadd.s32 4294967294, %s1306_s28   ;;  %s1421_s14 = sadd.s32 1, %s1306_s28  }
   0x9   : > { %s312_s15 = sadd.s32 1, %s1302_s27  ;;  %s309_s16 = ssub.s32 %s1306_s28, %s1421_s14 }
   0xa   : > { %p322_p0 = scmp.ne.s32.totalorder %s1302_s27, %s1298_s26  ;;  %p310_p1 = scmp.eq.s32.totalorder %s309_s16, 0 }
   0xb   : > { %p323_p2 = scmp.eq.s32.totalorder %s1417_s29, 1  ;;  %p328_p3 = scmp.ne.s32.totalorder %s1298_s26, %s1294_s25 }
   0xc   : > { %p329_p4 = scmp.eq.s32.totalorder %s1039_s30, 1  ;;  %p1040_p7 = scmp.ge.s32.totalorder %s1306_s28, 1 }
   0xd   : > { %s1432_s17 = scalar_select %p310_p1, %s1302_s27, %s312_s15  }
   0xe   : > { %p1434_p5 = por %p323_p2, %p322_p0  ;;  %p1438_p6 = por %p329_p4, %p328_p3 }
   0xf   : > { %1607 = sst [smem:[#allocation10_spill]] %s1432_s17  ;;  %p336_p8 = scmp.lt.s32.totalorder %s1306_s28, 3 }
  0x10   : > { %p1127_p9 = scmp.eq.s32.totalorder %s1417_s29, 0  ;;  %s1610_s5 = sld [smem:[#allocation12_spill]] }
  0x11   : > { %p337_p10 = pnand %p1040_p7, %p336_p8  ;;  %s1308_s23 = smov [#allocation3]  }
  0x12   : > { %s361_s24 = sshll.u32 %s1308_s23, 4  ;;  %s1309_s30 = smov 64   ;;  %s362_s24 = int_to_ptr.vmem [resolvable:$true] %s361_s24 }
  0x13   : > { %p1119_p11 = pneg %p337_p10  ;;  %s1310_s15 = smov 4  }
  0x14   : > { %405 = sbr.rel (%p337_p10) target bundleno = 1920 (0x780), region = 72 }
  0x15   : > { %p1120_p12 = pnand %p1127_p9, %p1119_p11 }
  0x16   : > { %s359_s22 = sshll.u32 %s1610_s5, 4  ;;  %s360_s22 = int_to_ptr.hbm [resolvable:$true] %s359_s22 }
  0x17   : > { %1122 = dma.hbm_to_vmem [thread:$0]  (!%p1120_p12), %s360_s22, 256, %s362_s24, [#allocation4], %s1309_s30, %s1309_s30, %s1310_s15  }
  0x19   : > { %1285 = dma.done.wait (%p1127_p9), [#allocation4], 256  }
  0x1a   : > { %1287 = vsyncadd (%p1127_p9), [#allocation4], 4294967040  ;;  %p449_p13 = scmp.lt.s32.totalorder %s1417_s29, 1  ;;  %s1611_s0 = sld [smem:[#allocation11_spill]]  ;;  %v1104_v0 = vld [vmem:[%s1590_s1 + $0x8] sm:$0xff]  ;;  %v1103_v1 = vld [vmem:[%s1590_s1] sm:$0xff] }
  0x1b   : > { %486 = vmatpush.bf16.msra.mxu0 %v1104_v0  ;;  %vm476_vm0 = vcmask 261120   ;;  %v1180_v4 = vld [vmem:[%s1591_s2] ss:$0 sm:$0xff]  ;;  %s1312_s27 = smov 120   ;;  %s1313_s17 = smov 96   ;;  %vm499_vm1 = vcmask 64512  }
  0x1c   : > { %s450_s16 = scalar_select %p449_p13, %s1417_s29, 1  ;;  %vm537_vm2 = vcmask 1043456   ;;  %vm555_vm3 = vcmask 60416   ;;  %vm619_vm4 = vcmask 126016   ;;  %vm683_vm5 = vcmask 191616  }
  0x1d   : > { %s1316_s21 = smov 88   ;;  %s1317_s23 = smov 112   ;;  %vm747_vm6 = vcmask 257216   ;;  %vm901_vm11 = vcmask 523264  }
  0x1e   : > { %s1046_s20 = sshll.u32 %s450_s16, 3  ;;  %s1314_s16 = smov 80  }
  0x1f   : > { %487 = vmatpush.bf16.msra.mxu0 %v1103_v1  ;;  %s1318_s22 = smov 64   ;;  %s1319_s24 = smov 40  }
  0x20   : > { %s452_s5 = scalar_lea.vmem %s1611_s0, %s1046_s20  ;;  %s1315_s20 = smov 72  }
  0x21   : > { %v1465_v2 = vld [vmem:[%s452_s5] sm:$0xff]  ;;  %s1311_s5 = smov 104   ;;  %s1320_s30 = smov 56  }
  0x22   : > { %v455_v3 = vpack.c.bf16 %v1465_v2, %v1465_v2  ;;  %s1321_s15 = smov 48  }
  0x24   : > { %1055 = vmatmul.msk.bf16.vlgmr.msra.gmra.mxu0 %vm476_vm0, %v455_v3 }
  0xa1   : > { %v489_v5 = vpop.f32.mrf.mxu0 }
  0xa2   : > { %v490_v6 = vadd.f32 %v1180_v4, %v489_v5 }
  0xa4   : > { %v493_v7 = vpack.c.bf16 %v490_v6, %v490_v6 }
  0xa6   : > { %v495_v8 = vunpack.c.l.b16 %v493_v7 }
  0xa8   : > { %v1473_v9 = vpack.c.b16 %v495_v8, %v495_v8 }
  0xa9   : > { %v491_v10 = vpop.f32.mrf.mxu0 }
  0xaa   : > { %685 = vrot.lane.b32.xlu2 %v1473_v9, %s1311_s5  ;;  %557 = vrot.lane.b32.xlu1 %v1473_v9, %s1312_s27  ;;  %s1322_s5 = smov 8   ;;  %s1323_s27 = smov 16  }
  0xab   : > { %497 = vrot.lane.b32.xlu0 %v1473_v9, %s1313_s17  ;;  %s1324_s17 = smov 24  }
  0xb2   : > { %623 = vrot.lane.b32.xlu2 %v1473_v9, %s1314_s16  ;;  %687 = vrot.lane.b32.xlu1 %v1473_v9, %s1315_s20  ;;  %s446_s16 = sand.u32 1, %s1298_s26  }
  0xb3   : > { %559 = vrot.lane.b32.xlu0 %v1473_v9, %s1316_s21  ;;  %s1045_s20 = sshll.u32 %s446_s16, 3  ;;  %s1100_s21 = sshll.u32 %s1417_s29, 3 }
  0xbb   : > { %621 = vrot.lane.b32.xlu0 %v1473_v9, %s1317_s23  ;;  %s953_s23 = scalar_lea.sflag [#allocation5], %s446_s16 }
 0x104   : > { %v686_v11 = vpop.permute.xlu2 %685 }
 0x10c   : > { %v624_v12 = vpop.permute.xlu2 %623 }
 0x10d   : > { %v629_v13 = vsel %vm499_vm1, %v624_v12, 0 }
 0x10e   : > { %638 = vmatpush.bf16.xpose.msrb.mxu0 %v629_v13 }
 0x11c   : > { %v558_v14 = vpop.permute.xlu1 %557 }
 0x11d   : > { %v498_v15 = vpop.permute.xlu0 %497 }
 0x11e   : > { %v504_v16 = vsel %vm499_vm1, %v498_v15, 0 }
 0x11f   : > { %513 = vmatpush.bf16.xpose.msra.mxu1 %v504_v16 }
 0x124   : > { %v688_v17 = vpop.permute.xlu1 %687 }
 0x125   : > { %v560_v18 = vpop.permute.xlu0 %559  ;;  %v693_v19 = vsel %vm499_vm1, %v688_v17, 0 }
 0x126   : > { %1056 = vmatmul.msk.bf16.vlgmr.msra.gmra.mxu1 %vm499_vm1, %v493_v7  ;;  %v565_v20 = vsel %vm499_vm1, %v560_v18, 0 }
 0x127   : > { %574 = vmatpush.bf16.xpose.msra.mxu3 %v565_v20 }
 0x12d   : > { %v622_v21 = vpop.permute.xlu0 %621 }
 0x12e   : > { %1058 = vmatmul.msk.bf16.vlgmr.msra.gmra.mxu3 %vm499_vm1, %v558_v14  ;;  %1060 = vmatmul.msk.bf16.vlgmr.msrb.gmra.mxu0 %vm499_vm1, %v622_v21 }
 0x12f   : > { %702 = vmatpush.bf16.xpose.msrb.mxu3 %v693_v19 }
 0x13e   : > { %1062 = vmatmul.msk.bf16.vlgmr.msrb.gmra.mxu3 %vm499_vm1, %v686_v11 }
 0x1a3   : > { %v515_v22 = vpop.f32.mrf.mxu1 }
 0x1a4   : > { %v519_v23 = vmul.f32 0.35355338, %v515_v22 }
 0x1a6   : > { %v520_v24 = vsel %vm499_vm1, %v519_v23, -inf }
 0x1a7   : > { %521 = vmax.xlane.f32.xlu1 %v520_v24 }
 0x1ab   : > { %v517_v25 = vpop.f32.mrf.mxu1  ;;  %v640_v26 = vpop.f32.mrf.mxu0 }
 0x1ac   : > { %v644_v31 = vmul.f32 0.35355338, %v640_v26 }
 0x1ae   : > { %v645_v33 = vsel %vm499_vm1, %v644_v31, -inf }
 0x1b1   : > { %v576_v27 = vpop.f32.mrf.mxu3 }
 0x1b2   : > { %v580_v28 = vmul.f32 0.35355338, %v576_v27 }
 0x1b3   : > { %v642_v29 = vpop.f32.mrf.mxu0 }
 0x1b4   : > { %v581_v30 = vsel %vm499_vm1, %v580_v28, -inf }
 0x1b5   : > { %582 = vmax.xlane.f32.xlu2 %v581_v30 }
 0x1b9   : > { %v578_v32 = vpop.f32.mrf.mxu3 }
 0x1ba   : > { %v1105_v32 = vld [vmem:[%s1592_s3] sm:$0xff] }
 0x1bd   : > { %646 = vmax.xlane.f32.xlu2 %v645_v33 }
 0x1c1   : > { %v704_v34 = vpop.f32.mrf.mxu3 }
 0x1c2   : > { %v708_v35 = vmul.f32 0.35355338, %v704_v34 }
 0x1c4   : > { %v709_v36 = vsel %vm499_vm1, %v708_v35, -inf }
 0x1c5   : > { %710 = vmax.xlane.f32.xlu0 %v709_v36 }
 0x1c9   : > { %v706_v37 = vpop.f32.mrf.mxu3 }
 0x1ca   : > { %v1181_v37 = vld [vmem:[%s1593_s4] ss:$0 sm:$0xff] }
 0x1d5   : > { %532 = vrot.lane.b32.xlu2 %v1473_v9, %s1318_s22 }
 0x1dd   : > { %721 = vrot.lane.b32.xlu2 %v1473_v9, %s1319_s24 }
 0x21a   : > { %v522_v38 = vpop.xlane.xlu1 %521 }
 0x21b   : > { %v523_v39 = vsub.f32 %v519_v23, %v522_v38 }
 0x21d   : > { %v524_v40 = vmul.f32 1.442695, %v523_v39 }
 0x21f   : > { %1188 = vpow2.f32 %v524_v40 }
 0x225   : > { %v1189_v41 = vpop.eup %1188 }
 0x226   : > { %v526_v42 = vsel %vm499_vm1, %v1189_v41, 0.0 }
 0x227   : > { %527 = vadd.xlane.f32.xlu1 %v526_v42 }
 0x228   : > { %v583_v43 = vpop.xlane.xlu2 %582 }
 0x229   : > { %v584_v46 = vsub.f32 %v580_v28, %v583_v43  ;;  %v1325_v43 = vmov 32.0  }
 0x22b   : > { %v585_v48 = vmul.f32 1.442695, %v584_v46 }
 0x230   : > { %v647_v44 = vpop.xlane.xlu2 %646 }
 0x231   : > { %v648_v45 = vsub.f32 %v644_v31, %v647_v44  ;;  %v1106_v31 = vld [vmem:[%s1592_s3 + $0x8] sm:$0xff] }
 0x232   : > { %779 = vmatpush.bf16.msra.mxu0 %v1106_v31 }
 0x233   : > { %v649_v47 = vmul.f32 1.442695, %v648_v45 }
 0x235   : > { %1190 = vpow2.f32 %v649_v47 }
 0x236   : > { %1192 = vpow2.f32 %v585_v48  ;;  %780 = vmatpush.bf16.msra.mxu0 %v1105_v32 }
 0x238   : > { %v533_v49 = vpop.permute.xlu2 %532  ;;  %v711_v50 = vpop.xlane.xlu0 %710 }
 0x239   : > { %v539_v51 = vsel %vm537_vm2, %v533_v49, 0  ;;  %v712_v53 = vsub.f32 %v708_v35, %v711_v50 }
 0x23a   : > { %548 = vmatpush.bf16.msra.mxu2 %v539_v51 }
 0x23b   : > { %v1191_v52 = vpop.eup %1190  ;;  %v713_v55 = vmul.f32 1.442695, %v712_v53 }
 0x23c   : > { %v651_v54 = vsel %vm499_vm1, %v1191_v52, 0.0  ;;  %v1193_v56 = vpop.eup %1192 }
 0x23d   : > { %652 = vadd.xlane.f32.xlu0 %v651_v54  ;;  %1194 = vpow2.f32 %v713_v55  ;;  %v587_v57 = vsel %vm499_vm1, %v1193_v56, 0.0  ;;  %v1107_v55 = vld [vmem:[#allocation3] sm:$0xff] }
 0x240   : > { %593 = vrot.lane.b32.xlu1 %v1473_v9, %s1320_s30  ;;  %v722_v1 = vpop.permute.xlu2 %721 }
 0x241   : > { %v727_v5 = vsel %vm537_vm2, %v722_v1, 0 }
 0x243   : > { %v1195_v58 = vpop.eup %1194 }
 0x244   : > { %v715_v59 = vsel %vm499_vm1, %v1195_v58, 0.0 }
 0x245   : > { %588 = vadd.xlane.f32.xlu0 %v587_v57 }
 0x24d   : > { %716 = vadd.xlane.f32.xlu0 %v715_v59  ;;  %v1111_v59 = vld [vmem:[%s1596_s7 + $0x10] sm:$0xff] }
 0x261   : > { %657 = vrot.lane.b32.xlu0 %v1473_v9, %s1321_s15  ;;  %s963_s15 = scalar_lea.hbm %s1602_s13, %s1100_s21 }
 0x262   : > { %s967_s0 = sshll.u32 %s963_s15, 4  ;;  %s968_s0 = int_to_ptr.hbm [resolvable:$true] %s967_s0 }
 0x263   : > { %s1254_s22 = sshra.s32 %s968_s0, 4  ;;  %s1255_s22 = int_to_ptr.hbm [resolvable:$true] %s1254_s22 }
 0x264   : > { %s1256_s21 = scalar_lea.hbm %s1255_s22, 8  ;;  %p1261_p3 = scmp.lt.s32.totalorder %s1255_s22, %s1602_s13 }
 0x265   : > { %p1257_p0 = scmp.ne.s32.totalorder %s1255_s22, %s1256_s21 }
 0x267   : > { %p1258_p1 = pnand %p1257_p0, %p1434_p5 }
 0x269   : > { %p1259_p2 = pneg %p1258_p1 }
 0x29a   : > { %v528_v60 = vpop.xlane.xlu1 %527 }
 0x29b   : > { %1196 = vrcp.f32 %v528_v60 }
 0x2a1   : > { %v1197_v61 = vpop.eup %1196 }
 0x2a2   : > { %v530_v62 = vmul.f32 %v1197_v61, %v1189_v41  ;;  %v1110_v61 = vld [vmem:[%s1596_s7 + $0x8] sm:$0xff] }
 0x2a4   : > { %v531_v63 = vpack.c.bf16 %v530_v62, %v530_v62 }
 0x2a6   : > { %1057 = vmatmul.msk.bf16.vlgmr.msra.gmra.mxu2 %vm499_vm1, %v531_v63 }
 0x2b0   : > { %v653_v0 = vpop.xlane.xlu0 %652 }
 0x2b2   : > { %v594_v3 = vpop.permute.xlu1 %593 }
 0x2b3   : > { %v599_v4 = vsel %vm537_vm2, %v594_v3, 0 }
 0x2b4   : > { %608 = vmatpush.bf16.msrb.mxu2 %v599_v4 }
 0x2b8   : > { %736 = vmatpush.bf16.msra.mxu2 %v727_v5  ;;  %v589_v6 = vpop.xlane.xlu0 %588  ;;  %v1182_v5 = vld [vmem:[%s1598_s9] ss:$0 sm:$0xff] }
 0x2b9   : > { %1198 = vrcp.f32 %v589_v6 }
 0x2bf   : > { %v1199_v7 = vpop.eup %1198 }
 0x2c0   : > { %v591_v8 = vmul.f32 %v1199_v7, %v1193_v56  ;;  %v717_v9 = vpop.xlane.xlu0 %716  ;;  %v1112_v56 = vld [vmem:[%s1596_s7 + $0x18] sm:$0xff]  ;;  %v1183_v7 = vld [vmem:[%s1599_s10] ss:$0 sm:$0xff] }
 0x2c1   : > { %1200 = vrcp.f32 %v717_v9  ;;  %909 = vmatpush.bf16.msra.mxu3 %v1112_v56 }
 0x2c2   : > { %v592_v10 = vpack.c.bf16 %v591_v8, %v591_v8  ;;  %1202 = vrcp.f32 %v653_v0 }
 0x2c3   : > { %1204 = vrcp.f32 %v1325_v43 }
 0x2c4   : > { %1059 = vmatmul.msk.bf16.vlgmr.msrb.gmra.mxu2 %vm499_vm1, %v592_v10 }
 0x2c5   : > { %910 = vmatpush.bf16.msra.mxu3 %v1111_v59 }
 0x2c7   : > { %v1201_v11 = vpop.eup %1200 }
 0x2c8   : > { %v719_v12 = vmul.f32 %v1201_v11, %v1195_v58  ;;  %v1203_v13 = vpop.eup %1202 }
 0x2c9   : > { %v655_v14 = vmul.f32 %v1203_v13, %v1191_v52  ;;  %v1205_v44 = vpop.eup %1204  ;;  %911 = vmatpush.bf16.msra.mxu3 %v1110_v61  ;;  %v1184_v13 = vld [vmem:[%s1595_s6] ss:$0 sm:$0xff] }
 0x2ca   : > { %v720_v15 = vpack.c.bf16 %v719_v12, %v719_v12  ;;  %v793_v45 = vmul.f32 32.0, %v1205_v44  ;;  %vm797_vm7 = vweird.f32 %v1205_v44  ;;  %v1109_v12 = vld [vmem:[%s1596_s7] sm:$0xff] }
 0x2cb   : > { %v656_v18 = vpack.c.bf16 %v655_v14, %v655_v14 }
 0x2cc   : > { %v794_v46 = vsub.f32 1.0, %v793_v45 }
 0x2cd   : > { %912 = vmatpush.bf16.msra.mxu3 %v1109_v12 }
 0x2ce   : > { %v795_v47 = vmul.f32 %v1205_v44, %v794_v46 }
 0x2d0   : > { %v796_v48 = vadd.f32 %v1205_v44, %v795_v47 }
 0x2d2   : > { %v798_v49 = vsel %vm797_vm7, %v1205_v44, %v796_v48 }
 0x2d3   : > { %v658_v16 = vpop.permute.xlu0 %657 }
 0x2d4   : > { %1063 = vmatmul.msk.bf16.vlgmr.msra.gmra.mxu2 %vm499_vm1, %v720_v15  ;;  %v663_v17 = vsel %vm537_vm2, %v658_v16, 0 }
 0x2d5   : > { %672 = vmatpush.bf16.msrb.mxu1 %v663_v17 }
 0x2d8   : > { %1061 = vmatmul.msk.bf16.vlgmr.msrb.gmra.mxu1 %vm499_vm1, %v656_v18 }
 0x329   : > { %v550_v19 = vpop.f32.mrf.mxu2 }
 0x32a   : > { %v554_v20 = vpack.c.bf16 %v550_v19, %v550_v19  ;;  %v1185_v19 = vld [vmem:[%s1597_s8] ss:$0 sm:$0xff] }
 0x32c   : > { %556 = vst.msk [vmem:[#allocation2] sm:$0xf] %vm555_vm3, %v554_v20 }
 0x331   : > { %v552_v21 = vpop.f32.mrf.mxu2 }
 0x347   : > { %v610_v22 = vpop.f32.mrf.mxu2 }
 0x348   : > { %v614_v23 = vpack.c.bf16 %v610_v22, %v610_v22 }
 0x34a   : > { %616 = vrot.lane.b32.xlu1 %v614_v23, %s1322_s5 }
 0x34f   : > { %v612_v24 = vpop.f32.mrf.mxu2 }
 0x355   : > { %v674_v25 = vpop.f32.mrf.mxu1 }
 0x356   : > { %v678_v26 = vpack.c.bf16 %v674_v25, %v674_v25 }
 0x357   : > { %v738_v27 = vpop.f32.mrf.mxu2 }
 0x358   : > { %v742_v28 = vpack.c.bf16 %v738_v27, %v738_v27  ;;  %680 = vrot.lane.b32.xlu2 %v678_v26, %s1323_s27 }
 0x35a   : > { %744 = vrot.lane.b32.xlu1 %v742_v28, %s1324_s17  ;;  %s448_s17 = scalar_lea.vmem [#allocation6], %s1045_s20  ;;  %s1260_s20 = scalar_lea.hbm %s1602_s13, 16 }
 0x35b   : > { %s965_s29 = sshll.u32 %s448_s17, 4  ;;  %p1262_p4 = scmp.lt.s32.totalorder %s1260_s20, %s1256_s21  ;;  %s966_s29 = int_to_ptr.vmem [resolvable:$true] %s965_s29 }
 0x35d   : > { %v676_v29 = vpop.f32.mrf.mxu1  ;;  %p1263_p7 = por %p1262_p4, %p1261_p3 }
 0x35f   : > { %v740_v30 = vpop.f32.mrf.mxu2  ;;  %p1264_p8 = pnand %p1263_p7, %p1259_p2 }
 0x3b2   : > { %v681_v34 = vpop.permute.xlu2 %680 }
 0x3bc   : > { %v617_v33 = vpop.permute.xlu1 %616 }
 0x3bd   : > { %620 = vst.msk [vmem:[#allocation2] sm:$0xf] %vm619_vm4, %v617_v33 }
 0x3be   : > { %684 = vst.msk [vmem:[#allocation2] sm:$0xf] %vm683_vm5, %v681_v34 }
 0x3cc   : > { %v745_v35 = vpop.permute.xlu1 %744 }
 0x3cd   : > { %748 = vst.msk [vmem:[#allocation2] sm:$0xf] %vm747_vm6, %v745_v35 }
 0x3d4   : > { %v749_v36 = vld [vmem:[#allocation2] sm:$0xf] }
 0x3d5   : > { %1072 = vmatmul.msk.bf16.vlgmr.msra.gmra.mxu0 %vm476_vm0, %v749_v36 }
 0x452   : > { %v782_v38 = vpop.f32.mrf.mxu0 }
 0x453   : > { %v783_v39 = vadd.f32 %v1181_v37, %v782_v38 }
 0x455   : > { %v786_v40 = vadd.f32 %v783_v39, %v1465_v2  ;;  %v1108_v2 = vld [vmem:[#allocation3 + $0x8] sm:$0xff]  ;;  %v1186_v39 = vld [vmem:[%s1600_s11] ss:$0 sm:$0xff] }
 0x456   : > { %856 = vmatpush.bf16.msra.mxu1 %v1108_v2 }
 0x457   : > { %v789_v41 = vsel %vm476_vm0, %v786_v40, 0.0 }
 0x458   : > { %790 = vadd.xlane.f32.xlu2 %v789_v41 }
 0x45a   : > { %v784_v42 = vpop.f32.mrf.mxu0  ;;  %857 = vmatpush.bf16.msra.mxu1 %v1107_v55 }
 0x45b   : > { %v1187_v42 = vld [vmem:[%s1601_s12] ss:$0 sm:$0xff] }
 0x4cb   : > { %v791_v50 = vpop.xlane.xlu2 %790 }
 0x4cc   : > { %v799_v51 = vmul.f32 %v798_v49, %v791_v50 }
 0x4ce   : > { %v800_v52 = vsub.f32 %v786_v40, %v799_v51 }
 0x4d0   : > { %v801_v53 = vmul.f32 %v800_v52, %v800_v52 }
 0x4d2   : > { %v802_v54 = vsel %vm476_vm0, %v801_v53, 0.0 }
 0x4d3   : > { %803 = vadd.xlane.f32.xlu1 %v802_v54 }
 0x546   : > { %v804_v57 = vpop.xlane.xlu1 %803 }
 0x547   : > { %v805_v58 = vmul.f32 %v804_v57, %v798_v49 }
 0x549   : > { %v806_v60 = vadd.f32 1e-05, %v805_v58 }
 0x54b   : > { %1206 = vrsqrt.f32 %v806_v60  ;;  %vm813_vm9 = vweird.f32 %v806_v60 }
 0x551   : > { %v1207_v62 = vpop.eup %1206 }
 0x552   : > { %v808_v63 = vmul.f32 %v1207_v62, %v806_v60  ;;  %vm814_vm8 = vweird.f32 %v1207_v62 }
 0x553   : > { %vm815_vm10 = vmor %vm813_vm9, %vm814_vm8 }
 0x554   : > { %v809_v0 = vmul.f32 %v1207_v62, %v808_v63 }
 0x556   : > { %v810_v1 = vmul.f32 0.5, %v809_v0 }
 0x558   : > { %v811_v3 = vsub.f32 1.5, %v810_v1 }
 0x55a   : > { %v812_v4 = vmul.f32 %v1207_v62, %v811_v3 }
 0x55c   : > { %v816_v6 = vsel %vm815_vm10, %v1207_v62, %v812_v4 }
 0x55d   : > { %v817_v8 = vmul.f32 %v816_v6, %v800_v52 }
 0x55f   : > { %v821_v9 = vmul.f32 %v1182_v5, %v817_v8 }
 0x561   : > { %v825_v10 = vadd.f32 %v1183_v7, %v821_v9 }
 0x563   : > { %v826_v11 = vpack.c.bf16 %v825_v10, %v825_v10 }
 0x565   : > { %1081 = vmatmul.msk.bf16.vlgmr.msra.gmra.mxu1 %vm476_vm0, %v826_v11 }
 0x5e2   : > { %v859_v14 = vpop.f32.mrf.mxu1 }
 0x5e3   : > { %v860_v15 = vadd.f32 %v1184_v13, %v859_v14 }
 0x5e5   : > { %v863_v16 = vmax.f32 %v860_v15, 0.0 }
 0x5e7   : > { %v864_v17 = vpack.c.bf16 %v863_v16, %v863_v16 }
 0x5e9   : > { %1098 = vmatmul.msk.bf16.vlgmr.msra.gmra.mxu3 %vm901_vm11, %v864_v17 }
 0x5ea   : > { %v861_v18 = vpop.f32.mrf.mxu1 }
 0x66c   : > { %v914_v20 = vpop.f32.mrf.mxu3 }
 0x66d   : > { %v915_v21 = vadd.f32 %v1185_v19, %v914_v20 }
 0x66f   : > { %v918_v22 = vadd.f32 %v915_v21, %v825_v10 }
 0x671   : > { %v921_v23 = vsel %vm476_vm0, %v918_v22, 0.0 }
 0x672   : > { %922 = vadd.xlane.f32.xlu0 %v921_v23 }
 0x674   : > { %v916_v24 = vpop.f32.mrf.mxu3 }
 0x6e5   : > { %v923_v25 = vpop.xlane.xlu0 %922 }
 0x6e6   : > { %v924_v26 = vmul.f32 %v923_v25, %v798_v49 }
 0x6e8   : > { %v925_v27 = vsub.f32 %v918_v22, %v924_v26 }
 0x6ea   : > { %v926_v28 = vmul.f32 %v925_v27, %v925_v27 }
 0x6ec   : > { %v927_v29 = vsel %vm476_vm0, %v926_v28, 0.0 }
 0x6ed   : > { %928 = vadd.xlane.f32.xlu2 %v927_v29 }
 0x760   : > { %v929_v30 = vpop.xlane.xlu2 %928 }
 0x761   : > { %v930_v31 = vmul.f32 %v929_v30, %v798_v49 }
 0x763   : > { %v931_v32 = vadd.f32 1e-05, %v930_v31 }
 0x765   : > { %1208 = vrsqrt.f32 %v931_v32  ;;  %vm938_vm13 = vweird.f32 %v931_v32 }
 0x76b   : > { %v1209_v33 = vpop.eup %1208 }
 0x76c   : > { %v933_v34 = vmul.f32 %v1209_v33, %v931_v32  ;;  %vm939_vm12 = vweird.f32 %v1209_v33 }
 0x76d   : > { %vm940_vm14 = vmor %vm938_vm13, %vm939_vm12 }
 0x76e   : > { %v934_v35 = vmul.f32 %v1209_v33, %v933_v34 }
 0x770   : > { %v935_v36 = vmul.f32 0.5, %v934_v35 }
 0x772   : > { %v936_v37 = vsub.f32 1.5, %v935_v36 }
 0x774   : > { %v937_v38 = vmul.f32 %v1209_v33, %v936_v37 }
 0x776   : > { %v941_v40 = vsel %vm940_vm14, %v1209_v33, %v937_v38 }
 0x777   : > { %v942_v41 = vmul.f32 %v941_v40, %v925_v27 }
 0x779   : > { %v946_v43 = vmul.f32 %v1186_v39, %v942_v41 }
 0x77b   : > { %v950_v44 = vadd.f32 %v1187_v42, %v946_v43 }
 0x77d   : > { %951 = vst.msk [vmem:[%s448_s17] sm:$0xff] %vm476_vm0, %v950_v44 }
 0x77e   : > { %1267 = shalt.err (!%p1264_p8)
}
 0x77f   : > { %1117 = dma.vmem_to_hbm [thread:$0]  (%p1434_p5), %s966_s29, 128, %s968_s0, %s953_s23  }
 0x780 PF: > { %p1129_p9 = scmp.ge.s32.totalorder %s1306_s28, 2  ;;  %s979_s16 = sand.u32 1, %s1294_s25  }
 0x781   : > { %s980_s27 = scalar_lea.sflag [#allocation5], %s979_s16 }
 0x782   : > { %p1124_p10 = pnand %p1129_p9, %p1438_p6 }
 0x784   : > { %p1125_p11 = pneg %p1124_p10 }
 0x786   : > { %1289 = dma.done.wait (%p1125_p11), %s980_s27, 128  }
 0x787   : > { %1291 = vsyncadd (%p1125_p11), %s980_s27, 4294967168  ;;  %s1612_s17 = sld [smem:[#allocation9_spill]]  ;;  %p24_p12 = scmp.ge.s32.totalorder %s1421_s14, 4  }
 0x788   : > { %s1613_s27 = sld [smem:[#allocation10_spill]]  ;;  %s1614_s25 = smov %s1298_s26 }
 0x789   : > { %s1616_s28 = smov %s1421_s14  ;;  %26 = sbr.rel (!%p24_p12) target bundleno = 7 (0x7), region = 112 }
 0x78d   : > { %s1615_s26 = smov %s1612_s17 }
 0x78e   :  { %986 = vsyncpa [#allocation4], 1 }
 0x78f   :  { %988 = vsyncpa [#allocation4 + $0x1], 1 }
 0x790   :  { %989 = vsyncpa [#allocation5], 1 }
 0x791   :  { %991 = vsyncpa [#allocation5 + $0x1], 1 }

</bundles_post_ra>
